<compile_context>
chip_gen: v7x
topology: tpu7x:2x2x1
jax: 0.10.0
libtpu: 0.0.40
codegen_flags: <defaults>
</compile_context>

<pallas_src>
import numpy as np
import jax
import jax.numpy as jnp
from jax.experimental import pallas as pl
from jax.experimental.pallas import tpu as pltpu


LANE = 128          # all channel dims are padded to this many lanes
MAX_CHUNK_S = 32    # source-chunk size for the running-max aggregation

_VMEM = pl.BlockSpec(memory_space=pltpu.MemorySpace.VMEM)


# ----------------------------------------------------------------------------
# Pallas kernel
# ----------------------------------------------------------------------------
def _chunked_masked_max(adj, xs, chunk):
    """Masked max over the source axis WITHOUT a full [T, S, D] temporary.

    adj: [T, S] 0/1 float32; xs: [S, D] -> returns [T, D].
    Targets with no neighbors stay at -1e30 (caller zeroes them via deg mask).
    """
    T, S = adj.shape
    D = xs.shape[1]
    neg = jnp.float32(-1e30)
    acc = jnp.full((T, D), neg, dtype=jnp.float32)
    for start in range(0, S, chunk):           # static chunks -> static slices
        c = min(chunk, S - start)
        a = adj[:, start:start + c]                                  # [T, c]
        xv = xs[start:start + c, :]                                  # [c, D]
        blk = jnp.where(a[:, :, None] > 0.0, xv[None, :, :], neg)    # [T, c, D]
        acc = jnp.maximum(acc, jnp.max(blk, axis=1))
    return acc


def _make_fused_kernel(num_layers, out_classes, chunk_s):
    """Builds the fused GraphSAGE++DA forward kernel (all layers + head)."""

    def kernel(*refs):
        x_ref = refs[0]
        layer_refs = [refs[1 + 7 * i: 1 + 7 * (i + 1)] for i in range(num_layers)]
        w_top_ref = refs[1 + 7 * num_layers]
        w_bot_ref = refs[2 + 7 * num_layers]
        b_head_ref = refs[3 + 7 * num_layers]
        out_ref = refs[-1]

        x_full = x_ref[...]                    # [N0, P] padded original features
        P = x_full.shape[1]
        x_mean = x_full
        x_max = x_full

        for i, (adj_ref, deg_ref, wl_m_ref, b_m_ref, wl_x_ref, b_x_ref,
                wr_cat_ref) in enumerate(layer_refs):
            adj = adj_ref[...]                 # [T, S] 0/1 float32
            deg = deg_ref[...]                 # [T, 1] in-degree
            T = adj.shape[0]
            # torch quirk: root features come from the ORIGINAL x every layer.
            x_tgt = x_full[:T, :]

            # ---- mean aggregation: MXU matmul + reciprocal * sum ----
            agg_sum = jnp.dot(adj, x_mean, preferred_element_type=jnp.float32)
            # One EUP reciprocal per target row instead of P divides per row.
            # approx=True is a further micro-win at ~1e-4 relative error; kept
            # exact here so the numerical check against the reference stays tight.
            inv_deg = pl.reciprocal(jnp.maximum(deg, 1.0), approx=False)
            agg_mean = agg_sum * inv_deg

            # ---- max aggregation: chunked running max (no [T,S,D] temp) ----
            agg_max = _chunked_masked_max(adj, x_max, chunk_s)
            agg_max = jnp.where(deg > 0.0, agg_max, 0.0)   # isolated targets -> 0

            # ---- lin_r(x_target) computed once for BOTH branches ----
            r = jnp.dot(x_tgt, wr_cat_ref[...],
                        preferred_element_type=jnp.float32)          # [T, 2P]

            out_m = (jnp.dot(agg_mean, wl_m_ref[...],
                             preferred_element_type=jnp.float32)
                     + b_m_ref[...] + r[:, :P])
            out_x = (jnp.dot(agg_max, wl_x_ref[...],
                             preferred_element_type=jnp.float32)
                     + b_x_ref[...] + r[:, P:])

            if i != num_layers - 1:
                x_mean = jnp.maximum(out_m, 0.0)
                x_max = jnp.maximum(out_x, 0.0)
            else:
                x_mean, x_max = out_m, out_x

        # ---- head: cat([x_mean, x_max]) @ post_w + b  == two split matmuls ----
        logits = (jnp.dot(x_mean, w_top_ref[...],
                          preferred_element_type=jnp.float32)
                  + jnp.dot(x_max, w_bot_ref[...],
                            preferred_element_type=jnp.float32)
                  + b_head_ref[...])                                  # [T, P]

        # log_softmax over the first `out_classes` lanes only (rest is padding)
        lane_idx = jax.lax.broadcasted_iota(jnp.int32, logits.shape, 1)
        valid = lane_idx < out_classes
        neg = jnp.float32(-1e30)
        masked = jnp.where(valid, logits, neg)
        m = jnp.max(masked, axis=-1, keepdims=True)
        z = masked - m
        sumexp = jnp.sum(jnp.where(valid, jnp.exp(z), 0.0), axis=-1, keepdims=True)
        out_ref[...] = z - jnp.log(sumexp)

    return kernel


# ----------------------------------------------------------------------------
# Wrapper: parameter packing + the single pallas_call
# ----------------------------------------------------------------------------
def _pad2(a, rows, cols):
    a = jnp.asarray(a, jnp.float32)
    return jnp.zeros((rows, cols), jnp.float32).at[:a.shape[0], :a.shape[1]].set(a)


def pack_params(params, lane=LANE):
    """Pad/pack the logical parameters into lane-dense kernel operands."""
    layers = []
    for lp in params["layers"]:
        wl_m = _pad2(lp["wl_mean"], lane, lane)
        wl_x = _pad2(lp["wl_max"], lane, lane)
        wr_cat = jnp.concatenate(
            [_pad2(lp["wr_mean"], lane, lane), _pad2(lp["wr_max"], lane, lane)],
            axis=1)                                                 # [lane, 2*lane]
        b_m = _pad2(lp["bl_mean"], 1, lane)
        b_x = _pad2(lp["bl_max"], 1, lane)
        layers.append((wl_m, b_m, wl_x, b_x, wr_cat))
    H = params["layers"][-1]["wl_mean"].shape[1]
    w_top = _pad2(params["post_w"][:H, :], lane, lane)
    w_bot = _pad2(params["post_w"][H:, :], lane, lane)
    b_head = _pad2(params["post_b"], 1, lane)
    return layers, (w_top, w_bot, b_head)


def graphsage_pp_da_forward(x, adjs, params, out_channels,
                            lane=LANE, chunk_s=MAX_CHUNK_S):
    """Mirrors GraphSAGEPlusPlusDA.forward with a single fused Pallas kernel.

    adjs: list of (adj_dense [T,S] f32, deg [T,1] f32, n_tgt int) per layer.
    """
    num_layers = len(params["layers"])
    assert len(adjs) == num_layers
    layer_w, (w_top, w_bot, b_head) = pack_params(params, lane)

    n0, din = x.shape
    x_pad = jnp.zeros((n0, lane), jnp.float32).at[:, :din].set(x)

    inputs = [x_pad]
    for (adj, deg, _n_tgt), (wl_m, b_m, wl_x, b_x, wr_cat) in zip(adjs, layer_w):
        inputs += [adj, deg, wl_m, b_m, wl_x, b_x, wr_cat]
    inputs += [w_top, w_bot, b_head]

    n_out = adjs[-1][2]
    kernel = _make_fused_kernel(num_layers, out_channels, chunk_s)
    out_pad = pl.pallas_call(
        kernel,
        out_shape=jax.ShapeDtypeStruct((n_out, lane), jnp.float32),
        in_specs=[_VMEM] * len(inputs),
        out_specs=_VMEM,
    )(*inputs)
    return out_pad[:, :out_channels]


# ----------------------------------------------------------------------------
# Parameter / graph construction and pure-JAX reference
# ----------------------------------------------------------------------------
def _lin_init(key, fan_in, fan_out):
    bound = 1.0 / np.sqrt(fan_in)
    return jax.random.uniform(key, (fan_in, fan_out), jnp.float32, -bound, bound)


def init_params(key, in_channels, hidden_channels, out_channels, num_layers):
    layers = []
    for i in range(num_layers):
        din = in_channels if i == 0 else hidden_channels
        key, *ks = jax.random.split(key, 7)
        layers.append({
            "wl_mean": _lin_init(ks[0], din, hidden_channels),
            "bl_mean": _lin_init(ks[1], din, hidden_channels)[:1, :],   # [1, H]
            "wr_mean": _lin_init(ks[2], din, hidden_channels),
            "wl_max":  _lin_init(ks[3], din, hidden_channels),
            "bl_max":  _lin_init(ks[4], din, hidden_channels)[:1, :],   # [1, H]
            "wr_max":  _lin_init(ks[5], din, hidden_channels),
        })
    key, k_w, k_b = jax.random.split(key, 3)
    return {
        "layers": layers,
        "post_w": _lin_init(k_w, 2 * hidden_channels, out_channels),
        "post_b": _lin_init(k_b, 2 * hidden_channels, out_channels)[:1, :],  # [1, C]
    }


def make_edges(num_src, num_tgt):
    """Deterministic bipartite edge_index [2, E]; every target has >=1 neighbor."""
    src_list, tgt_list = [], []
    for t in range(num_tgt):
        for s in sorted({t % num_src, (2 * t + 1) % num_src, (5 * t + 3) % num_src}):
            src_list.append(s)
            tgt_list.append(t)
    return jnp.asarray(np.array([src_list, tgt_list], dtype=np.int32))


def dense_adj(edge_index, num_src, num_tgt):
    src, tgt = edge_index[0], edge_index[1]
    adj = jnp.zeros((num_tgt, num_src), jnp.float32).at[tgt, src].set(1.0)
    deg = jnp.sum(adj, axis=1, keepdims=True)
    return adj, deg


def _sage_conv_ref(x_src, x_tgt, edge_index, wl, bl, wr, aggr):
    src, tgt = edge_index[0], edge_index[1]
    msgs = x_src[src]
    T = x_tgt.shape[0]
    ones = jnp.ones((src.shape[0], 1), jnp.float32)
    cnt = jax.ops.segment_sum(ones, tgt, num_segments=T)
    if aggr == "mean":
        s = jax.ops.segment_sum(msgs, tgt, num_segments=T)
        agg = s / jnp.maximum(cnt, 1.0)
    else:
        agg = jax.ops.segment_max(msgs, tgt, num_segments=T)
        agg = jnp.where(cnt > 0.0, agg, 0.0)
    return agg @ wl + bl + x_tgt @ wr


def reference_forward(x, edge_adjs, params):
    num_layers = len(params["layers"])
    x_mean, x_max = x, x
    for i, (edge_index, n_tgt) in enumerate(edge_adjs):
        x_tgt = x[:n_tgt]
        lp = params["layers"][i]
        xm = _sage_conv_ref(x_mean, x_tgt, edge_index,
                            lp["wl_mean"], lp["bl_mean"], lp["wr_mean"], "mean")
        xx = _sage_conv_ref(x_max, x_tgt, edge_index,
                            lp["wl_max"], lp["bl_max"], lp["wr_max"], "max")
        if i == num_layers - 1:
            h = jnp.concatenate([xm, xx], axis=-1)
            logits = h @ params["post_w"] + params["post_b"]
            return jax.nn.log_softmax(logits, axis=-1)
        x_mean = jax.nn.relu(xm)
        x_max = jax.nn.relu(xx)


# ----------------------------------------------------------------------------
# Main
# ----------------------------------------------------------------------------
if __name__ == "__main__":
    # Small deterministic config. in_channels == hidden_channels is required by
    # the original module's use of `x[:size[1]]` as root features at every layer.
    in_channels = hidden_channels = 32
    out_channels = 8
    num_layers = 2
    N0, N1, N2 = 64, 32, 16   # NeighborSampler-style node counts per hop

    key = jax.random.PRNGKey(0)
    key, k_x, k_p = jax.random.split(key, 3)
    x = jax.random.normal(k_x, (N0, in_channels), jnp.float32)

    params = init_params(k_p, in_channels, hidden_channels, out_channels, num_layers)

    edges0 = make_edges(N0, N1)
    edges1 = make_edges(N1, N2)
    adj0, deg0 = dense_adj(edges0, N0, N1)
    adj1, deg1 = dense_adj(edges1, N1, N2)
    adjs = [(adj0, deg0, N1), (adj1, deg1, N2)]

    out = graphsage_pp_da_forward(x, adjs, params, out_channels)
    out = jax.block_until_ready(out)

    ref = reference_forward(x, [(edges0, N1), (edges1, N2)], params)
    ref = jax.block_until_ready(ref)

    assert out.shape == (N2, out_channels), out.shape
    assert jnp.allclose(out, ref, atol=5e-4, rtol=5e-4), \
        f"max abs err {jnp.max(jnp.abs(out - ref))}"

    print("KERNEL_OK")
</pallas_src>

<mosaic_0001>
module attributes {stable_mosaic.version = 11 : i64} {
  func.func @kernel(%arg0: memref<64x128xf32, #tpu.memory_space<vmem>>, %arg1: memref<32x64xf32, #tpu.memory_space<vmem>>, %arg2: memref<32x1xf32, #tpu.memory_space<vmem>>, %arg3: memref<128x128xf32, #tpu.memory_space<vmem>>, %arg4: memref<1x128xf32, #tpu.memory_space<vmem>>, %arg5: memref<128x128xf32, #tpu.memory_space<vmem>>, %arg6: memref<1x128xf32, #tpu.memory_space<vmem>>, %arg7: memref<128x256xf32, #tpu.memory_space<vmem>>, %arg8: memref<16x32xf32, #tpu.memory_space<vmem>>, %arg9: memref<16x1xf32, #tpu.memory_space<vmem>>, %arg10: memref<128x128xf32, #tpu.memory_space<vmem>>, %arg11: memref<1x128xf32, #tpu.memory_space<vmem>>, %arg12: memref<128x128xf32, #tpu.memory_space<vmem>>, %arg13: memref<1x128xf32, #tpu.memory_space<vmem>>, %arg14: memref<128x256xf32, #tpu.memory_space<vmem>>, %arg15: memref<128x128xf32, #tpu.memory_space<vmem>>, %arg16: memref<128x128xf32, #tpu.memory_space<vmem>>, %arg17: memref<1x128xf32, #tpu.memory_space<vmem>>, %arg18: memref<16x128xf32, #tpu.memory_space<vmem>>) attributes {dimension_semantics = [], scalar_prefetch = 0 : i64, scratch_operands = 0 : i64, tpu.core_type = #tpu.core_type<tc>} {
    %c0 = arith.constant 0 : index
    %c0_0 = arith.constant 0 : index
    %0 = vector.load %arg0[%c0, %c0_0] : memref<64x128xf32, #tpu.memory_space<vmem>>, vector<64x128xf32>
    %c0_1 = arith.constant 0 : index
    %c0_2 = arith.constant 0 : index
    %1 = vector.load %arg1[%c0_1, %c0_2] : memref<32x64xf32, #tpu.memory_space<vmem>>, vector<32x64xf32>
    %c0_3 = arith.constant 0 : index
    %c0_4 = arith.constant 0 : index
    %2 = vector.load %arg2[%c0_3, %c0_4] : memref<32x1xf32, #tpu.memory_space<vmem>>, vector<32x1xf32>
    %3 = vector.extract_strided_slice %0 {offsets = [0, 0], sizes = [32, 128], strides = [1, 1]} : vector<64x128xf32> to vector<32x128xf32>
    %cst = arith.constant dense<0.000000e+00> : vector<32x128xf32>
    %4 = tpu.matmul %1, %0, %cst {dimension_numbers = #tpu.dot_dimension_numbers<[1], [0], [0], [1], [0, 0, 1, 1], [], []>} : vector<32x64xf32>, vector<64x128xf32>, vector<32x128xf32> -> vector<32x128xf32>
    %cst_5 = arith.constant 1.000000e+00 : f32
    %5 = vector.broadcast %cst_5 : f32 to vector<32x1xf32>
    %6 = arith.maximumf %2, %5 : vector<32x1xf32>
    %7 = tpu.reciprocal %6 : vector<32x1xf32> -> vector<32x1xf32>
    %8 = vector.broadcast %7 : vector<32x1xf32> to vector<32x128xf32>
    %9 = arith.mulf %4, %8 : vector<32x128xf32>
    %cst_6 = arith.constant -1.000000e+30 : f32
    %10 = vector.broadcast %cst_6 : f32 to vector<32x128xf32>
    %11 = vector.extract_strided_slice %1 {offsets = [0, 0], sizes = [32, 32], strides = [1, 1]} : vector<32x64xf32> to vector<32x32xf32>
    %12 = vector.extract_strided_slice %0 {offsets = [0, 0], sizes = [32, 128], strides = [1, 1]} : vector<64x128xf32> to vector<32x128xf32>
    %13 = vector.shape_cast %11 : vector<32x32xf32> to vector<32x32x1xf32>
    %cst_7 = arith.constant 0.000000e+00 : f32
    %14 = vector.broadcast %cst_7 : f32 to vector<32x32x1xf32>
    %15 = arith.cmpf ogt, %13, %14 : vector<32x32x1xf32>
    %16 = vector.shape_cast %12 : vector<32x128xf32> to vector<1x32x128xf32>
    %cst_8 = arith.constant -1.000000e+30 : f32
    %17 = vector.shape_cast %15 : vector<32x32x1xi1> to vector<32x32x1xi1>
    %18 = vector.broadcast %17 : vector<32x32x1xi1> to vector<32x32x128xi1>
    %19 = vector.shape_cast %16 : vector<1x32x128xf32> to vector<1x32x128xf32>
    %20 = vector.broadcast %19 : vector<1x32x128xf32> to vector<32x32x128xf32>
    %21 = vector.broadcast %cst_8 : f32 to vector<32x32x128xf32>
    %22 = arith.select %18, %20, %21 : vector<32x32x128xi1>, vector<32x32x128xf32>
    %cst_9 = arith.constant dense<0xFF800000> : vector<32x128xf32>
    %23 = vector.multi_reduction <maximumf>, %22, %cst_9 [1] : vector<32x32x128xf32> to vector<32x128xf32>
    %24 = arith.maximumf %10, %23 : vector<32x128xf32>
    %25 = vector.extract_strided_slice %1 {offsets = [0, 32], sizes = [32, 32], strides = [1, 1]} : vector<32x64xf32> to vector<32x32xf32>
    %26 = vector.extract_strided_slice %0 {offsets = [32, 0], sizes = [32, 128], strides = [1, 1]} : vector<64x128xf32> to vector<32x128xf32>
    %27 = vector.shape_cast %25 : vector<32x32xf32> to vector<32x32x1xf32>
    %cst_10 = arith.constant 0.000000e+00 : f32
    %28 = vector.broadcast %cst_10 : f32 to vector<32x32x1xf32>
    %29 = arith.cmpf ogt, %27, %28 : vector<32x32x1xf32>
    %30 = vector.shape_cast %26 : vector<32x128xf32> to vector<1x32x128xf32>
    %cst_11 = arith.constant -1.000000e+30 : f32
    %31 = vector.shape_cast %29 : vector<32x32x1xi1> to vector<32x32x1xi1>
    %32 = vector.broadcast %31 : vector<32x32x1xi1> to vector<32x32x128xi1>
    %33 = vector.shape_cast %30 : vector<1x32x128xf32> to vector<1x32x128xf32>
    %34 = vector.broadcast %33 : vector<1x32x128xf32> to vector<32x32x128xf32>
    %35 = vector.broadcast %cst_11 : f32 to vector<32x32x128xf32>
    %36 = arith.select %32, %34, %35 : vector<32x32x128xi1>, vector<32x32x128xf32>
    %cst_12 = arith.constant dense<0xFF800000> : vector<32x128xf32>
    %37 = vector.multi_reduction <maximumf>, %36, %cst_12 [1] : vector<32x32x128xf32> to vector<32x128xf32>
    %38 = arith.maximumf %24, %37 : vector<32x128xf32>
    %cst_13 = arith.constant 0.000000e+00 : f32
    %39 = vector.broadcast %cst_13 : f32 to vector<32x1xf32>
    %40 = arith.cmpf ogt, %2, %39 : vector<32x1xf32>
    %cst_14 = arith.constant 0.000000e+00 : f32
    %41 = vector.shape_cast %40 : vector<32x1xi1> to vector<32x1xi1>
    %42 = vector.broadcast %41 : vector<32x1xi1> to vector<32x128xi1>
    %43 = vector.broadcast %cst_14 : f32 to vector<32x128xf32>
    %44 = arith.select %42, %38, %43 : vector<32x128xi1>, vector<32x128xf32>
    %c0_15 = arith.constant 0 : index
    %c0_16 = arith.constant 0 : index
    %45 = vector.load %arg7[%c0_15, %c0_16] : memref<128x256xf32, #tpu.memory_space<vmem>>, vector<128x256xf32>
    %cst_17 = arith.constant dense<0.000000e+00> : vector<32x256xf32>
    %46 = tpu.matmul %3, %45, %cst_17 {dimension_numbers = #tpu.dot_dimension_numbers<[1], [0], [0], [1], [0, 0, 1, 1], [], []>} : vector<32x128xf32>, vector<128x256xf32>, vector<32x256xf32> -> vector<32x256xf32>
    %c0_18 = arith.constant 0 : index
    %c0_19 = arith.constant 0 : index
    %47 = vector.load %arg3[%c0_18, %c0_19] : memref<128x128xf32, #tpu.memory_space<vmem>>, vector<128x128xf32>
    %cst_20 = arith.constant dense<0.000000e+00> : vector<32x128xf32>
    %48 = tpu.matmul %9, %47, %cst_20 {dimension_numbers = #tpu.dot_dimension_numbers<[1], [0], [0], [1], [0, 0, 1, 1], [], []>} : vector<32x128xf32>, vector<128x128xf32>, vector<32x128xf32> -> vector<32x128xf32>
    %c0_21 = arith.constant 0 : index
    %c0_22 = arith.constant 0 : index
    %49 = vector.load %arg4[%c0_21, %c0_22] : memref<1x128xf32, #tpu.memory_space<vmem>>, vector<1x128xf32>
    %50 = vector.broadcast %49 : vector<1x128xf32> to vector<32x128xf32>
    %51 = arith.addf %48, %50 : vector<32x128xf32>
    %52 = vector.extract_strided_slice %46 {offsets = [0, 0], sizes = [32, 128], strides = [1, 1]} : vector<32x256xf32> to vector<32x128xf32>
    %53 = arith.addf %51, %52 : vector<32x128xf32>
    %c0_23 = arith.constant 0 : index
    %c0_24 = arith.constant 0 : index
    %54 = vector.load %arg5[%c0_23, %c0_24] : memref<128x128xf32, #tpu.memory_space<vmem>>, vector<128x128xf32>
    %cst_25 = arith.constant dense<0.000000e+00> : vector<32x128xf32>
    %55 = tpu.matmul %44, %54, %cst_25 {dimension_numbers = #tpu.dot_dimension_numbers<[1], [0], [0], [1], [0, 0, 1, 1], [], []>} : vector<32x128xf32>, vector<128x128xf32>, vector<32x128xf32> -> vector<32x128xf32>
    %c0_26 = arith.constant 0 : index
    %c0_27 = arith.constant 0 : index
    %56 = vector.load %arg6[%c0_26, %c0_27] : memref<1x128xf32, #tpu.memory_space<vmem>>, vector<1x128xf32>
    %57 = vector.broadcast %56 : vector<1x128xf32> to vector<32x128xf32>
    %58 = arith.addf %55, %57 : vector<32x128xf32>
    %59 = vector.extract_strided_slice %46 {offsets = [0, 128], sizes = [32, 128], strides = [1, 1]} : vector<32x256xf32> to vector<32x128xf32>
    %60 = arith.addf %58, %59 : vector<32x128xf32>
    %cst_28 = arith.constant 0.000000e+00 : f32
    %61 = vector.broadcast %cst_28 : f32 to vector<32x128xf32>
    %62 = arith.maximumf %53, %61 : vector<32x128xf32>
    %cst_29 = arith.constant 0.000000e+00 : f32
    %63 = vector.broadcast %cst_29 : f32 to vector<32x128xf32>
    %64 = arith.maximumf %60, %63 : vector<32x128xf32>
    %c0_30 = arith.constant 0 : index
    %c0_31 = arith.constant 0 : index
    %65 = vector.load %arg8[%c0_30, %c0_31] : memref<16x32xf32, #tpu.memory_space<vmem>>, vector<16x32xf32>
    %c0_32 = arith.constant 0 : index
    %c0_33 = arith.constant 0 : index
    %66 = vector.load %arg9[%c0_32, %c0_33] : memref<16x1xf32, #tpu.memory_space<vmem>>, vector<16x1xf32>
    %67 = vector.extract_strided_slice %0 {offsets = [0, 0], sizes = [16, 128], strides = [1, 1]} : vector<64x128xf32> to vector<16x128xf32>
    %cst_34 = arith.constant dense<0.000000e+00> : vector<16x128xf32>
    %68 = tpu.matmul %65, %62, %cst_34 {dimension_numbers = #tpu.dot_dimension_numbers<[1], [0], [0], [1], [0, 0, 1, 1], [], []>} : vector<16x32xf32>, vector<32x128xf32>, vector<16x128xf32> -> vector<16x128xf32>
    %cst_35 = arith.constant 1.000000e+00 : f32
    %69 = vector.broadcast %cst_35 : f32 to vector<16x1xf32>
    %70 = arith.maximumf %66, %69 : vector<16x1xf32>
    %71 = tpu.reciprocal %70 : vector<16x1xf32> -> vector<16x1xf32>
    %72 = vector.broadcast %71 : vector<16x1xf32> to vector<16x128xf32>
    %73 = arith.mulf %68, %72 : vector<16x128xf32>
    %cst_36 = arith.constant -1.000000e+30 : f32
    %74 = vector.broadcast %cst_36 : f32 to vector<16x128xf32>
    %75 = vector.shape_cast %65 : vector<16x32xf32> to vector<16x32x1xf32>
    %cst_37 = arith.constant 0.000000e+00 : f32
    %76 = vector.broadcast %cst_37 : f32 to vector<16x32x1xf32>
    %77 = arith.cmpf ogt, %75, %76 : vector<16x32x1xf32>
    %78 = vector.shape_cast %64 : vector<32x128xf32> to vector<1x32x128xf32>
    %cst_38 = arith.constant -1.000000e+30 : f32
    %79 = vector.shape_cast %77 : vector<16x32x1xi1> to vector<16x32x1xi1>
    %80 = vector.broadcast %79 : vector<16x32x1xi1> to vector<16x32x128xi1>
    %81 = vector.shape_cast %78 : vector<1x32x128xf32> to vector<1x32x128xf32>
    %82 = vector.broadcast %81 : vector<1x32x128xf32> to vector<16x32x128xf32>
    %83 = vector.broadcast %cst_38 : f32 to vector<16x32x128xf32>
    %84 = arith.select %80, %82, %83 : vector<16x32x128xi1>, vector<16x32x128xf32>
    %cst_39 = arith.constant dense<0xFF800000> : vector<16x128xf32>
    %85 = vector.multi_reduction <maximumf>, %84, %cst_39 [1] : vector<16x32x128xf32> to vector<16x128xf32>
    %86 = arith.maximumf %74, %85 : vector<16x128xf32>
    %cst_40 = arith.constant 0.000000e+00 : f32
    %87 = vector.broadcast %cst_40 : f32 to vector<16x1xf32>
    %88 = arith.cmpf ogt, %66, %87 : vector<16x1xf32>
    %cst_41 = arith.constant 0.000000e+00 : f32
    %89 = vector.shape_cast %88 : vector<16x1xi1> to vector<16x1xi1>
    %90 = vector.broadcast %89 : vector<16x1xi1> to vector<16x128xi1>
    %91 = vector.broadcast %cst_41 : f32 to vector<16x128xf32>
    %92 = arith.select %90, %86, %91 : vector<16x128xi1>, vector<16x128xf32>
    %c0_42 = arith.constant 0 : index
    %c0_43 = arith.constant 0 : index
    %93 = vector.load %arg14[%c0_42, %c0_43] : memref<128x256xf32, #tpu.memory_space<vmem>>, vector<128x256xf32>
    %cst_44 = arith.constant dense<0.000000e+00> : vector<16x256xf32>
    %94 = tpu.matmul %67, %93, %cst_44 {dimension_numbers = #tpu.dot_dimension_numbers<[1], [0], [0], [1], [0, 0, 1, 1], [], []>} : vector<16x128xf32>, vector<128x256xf32>, vector<16x256xf32> -> vector<16x256xf32>
    %c0_45 = arith.constant 0 : index
    %c0_46 = arith.constant 0 : index
    %95 = vector.load %arg10[%c0_45, %c0_46] : memref<128x128xf32, #tpu.memory_space<vmem>>, vector<128x128xf32>
    %cst_47 = arith.constant dense<0.000000e+00> : vector<16x128xf32>
    %96 = tpu.matmul %73, %95, %cst_47 {dimension_numbers = #tpu.dot_dimension_numbers<[1], [0], [0], [1], [0, 0, 1, 1], [], []>} : vector<16x128xf32>, vector<128x128xf32>, vector<16x128xf32> -> vector<16x128xf32>
    %c0_48 = arith.constant 0 : index
    %c0_49 = arith.constant 0 : index
    %97 = vector.load %arg11[%c0_48, %c0_49] : memref<1x128xf32, #tpu.memory_space<vmem>>, vector<1x128xf32>
    %98 = vector.broadcast %97 : vector<1x128xf32> to vector<16x128xf32>
    %99 = arith.addf %96, %98 : vector<16x128xf32>
    %100 = vector.extract_strided_slice %94 {offsets = [0, 0], sizes = [16, 128], strides = [1, 1]} : vector<16x256xf32> to vector<16x128xf32>
    %101 = arith.addf %99, %100 : vector<16x128xf32>
    %c0_50 = arith.constant 0 : index
    %c0_51 = arith.constant 0 : index
    %102 = vector.load %arg12[%c0_50, %c0_51] : memref<128x128xf32, #tpu.memory_space<vmem>>, vector<128x128xf32>
    %cst_52 = arith.constant dense<0.000000e+00> : vector<16x128xf32>
    %103 = tpu.matmul %92, %102, %cst_52 {dimension_numbers = #tpu.dot_dimension_numbers<[1], [0], [0], [1], [0, 0, 1, 1], [], []>} : vector<16x128xf32>, vector<128x128xf32>, vector<16x128xf32> -> vector<16x128xf32>
    %c0_53 = arith.constant 0 : index
    %c0_54 = arith.constant 0 : index
    %104 = vector.load %arg13[%c0_53, %c0_54] : memref<1x128xf32, #tpu.memory_space<vmem>>, vector<1x128xf32>
    %105 = vector.broadcast %104 : vector<1x128xf32> to vector<16x128xf32>
    %106 = arith.addf %103, %105 : vector<16x128xf32>
    %107 = vector.extract_strided_slice %94 {offsets = [0, 128], sizes = [16, 128], strides = [1, 1]} : vector<16x256xf32> to vector<16x128xf32>
    %108 = arith.addf %106, %107 : vector<16x128xf32>
    %c0_55 = arith.constant 0 : index
    %c0_56 = arith.constant 0 : index
    %109 = vector.load %arg15[%c0_55, %c0_56] : memref<128x128xf32, #tpu.memory_space<vmem>>, vector<128x128xf32>
    %cst_57 = arith.constant dense<0.000000e+00> : vector<16x128xf32>
    %110 = tpu.matmul %101, %109, %cst_57 {dimension_numbers = #tpu.dot_dimension_numbers<[1], [0], [0], [1], [0, 0, 1, 1], [], []>} : vector<16x128xf32>, vector<128x128xf32>, vector<16x128xf32> -> vector<16x128xf32>
    %c0_58 = arith.constant 0 : index
    %c0_59 = arith.constant 0 : index
    %111 = vector.load %arg16[%c0_58, %c0_59] : memref<128x128xf32, #tpu.memory_space<vmem>>, vector<128x128xf32>
    %cst_60 = arith.constant dense<0.000000e+00> : vector<16x128xf32>
    %112 = tpu.matmul %108, %111, %cst_60 {dimension_numbers = #tpu.dot_dimension_numbers<[1], [0], [0], [1], [0, 0, 1, 1], [], []>} : vector<16x128xf32>, vector<128x128xf32>, vector<16x128xf32> -> vector<16x128xf32>
    %113 = arith.addf %110, %112 : vector<16x128xf32>
    %c0_61 = arith.constant 0 : index
    %c0_62 = arith.constant 0 : index
    %114 = vector.load %arg17[%c0_61, %c0_62] : memref<1x128xf32, #tpu.memory_space<vmem>>, vector<1x128xf32>
    %115 = vector.broadcast %114 : vector<1x128xf32> to vector<16x128xf32>
    %116 = arith.addf %113, %115 : vector<16x128xf32>
    %117 = tpu.iota {dimensions = array<i32: 1>} : vector<16x128xi32>
    %c8_i32 = arith.constant 8 : i32
    %118 = vector.broadcast %c8_i32 : i32 to vector<16x128xi32>
    %119 = arith.cmpi slt, %117, %118 : vector<16x128xi32>
    %cst_63 = arith.constant -1.000000e+30 : f32
    %120 = vector.broadcast %cst_63 : f32 to vector<16x128xf32>
    %121 = arith.select %119, %116, %120 : vector<16x128xi1>, vector<16x128xf32>
    %cst_64 = arith.constant dense<0xFF800000> : vector<16xf32>
    %122 = vector.multi_reduction <maximumf>, %121, %cst_64 [1] : vector<16x128xf32> to vector<16xf32>
    %123 = vector.shape_cast %122 : vector<16xf32> to vector<16x1xf32>
    %124 = vector.broadcast %123 : vector<16x1xf32> to vector<16x128xf32>
    %125 = arith.subf %121, %124 : vector<16x128xf32>
    %126 = math.exp %125 : vector<16x128xf32>
    %cst_65 = arith.constant 0.000000e+00 : f32
    %127 = vector.broadcast %cst_65 : f32 to vector<16x128xf32>
    %128 = arith.select %119, %126, %127 : vector<16x128xi1>, vector<16x128xf32>
    %cst_66 = arith.constant dense<0.000000e+00> : vector<16xf32>
    %129 = vector.multi_reduction <add>, %128, %cst_66 [1] : vector<16x128xf32> to vector<16xf32>
    %130 = vector.shape_cast %129 : vector<16xf32> to vector<16x1xf32>
    %131 = math.log %130 : vector<16x1xf32>
    %132 = vector.broadcast %131 : vector<16x1xf32> to vector<16x128xf32>
    %133 = arith.subf %125, %132 : vector<16x128xf32>
    %c0_67 = arith.constant 0 : index
    %c0_68 = arith.constant 0 : index
    %134 = vector.load %arg18[%c0_67, %c0_68] : memref<16x128xf32, #tpu.memory_space<vmem>>, vector<16x128xf32>
    tpu.vector_store %arg18[%c0_67, %c0_68], %133 {strides = array<i32>} : memref<16x128xf32, #tpu.memory_space<vmem>>, vector<16x128xf32>,
    return
  }
}

</mosaic_0001>

<bundles_post_ra>
// kernel: tpu_custom_call.1
= control target key start
LH: loop header
LB: loop body
LE: loop exit
PB: predicated region body
PF: predicated region fallthrough
CT: control target
= control target key end

     0   :  { %s9706_s0 = inlined_call_operand.hbm [shape: f32[64,128], index: 0, kind: input, shape index: {}]   ;;  %s9707_s1 = inlined_call_operand.vmem [shape: f32[32,64], index: 1, kind: input, shape index: {}]   ;;  %s9708_s2 = inlined_call_operand.vmem [shape: f32[32,1], index: 2, kind: input, shape index: {}]   ;;  %s9709_s3 = inlined_call_operand.hbm [shape: f32[128,128], index: 3, kind: input, shape index: {}]   ;;  %s9710_s4 = inlined_call_operand.vmem [shape: f32[1,128], index: 4, kind: input, shape index: {}]   ;;  %s9711_s5 = inlined_call_operand.hbm [shape: f32[128,128], index: 5, kind: input, shape index: {}]   ;;  %s9712_s6 = inlined_call_operand.vmem [shape: f32[1,128], index: 6, kind: input, shape index: {}]   ;;  %s9713_s7 = inlined_call_operand.hbm [shape: f32[128,256], index: 7, kind: input, shape index: {}]   ;;  %s9714_s8 = inlined_call_operand.vmem [shape: f32[16,32], index: 8, kind: input, shape index: {}]   ;;  %s9715_s9 = inlined_call_operand.vmem [shape: f32[16,1], index: 9, kind: input, shape index: {}]   ;;  %s9716_s10 = inlined_call_operand.hbm [shape: f32[128,128], index: 10, kind: input, shape index: {}]   ;;  %s9717_s11 = inlined_call_operand.vmem [shape: f32[1,128], index: 11, kind: input, shape index: {}]   ;;  %s9718_s12 = inlined_call_operand.hbm [shape: f32[128,128], index: 12, kind: input, shape index: {}]   ;;  %s9719_s13 = inlined_call_operand.vmem [shape: f32[1,128], index: 13, kind: input, shape index: {}]   ;;  %s9720_s14 = inlined_call_operand.hbm [shape: f32[128,256], index: 14, kind: input, shape index: {}]   ;;  %s9721_s15 = inlined_call_operand.hbm [shape: f32[128,128], index: 15, kind: input, shape index: {}]   ;;  %s9722_s16 = inlined_call_operand.hbm [shape: f32[128,128], index: 16, kind: input, shape index: {}]   ;;  %s9723_s17 = inlined_call_operand.vmem [shape: f32[1,128], index: 17, kind: input, shape index: {}]   ;;  %s9724_s18 = inlined_call_operand.hbm [shape: f32[16,128], index: 18, kind: output, shape index: {}]  }
   0x1   :  { %9968 = sst [smem:[#allocation139_spill]] %s9706_s0 }
   0x2   :  { %9969 = sst [smem:[#allocation140_spill]] %s9707_s1 }
   0x3   :  { %9970 = sst [smem:[#allocation141_spill]] %s9708_s2 }
   0x4   :  { %23 = vsyncpa [#allocation3], 0 }
   0x5   :  { %24 = vsyncpa [#allocation6], 0 }
   0x6   :  { %25 = vsyncpa [#allocation9], 0 }
   0x7   :  { %26 = vsyncpa [#allocation12], 0 }
   0x8   :  { %27 = vsyncpa [#allocation15], 0 }
   0x9   :  { %28 = vsyncpa [#allocation4], 0  ;;  %s5962_s27 = smov [#allocation5]   ;;  %s5963_s29 = smov [#allocation8]  }
   0xa   :  { %s50_s28 = sshll.u32 %s5962_s27, 4  ;;  %s78_s30 = sshll.u32 %s5963_s29, 4  ;;  %s51_s28 = int_to_ptr.vmem [resolvable:$true] %s50_s28  ;;  %s6073_s30 = int_to_ptr.vmem [resolvable:$true] %s78_s30 }
   0xb   :  { %s5730_s1 = scalar_lea.hbm %s9709_s3, 2048 }
   0xc   :  { %p5731_p0 = scmp.ne.s32.totalorder %s9709_s3, %s5730_s1  ;;  %p5734_p1 = scmp.lt.u32.totalorder %s5730_s1, %s9709_s3 }
   0xe   :  { %p5736_p2 = pnand %p5734_p1, %p5731_p0 }
  0x10   :  { %5739 = shalt.err (!%p5736_p2)
}
  0x11   :  { %s5740_s23 = scalar_lea.vmem %s51_s28, 2048  ;;  %p5745_p4 = scmp.lt.s32.totalorder %s51_s28, %s51_s28 }
  0x12   :  { %p5741_p3 = scmp.ne.s32.totalorder %s51_s28, %s5740_s23  ;;  %p5746_p5 = scmp.lt.s32.totalorder %s5740_s23, %s5740_s23 }
  0x14   :  { %p5747_p6 = por %p5746_p5, %p5745_p4 }
  0x16   :  { %p5748_p7 = pnand %p5747_p6, %p5741_p3 }
  0x18   :  { %5751 = shalt.err (!%p5748_p7)
}
  0x19   :  { %s9728_s24 = smov 128   ;;  %s9730_s25 = smov 8  }
  0x1a   :  { %56 = dma.hbm_to_vmem [thread:$0]  %s9709_s3, 2048, %s51_s28, [#allocation6], %s9728_s24, %s9728_s24, %s9730_s25  }
  0x1b   :  { %s5752_s19 = scalar_lea.hbm %s9713_s7, 4096 }
  0x1c   :  { %p5753_p8 = scmp.ne.s32.totalorder %s9713_s7, %s5752_s19  ;;  %p5756_p9 = scmp.lt.u32.totalorder %s5752_s19, %s9713_s7 }
  0x1e   :  { %p5758_p10 = pnand %p5756_p9, %p5753_p8 }
  0x20   :  { %5761 = shalt.err (!%p5758_p10)
}
  0x21   :  { %s5762_s2 = scalar_lea.vmem %s6073_s30, 4096  ;;  %p5767_p12 = scmp.lt.s32.totalorder %s6073_s30, %s6073_s30 }
  0x22   :  { %p5763_p11 = scmp.ne.s32.totalorder %s6073_s30, %s5762_s2  ;;  %p5768_p13 = scmp.lt.s32.totalorder %s5762_s2, %s5762_s2 }
  0x24   :  { %p5769_p0 = por %p5768_p13, %p5767_p12 }
  0x26   :  { %p5770_p1 = pnand %p5769_p0, %p5763_p11 }
  0x28   :  { %5773 = shalt.err (!%p5770_p1)
}
  0x29   :  { %s9732_s3 = smov 256   ;;  %s5967_s28 = smov 16  }
  0x2a   :  { %84 = dma.hbm_to_vmem [thread:$0]  %s9713_s7, 4096, %s6073_s30, [#allocation9], %s9732_s3, %s9732_s3, %s5967_s28  }
  0x2b   :  { %s5968_s27 = smov [#allocation11]   ;;  %s5969_s0 = smov [#allocation14]  }
  0x2c   :  { %s108_s29 = sshll.u32 %s5968_s27, 4  ;;  %s134_s19 = sshll.u32 %s5969_s0, 4  ;;  %s109_s29 = int_to_ptr.vmem [resolvable:$true] %s108_s29  ;;  %s6110_s19 = int_to_ptr.vmem [resolvable:$true] %s134_s19 }
  0x2d   :  { %s5774_s21 = scalar_lea.hbm %s9718_s12, 2048 }
  0x2e   :  { %p5775_p2 = scmp.ne.s32.totalorder %s9718_s12, %s5774_s21  ;;  %p5778_p3 = scmp.lt.u32.totalorder %s5774_s21, %s9718_s12 }
  0x30   :  { %p5780_p4 = pnand %p5778_p3, %p5775_p2 }
  0x32   :  { %5783 = shalt.err (!%p5780_p4)
}
  0x33   :  { %s5784_s7 = scalar_lea.vmem %s109_s29, 2048  ;;  %p5789_p6 = scmp.lt.s32.totalorder %s109_s29, %s109_s29 }
  0x34   :  { %p5785_p5 = scmp.ne.s32.totalorder %s109_s29, %s5784_s7  ;;  %p5790_p7 = scmp.lt.s32.totalorder %s5784_s7, %s5784_s7 }
  0x36   :  { %p5791_p8 = por %p5790_p7, %p5789_p6 }
  0x38   :  { %p5792_p9 = pnand %p5791_p8, %p5785_p5 }
  0x3a   :  { %5795 = shalt.err (!%p5792_p9)
}
  0x3b   :  { %s9971_s30 = smov 8   ;;  %s9972_s23 = smov 128  }
  0x3c   :  { %114 = dma.hbm_to_vmem [thread:$0]  %s9718_s12, 2048, %s109_s29, [#allocation12], %s9972_s23, %s9972_s23, %s9971_s30  }
  0x3d   :  { %s5796_s24 = scalar_lea.hbm %s9721_s15, 2048 }
  0x3e   :  { %p5797_p10 = scmp.ne.s32.totalorder %s9721_s15, %s5796_s24  ;;  %p5800_p11 = scmp.lt.u32.totalorder %s5796_s24, %s9721_s15 }
  0x40   :  { %p5802_p12 = pnand %p5800_p11, %p5797_p10 }
  0x42   :  { %5805 = shalt.err (!%p5802_p12)
}
  0x43   :  { %s5806_s2 = scalar_lea.vmem %s6110_s19, 2048  ;;  %p5811_p0 = scmp.lt.s32.totalorder %s6110_s19, %s6110_s19 }
  0x44   :  { %p5807_p13 = scmp.ne.s32.totalorder %s6110_s19, %s5806_s2  ;;  %p5812_p1 = scmp.lt.s32.totalorder %s5806_s2, %s5806_s2 }
  0x46   :  { %p5813_p2 = por %p5812_p1, %p5811_p0 }
  0x48   :  { %p5814_p3 = pnand %p5813_p2, %p5807_p13 }
  0x4a   :  { %5817 = shalt.err (!%p5814_p3)
}
  0x4b   :  { %140 = dma.hbm_to_vmem [thread:$0]  %s9721_s15, 2048, %s6110_s19, [#allocation15], %s9972_s23, %s9972_s23, %s9971_s30  }
  0x4c   :  { %s5970_s7 = smov [#allocation2]   ;;  %s5971_s27 = smov [#allocation7]  }
  0x4d   :  { %s34_s26 = sshll.u32 %s5970_s7, 4  ;;  %s64_s0 = sshll.u32 %s5971_s27, 4  ;;  %s35_s26 = int_to_ptr.vmem [resolvable:$true] %s34_s26  ;;  %s6147_s0 = int_to_ptr.vmem [resolvable:$true] %s64_s0 }
  0x4e   :  { %s9973_s25 = sld [smem:[#allocation139_spill]] }
  0x54   :  { %s5818_s20 = scalar_lea.hbm %s9973_s25, 1024 }
  0x55   :  { %p5819_p4 = scmp.ne.s32.totalorder %s9973_s25, %s5818_s20  ;;  %p5822_p5 = scmp.lt.u32.totalorder %s5818_s20, %s9973_s25 }
  0x57   :  { %p5824_p6 = pnand %p5822_p5, %p5819_p4 }
  0x59   :  { %5827 = shalt.err (!%p5824_p6)
}
  0x5a   :  { %s5828_s15 = scalar_lea.vmem %s35_s26, 1024  ;;  %p5833_p8 = scmp.lt.s32.totalorder %s35_s26, %s35_s26 }
  0x5b   :  { %p5829_p7 = scmp.ne.s32.totalorder %s35_s26, %s5828_s15  ;;  %p5834_p9 = scmp.lt.s32.totalorder %s5828_s15, %s5828_s15 }
  0x5d   :  { %p5835_p10 = por %p5834_p9, %p5833_p8 }
  0x5f   :  { %p5836_p11 = pnand %p5835_p10, %p5829_p7 }
  0x61   :  { %5839 = shalt.err (!%p5836_p11)
}
  0x62   :  { %40 = dma.hbm_to_vmem [thread:$0]  %s9973_s25, 1024, %s35_s26, [#allocation3], %s9972_s23, %s9972_s23, %s9971_s30  }
  0x63   :  { %s5840_s3 = scalar_lea.hbm %s9711_s5, 2048 }
  0x64   :  { %p5841_p12 = scmp.ne.s32.totalorder %s9711_s5, %s5840_s3  ;;  %p5844_p13 = scmp.lt.u32.totalorder %s5840_s3, %s9711_s5 }
  0x66   :  { %p5846_p0 = pnand %p5844_p13, %p5841_p12 }
  0x68   :  { %5849 = shalt.err (!%p5846_p0)
}
  0x69   :  { %s5850_s21 = scalar_lea.vmem %s6147_s0, 2048  ;;  %p5855_p2 = scmp.lt.s32.totalorder %s6147_s0, %s6147_s0 }
  0x6a   :  { %p5851_p1 = scmp.ne.s32.totalorder %s6147_s0, %s5850_s21  ;;  %p5856_p3 = scmp.lt.s32.totalorder %s5850_s21, %s5850_s21 }
  0x6c   :  { %p5857_p4 = por %p5856_p3, %p5855_p2 }
  0x6e   :  { %p5858_p5 = pnand %p5857_p4, %p5851_p1 }
  0x70   :  { %5861 = shalt.err (!%p5858_p5)
}
  0x71   :  { %70 = dma.hbm_to_vmem [thread:$0]  %s9711_s5, 2048, %s6147_s0, [#allocation6], %s9972_s23, %s9972_s23, %s9971_s30  }
  0x72   :  { %s5972_s22 = smov [#allocation10]   ;;  %s5973_s15 = smov [#allocation13]  }
  0x73   :  { %s94_s2 = sshll.u32 %s5972_s22, 4  ;;  %s122_s19 = sshll.u32 %s5973_s15, 4  ;;  %s95_s2 = int_to_ptr.vmem [resolvable:$true] %s94_s2  ;;  %s6184_s19 = int_to_ptr.vmem [resolvable:$true] %s122_s19 }
  0x74   :  { %s5862_s7 = scalar_lea.hbm %s9716_s10, 2048 }
  0x75   :  { %p5863_p6 = scmp.ne.s32.totalorder %s9716_s10, %s5862_s7  ;;  %p5866_p7 = scmp.lt.u32.totalorder %s5862_s7, %s9716_s10 }
  0x77   :  { %p5868_p8 = pnand %p5866_p7, %p5863_p6 }
  0x79   :  { %5871 = shalt.err (!%p5868_p8)
}
  0x7a   :  { %s5872_s5 = scalar_lea.vmem %s95_s2, 2048  ;;  %p5877_p10 = scmp.lt.s32.totalorder %s95_s2, %s95_s2 }
  0x7b   :  { %p5873_p9 = scmp.ne.s32.totalorder %s95_s2, %s5872_s5  ;;  %p5878_p11 = scmp.lt.s32.totalorder %s5872_s5, %s5872_s5 }
  0x7d   :  { %p5879_p12 = por %p5878_p11, %p5877_p10 }
  0x7f   :  { %p5880_p13 = pnand %p5879_p12, %p5873_p9 }
  0x81   :  { %5883 = shalt.err (!%p5880_p13)
}
  0x82   :  { %100 = dma.hbm_to_vmem [thread:$0]  %s9716_s10, 2048, %s95_s2, [#allocation9], %s9972_s23, %s9972_s23, %s9971_s30  }
  0x83   :  { %s5884_s25 = scalar_lea.hbm %s9720_s14, 4096 }
  0x84   :  { %p5885_p0 = scmp.ne.s32.totalorder %s9720_s14, %s5884_s25  ;;  %p5888_p1 = scmp.lt.u32.totalorder %s5884_s25, %s9720_s14 }
  0x86   :  { %p5890_p2 = pnand %p5888_p1, %p5885_p0 }
  0x88   :  { %5893 = shalt.err (!%p5890_p2)
}
  0x89   :  { %s5894_s7 = scalar_lea.vmem %s6184_s19, 4096  ;;  %p5899_p4 = scmp.lt.s32.totalorder %s6184_s19, %s6184_s19 }
  0x8a   :  { %p5895_p3 = scmp.ne.s32.totalorder %s6184_s19, %s5894_s7  ;;  %p5900_p5 = scmp.lt.s32.totalorder %s5894_s7, %s5894_s7 }
  0x8c   :  { %p5901_p6 = por %p5900_p5, %p5899_p4 }
  0x8e   :  { %p5902_p7 = pnand %p5901_p6, %p5895_p3 }
  0x90   :  { %5905 = shalt.err (!%p5902_p7)
}
  0x91   :  { %s9974_s10 = smov 256   ;;  %s5974_s27 = smov [#allocation16]  }
  0x92   :  { %128 = dma.hbm_to_vmem [thread:$0]  %s9720_s14, 4096, %s6184_s19, [#allocation12], %s9974_s10, %s9974_s10, %s5967_s28  }
  0x93   :  { %s146_s1 = sshll.u32 %s5974_s27, 4  ;;  %s5906_s0 = scalar_lea.hbm %s9722_s16, 2048  ;;  %s147_s1 = int_to_ptr.vmem [resolvable:$true] %s146_s1 }
  0x94   :  { %p5907_p8 = scmp.ne.s32.totalorder %s9722_s16, %s5906_s0  ;;  %p5910_p9 = scmp.lt.u32.totalorder %s5906_s0, %s9722_s16 }
  0x96   :  { %p5912_p10 = pnand %p5910_p9, %p5907_p8 }
  0x98   :  { %5915 = shalt.err (!%p5912_p10)
}
  0x99   :  { %s5916_s22 = scalar_lea.vmem %s147_s1, 2048  ;;  %p5921_p12 = scmp.lt.s32.totalorder %s147_s1, %s147_s1 }
  0x9a   :  { %p5917_p11 = scmp.ne.s32.totalorder %s147_s1, %s5916_s22  ;;  %p5922_p13 = scmp.lt.s32.totalorder %s5916_s22, %s5916_s22 }
  0x9c   :  { %p5923_p0 = por %p5922_p13, %p5921_p12 }
  0x9e   :  { %p5924_p1 = pnand %p5923_p0, %p5917_p11 }
  0xa0   :  { %5927 = shalt.err (!%p5924_p1)
}
  0xa1   :  { %152 = dma.hbm_to_vmem [thread:$0]  %s9722_s16, 2048, %s147_s1, [#allocation15], %s9972_s23, %s9972_s23, %s9971_s30  }
  0xa2   :  { %5950 = dma.done.wait [#allocation3], 1024  }
  0xa3   :  { %5951 = vsyncadd [#allocation3], 4294966272 }
  0xa4   :  { %5952 = dma.done.wait [#allocation6], 4096  }
  0xa5   :  { %5953 = vsyncadd [#allocation6], 4294963200 }
  0xa6   :  { %5954 = dma.done.wait [#allocation9], 6144  }
  0xa7   :  { %5955 = vsyncadd [#allocation9], 4294961152 }
  0xa8   :  { %5956 = dma.done.wait [#allocation12], 6144  }
  0xa9   :  { %5957 = vsyncadd [#allocation12], 4294961152 }
  0xaa   :  { %5958 = dma.done.wait [#allocation15], 4096  }
  0xab   :  { %5959 = vsyncadd [#allocation15], 4294963200  ;;  %v9733_v0 = vlaneseq  ;;  %v9734_v1 = vmov 0   ;;  %vm198_vm0 = vcmask 523264   ;;  %s9977_s15 = sld [smem:[#allocation140_spill]]  ;;  %v6252_v6 = vld [vmem:[#allocation2] sm:$0xff] }
  0xac   :  { %5677 = vset.pattern.permute.xlu1 %v9734_v1  ;;  %5676 = vset.pattern.permute.xlu0 %v9734_v1  ;;  %v6254_v7 = vld [vmem:[#allocation2 + $0x8] sm:$0xff]  ;;  %v6262_v10 = vld [vmem:[#allocation2 + $0x10] sm:$0xff]  ;;  %v6264_v11 = vld [vmem:[#allocation2 + $0x18] sm:$0xff]  ;;  %s9979_s7 = sld [smem:[#allocation141_spill]] }
  0xad   :  { %v6239_v2 = vshrl.u32 %v9733_v0, 7  ;;  %v5378_v9 = vpack.c.bf16 %v6254_v7, %v6252_v6  ;;  %v5382_v12 = vpack.c.bf16 %v6264_v11, %v6262_v10  ;;  %v186_v13 = vld [vmem:[#allocation2 + $0x20] sm:$0xff]  ;;  %v187_v16 = vld [vmem:[#allocation2 + $0x28] sm:$0xff]  ;;  %v188_v27 = vld [vmem:[#allocation2 + $0x30] sm:$0xff] }
  0xae   :  { %v5386_v24 = vpack.c.bf16 %v187_v16, %v186_v13  ;;  %v189_v28 = vld [vmem:[#allocation2 + $0x38] sm:$0xff]  ;;  %v3212_v42 = vld [vmem:[#allocation8 + $0x8] sm:$0xff]  ;;  %v3211_v45 = vld [vmem:[#allocation8] sm:$0xff] }
  0xaf   :  { %v6242_v3 = vsub.s32 0, %v6239_v2  ;;  %v6245_v4 = vsub.s32 1, %v6239_v2  ;;  %v6277_v15 = vsub.s32 2, %v6239_v2  ;;  %5379 = vmatprep.subr.bf16.mxu1 %v5378_v9  ;;  %v5390_v30 = vpack.c.bf16 %v189_v28, %v188_v27  ;;  %v3214_v43 = vld [vmem:[#allocation8 + $0x18] sm:$0xff]  ;;  %v3213_v46 = vld [vmem:[#allocation8 + $0x10] sm:$0xff]  ;;  %v3216_v49 = vld [vmem:[#allocation8 + $0x28] sm:$0xff] }
  0xb0   :  { %5381 = vmatpush3.bf16.msra.mxu1 %v5378_v9  ;;  %v6333_v39 = vsub.s32 3, %v6239_v2  ;;  %v5394_v44 = vpack.c.bf16 %v3214_v43, %v3212_v42  ;;  %v6352_v47 = vsub.s32 4, %v6239_v2  ;;  %v5396_v48 = vpack.c.bf16 %v3213_v46, %v3211_v45  ;;  %v3218_v50 = vld [vmem:[#allocation8 + $0x38] sm:$0xff]  ;;  %v3215_v52 = vld [vmem:[#allocation8 + $0x20] sm:$0xff]  ;;  %v3217_v53 = vld [vmem:[#allocation8 + $0x30] sm:$0xff] }
  0xb1   :  { %9975 = vst [vmem:[#allocation24_spill] sm:$0xff] %v6242_v3  ;;  %9976 = vst [vmem:[#allocation25_spill] sm:$0xff] %v6245_v4  ;;  %v6250_v5 = vld [vmem:[%s9977_s15] sm:$0xff]  ;;  %5383 = vmatprep.subr.bf16.mxu1 %v5382_v12  ;;  %v6300_v29 = vld [vmem:[%s9977_s15 + $0x8] sm:$0xff]  ;;  %v5398_v51 = vpack.c.bf16 %v3218_v50, %v3216_v49  ;;  %v5400_v55 = vpack.c.bf16 %v3217_v53, %v3215_v52 }
  0xb2   :  { %v6258_v8 = vrot.slane %v6250_v5, %v6242_v3  ;;  %5145 = vmatprep.mubr.msk.f32.mxu1 %vm198_vm0, %v6250_v5  ;;  %v6274_v14 = vrot.slane %v6250_v5, %v6245_v4  ;;  %9978 = vst [vmem:[#allocation26_spill] sm:$0xff] %v6277_v15  ;;  %v196_v17 = vld [vmem:[%s9979_s7 + $0x10] sm:$0xff]  ;;  %v194_v18 = vld [vmem:[%s9979_s7] sm:$0xff]  ;;  %v197_v21 = vld [vmem:[%s9979_s7 + $0x18] sm:$0xff]  ;;  %v6295_v26 = vrot.slane %v6250_v5, %v6277_v15 }
  0xb3   :  { %v298_v19 = vmax.f32 %v196_v17, 1.0  ;;  %v296_v20 = vmax.f32 %v194_v18, 1.0  ;;  %v195_v22 = vld [vmem:[%s9979_s7 + $0x8] sm:$0xff]  ;;  %v299_v23 = vmax.f32 %v197_v21, 1.0  ;;  %v6306_v31 = vrot.slane %v6300_v29, %v6242_v3  ;;  %v6313_v34 = vld [vmem:[%s9977_s15 + $0x10] sm:$0xff]  ;;  %v6322_v37 = vld [vmem:[%s9977_s15 + $0x18] sm:$0xff]  ;;  %5395 = vmatprep.subr.bf16.mxu0 %v5394_v44 }
  0xb4   :  { %337 = vbcast.lane.b32.xlu1 %v6258_v8, 264  ;;  %333 = vbcast.lane.b32.xlu0 %v6258_v8, 256  ;;  %v297_v25 = vmax.f32 %v195_v22, 1.0  ;;  %v6326_v38 = vrot.slane %v6300_v29, %v6245_v4  ;;  %9980 = vst [vmem:[#allocation27_spill] sm:$0xff] %v6333_v39  ;;  %v6339_v40 = vrot.slane %v6250_v5, %v6333_v39  ;;  %9981 = vst [vmem:[#allocation28_spill] sm:$0xff] %v6352_v47  ;;  %v3220_v56 = vld [vmem:[#allocation8 + $0x48] sm:$0xff] }
  0xb5   :  { %5678 = vrcp.f32 %v298_v19  ;;  %5385 = vmatpush3.bf16.msra.mxu1 %v5382_v12  ;;  %v6345_v41 = vrot.slane %v6300_v29, %v6277_v15  ;;  %5397 = vmatpush1.bf16.msra.mxu0 %v5396_v48  ;;  %v6358_v54 = vrot.slane %v6250_v5, %v6352_v47  ;;  %v3222_v57 = vld [vmem:[#allocation8 + $0x58] sm:$0xff]  ;;  %v3219_v59 = vld [vmem:[#allocation8 + $0x40] sm:$0xff]  ;;  %v3221_v60 = vld [vmem:[#allocation8 + $0x50] sm:$0xff]  ;;  %v6366_v16 = vrot.slane %v6300_v29, %v6333_v39 }
  0xb6   :  { %5680 = vrcp.f32 %v296_v20  ;;  %5387 = vmatprep.subr.bf16.mxu1 %v5386_v24  ;;  %5399 = vmatprep.subr.bf16.mxu0 %v5398_v51  ;;  %v5402_v58 = vpack.c.bf16 %v3222_v57, %v3220_v56  ;;  %v5404_v61 = vpack.c.bf16 %v3221_v60, %v3219_v59  ;;  %v3224_v62 = vld [vmem:[#allocation8 + $0x68] sm:$0xff]  ;;  %v3226_v63 = vld [vmem:[#allocation8 + $0x78] sm:$0xff]  ;;  %v3223_v12 = vld [vmem:[#allocation8 + $0x60] sm:$0xff]  ;;  %v6379_v56 = vsub.s32 5, %v6239_v2 }
  0xb7   :  { %5682 = vrcp.f32 %v299_v23  ;;  %v5406_v9 = vpack.c.bf16 %v3226_v63, %v3224_v62  ;;  %v3225_v13 = vld [vmem:[#allocation8 + $0x70] sm:$0xff]  ;;  %v3228_v18 = vld [vmem:[#allocation8 + $0x88] sm:$0xff]  ;;  %v3230_v19 = vld [vmem:[#allocation8 + $0x98] sm:$0xff]  ;;  %v9736_v57 = vmov 0.0  }
  0xb8   :  { %356 = vbcast.lane.b32.xlu1 %v6274_v14, 264  ;;  %352 = vbcast.lane.b32.xlu0 %v6274_v14, 256  ;;  %5684 = vrcp.f32 %v297_v25  ;;  %v5408_v17 = vpack.c.bf16 %v3225_v13, %v3223_v12  ;;  %v5410_v20 = vpack.c.bf16 %v3230_v19, %v3228_v18  ;;  %v3227_v21 = vld [vmem:[#allocation8 + $0x80] sm:$0xff]  ;;  %v3229_v22 = vld [vmem:[#allocation8 + $0x90] sm:$0xff]  ;;  %v3234_v25 = vld [vmem:[#allocation8 + $0xb8] sm:$0xff]  ;;  %9982 = vst [vmem:[#allocation29_spill] sm:$0xff] %v6379_v56 }
  0xb9   :  { %5389 = vmatpush3.bf16.msra.mxu1 %v5386_v24  ;;  %5401 = vmatpush1.bf16.msra.mxu0 %v5400_v55  ;;  %v5412_v23 = vpack.c.bf16 %v3229_v22, %v3227_v21  ;;  %v3232_v24 = vld [vmem:[#allocation8 + $0xa8] sm:$0xff]  ;;  %v3231_v28 = vld [vmem:[#allocation8 + $0xa0] sm:$0xff]  ;;  %v3237_v43 = vld [vmem:[#allocation8 + $0xd0] sm:$0xff]  ;;  %v6396_v12 = vrot.slane %v6300_v29, %v6352_v47  ;;  %v6404_v19 = vrot.slane %v6313_v34, %v6242_v3 }
  0xba   :  { %5391 = vmatprep.subr.bf16.mxu1 %v5390_v30  ;;  %5403 = vmatprep.subr.bf16.mxu0 %v5402_v58  ;;  %v5414_v27 = vpack.c.bf16 %v3234_v25, %v3232_v24  ;;  %v3235_v42 = vld [vmem:[#allocation8 + $0xc0] sm:$0xff]  ;;  %v3240_v45 = vld [vmem:[#allocation8 + $0xe8] sm:$0xff]  ;;  %v3242_v46 = vld [vmem:[#allocation8 + $0xf8] sm:$0xff] }
  0xbb   :  { %v5420_v44 = vpack.c.bf16 %v3237_v43, %v3235_v42  ;;  %v5422_v48 = vpack.c.bf16 %v3242_v46, %v3240_v45  ;;  %v3239_v49 = vld [vmem:[#allocation8 + $0xe0] sm:$0xff]  ;;  %v3241_v50 = vld [vmem:[#allocation8 + $0xf0] sm:$0xff]  ;;  %v3333_v53 = vld [vmem:[#allocation5 + $0x8] sm:$0xff]  ;;  %3307 = vmatprep.mubr.f32.mxu0 %v9736_v57  ;;  %9983 = vst [vmem:[#allocation30_spill] sm:$0xff] %v6404_v19  ;;  %v6422_v42 = vsub.s32 6, %v6239_v2 }
  0xbc   :  { %375 = vbcast.lane.b32.xlu1 %v6295_v26, 264  ;;  %371 = vbcast.lane.b32.xlu0 %v6295_v26, 256  ;;  %v5424_v51 = vpack.c.bf16 %v3241_v50, %v3239_v49  ;;  %v3332_v52 = vld [vmem:[#allocation5] sm:$0xff]  ;;  %v3334_v58 = vld [vmem:[#allocation5 + $0x10] sm:$0xff]  ;;  %v3335_v59 = vld [vmem:[#allocation5 + $0x18] sm:$0xff] }
  0xbd   :  { %5393 = vmatpush3.bf16.msra.mxu1 %v5390_v30  ;;  %5405 = vmatpush1.bf16.msra.mxu0 %v5404_v61  ;;  %v3233_v30 = vld [vmem:[#allocation8 + $0xb0] sm:$0xff]  ;;  %v5426_v55 = vpack.c.bf16 %v3333_v53, %v3332_v52  ;;  %v5430_v60 = vpack.c.bf16 %v3335_v59, %v3334_v58  ;;  %v6388_v61 = vrot.slane %v6250_v5, %v6379_v56  ;;  %v3336_v62 = vld [vmem:[#allocation5 + $0x20] sm:$0xff]  ;;  %v3337_v63 = vld [vmem:[#allocation5 + $0x28] sm:$0xff] }
  0xbe   :  { %5407 = vmatprep.subr.bf16.mxu0 %v5406_v9  ;;  %v5434_v9 = vpack.c.bf16 %v3337_v63, %v3336_v62  ;;  %v3338_v13 = vld [vmem:[#allocation5 + $0x30] sm:$0xff]  ;;  %v3341_v21 = vld [vmem:[#allocation5 + $0x48] sm:$0xff]  ;;  %v3343_v25 = vld [vmem:[#allocation5 + $0x58] sm:$0xff]  ;;  %9985 = vst [vmem:[#allocation32_spill] sm:$0xff] %v6422_v42  ;;  %v6428_v43 = vrot.slane %v6250_v5, %v6422_v42  ;;  %v6464_v52 = vrot.slane %v6322_v37, %v6245_v4 }
  0xbf   :  { %v5679_v32 = vpop.eup %5678  ;;  %v3342_v24 = vld [vmem:[#allocation5 + $0x50] sm:$0xff] }
  0xc0   :  { %489 = vbcast.lane.b32.xlu1 %v6306_v31, 264  ;;  %485 = vbcast.lane.b32.xlu0 %v6306_v31, 256  ;;  %v5681_v33 = vpop.eup %5680  ;;  %9986 = vst [vmem:[#allocation33_spill] sm:$0xff] %v6428_v43  ;;  %9990 = vst [vmem:[#allocation37_spill] sm:$0xff] %v6464_v52 }
  0xc1   :  { %v5683_v35 = vpop.eup %5682  ;;  %5146 = vmatmul.mubr.msk.f32.vlgmr.msra.gmra.mrb[0].mxu1 %vm198_vm0, %v6300_v29  ;;  %5409 = vmatpush1.bf16.msra.mxu0 %v5408_v17  ;;  %v3339_v17 = vld [vmem:[#allocation5 + $0x38] sm:$0xff] }
  0xc2   :  { %v5685_v36 = vpop.eup %5684  ;;  %5148 = vmatprep.mubr.msk.f32.mxu1 %vm198_vm0, %v6313_v34  ;;  %5411 = vmatprep.subr.bf16.mxu0 %v5410_v20  ;;  %v5438_v18 = vpack.c.bf16 %v3339_v17, %v3338_v13  ;;  %v3340_v20 = vld [vmem:[#allocation5 + $0x40] sm:$0xff]  ;;  %v6491_v13 = vsub.s32 7, %v6239_v2 }
  0xc3   :  { %v5442_v22 = vpack.c.bf16 %v3341_v21, %v3340_v20 }
  0xc4   :  { %316 = vperm.xlu1 %5677, %v5679_v32   ;;  %306 = vperm.xlu0 %5676, %v5681_v33   ;;  %v5416_v32 = vpack.c.bf16 %v3233_v30, %v3231_v28  ;;  %v3236_v33 = vld [vmem:[#allocation8 + $0xc8] sm:$0xff]  ;;  %v3344_v28 = vld [vmem:[#allocation5 + $0x60] sm:$0xff]  ;;  %9991 = vst [vmem:[#allocation38_spill] sm:$0xff] %v6491_v13  ;;  %v6501_v20 = vrot.slane %v6250_v5, %v6491_v13 }
  0xc5   :  { %5149 = vmatmul.mubr.msk.f32.gmra.mrb[2].mxu1 %vm198_vm0, %v6322_v37  ;;  %5413 = vmatpush1.bf16.msra.mxu0 %v5412_v23  ;;  %v6411_v23 = vrot.slane %v6313_v34, %v6245_v4  ;;  %v3345_v30 = vld [vmem:[#allocation5 + $0x68] sm:$0xff]  ;;  %v6517_v5 = vrot.slane %v6300_v29, %v6422_v42 }
  0xc6   :  { %5415 = vmatprep.subr.bf16.mxu0 %v5414_v27  ;;  %v5446_v27 = vpack.c.bf16 %v3343_v25, %v3342_v24  ;;  %9992 = vst [vmem:[#allocation39_spill] sm:$0xff] %v6501_v20 }
  0xc7   :  { %9984 = vst [vmem:[#allocation31_spill] sm:$0xff] %v6411_v23  ;;  %9993 = vst [vmem:[#allocation40_spill] sm:$0xff] %v6517_v5 }
  0xc8   :  { %321 = vperm.xlu1 %5677, %v5683_v35   ;;  %311 = vperm.xlu0 %5676, %v5685_v36   ;;  %v3238_v35 = vld [vmem:[#allocation8 + $0xd8] sm:$0xff] }
  0xc9   :  { %5417 = vmatpush1.bf16.msra.mxu0 %v5416_v32  ;;  %v5418_v36 = vpack.c.bf16 %v3238_v35, %v3236_v33  ;;  %v5450_v32 = vpack.c.bf16 %v3345_v30, %v3344_v28  ;;  %v3346_v33 = vld [vmem:[#allocation5 + $0x70] sm:$0xff]  ;;  %v3347_v35 = vld [vmem:[#allocation5 + $0x78] sm:$0xff] }
  0xcb   :  { %5419 = vmatprep.subr.bf16.mxu0 %v5418_v36  ;;  %v5454_v36 = vpack.c.bf16 %v3347_v35, %v3346_v33 }
  0xcc   :  { %508 = vbcast.lane.b32.xlu1 %v6326_v38, 264  ;;  %504 = vbcast.lane.b32.xlu0 %v6326_v38, 256 }
  0xcd   :  { %5421 = vmatpush1.bf16.msra.mxu0 %v5420_v44  ;;  %v6438_v44 = vrot.slane %v6300_v29, %v6379_v56 }
  0xce   :  { %5423 = vmatprep.subr.bf16.mxu0 %v5422_v48  ;;  %v6448_v48 = vrot.slane %v6313_v34, %v6277_v15 }
  0xcf   :  { %9987 = vst [vmem:[#allocation34_spill] sm:$0xff] %v6438_v44 }
  0xd0   :  { %360 = vbcast.lane.b32.xlu1 %v6274_v14, 272  ;;  %341 = vbcast.lane.b32.xlu0 %v6258_v8, 272  ;;  %9988 = vst [vmem:[#allocation35_spill] sm:$0xff] %v6448_v48 }
  0xd1   :  { %5425 = vmatpush1.bf16.msra.mxu0 %v5424_v51  ;;  %v6458_v51 = vrot.slane %v6322_v37, %v6242_v3 }
  0xd2   :  { %5427 = vmatprep.subr.bf16.mxu0 %v5426_v55 }
  0xd3   :  { %9989 = vst [vmem:[#allocation36_spill] sm:$0xff] %v6458_v51 }
  0xd4   :  { %394 = vbcast.lane.b32.xlu1 %v6339_v40, 264  ;;  %390 = vbcast.lane.b32.xlu0 %v6339_v40, 256 }
  0xd5   :  { %3308 = vmatmul.mubr.f32.vlgmr.msra.gmra.mrb[0].mxu0 %v6252_v6 }
  0xd6   :  { %5429 = vmatpush3.bf16.msra.mxu0 %v5426_v55  ;;  %3313 = vmatprep.mubr.f32.mxu0 %v9736_v57 }
  0xd7   :  { %5431 = vmatprep.subr.bf16.mxu0 %v5430_v60 }
  0xd8   :  { %527 = vbcast.lane.b32.xlu1 %v6345_v41, 264  ;;  %523 = vbcast.lane.b32.xlu0 %v6345_v41, 256 }
  0xd9   :  { %3314 = vmatmul.mubr.f32.gmra.mrb[2].mxu0 %v6254_v7 }
  0xda   :  { %5433 = vmatpush3.bf16.msra.mxu0 %v5430_v60  ;;  %3319 = vmatprep.mubr.f32.mxu0 %v9736_v57 }
  0xdb   :  { %5435 = vmatprep.subr.bf16.mxu0 %v5434_v9 }
  0xdc   :  { %1774 = vbcast.lane.b32.xlu1 %v6258_v8, 296  ;;  %1770 = vbcast.lane.b32.xlu0 %v6258_v8, 288 }
  0xdd   :  { %3320 = vmatmul.mubr.f32.gmra.mrb[4].mxu0 %v6262_v10 }
  0xde   :  { %5437 = vmatpush3.bf16.msra.mxu0 %v5434_v9  ;;  %3325 = vmatprep.mubr.f32.mxu0 %v9736_v57 }
  0xdf   :  { %5439 = vmatprep.subr.bf16.mxu0 %v5438_v18 }
  0xe0   :  { %1790 = vbcast.lane.b32.xlu1 %v6274_v14, 296  ;;  %1786 = vbcast.lane.b32.xlu0 %v6274_v14, 288 }
  0xe1   :  { %3326 = vmatmul.mubr.f32.gmra.mrb[6].mxu0 %v6264_v11 }
  0xe2   :  { %5441 = vmatpush3.bf16.msra.mxu0 %v5438_v18 }
  0xe3   :  { %5443 = vmatprep.subr.bf16.mxu0 %v5442_v22 }
  0xe4   :  { %409 = vbcast.lane.b32.xlu1 %v6358_v54, 256  ;;  %379 = vbcast.lane.b32.xlu0 %v6295_v26, 272 }
  0xe6   :  { %5445 = vmatpush3.bf16.msra.mxu0 %v5442_v22 }
  0xe7   :  { %5447 = vmatprep.subr.bf16.mxu0 %v5446_v27 }
  0xe8   :  { %493 = vbcast.lane.b32.xlu1 %v6306_v31, 272  ;;  %413 = vbcast.lane.b32.xlu0 %v6358_v54, 264 }
  0xea   :  { %5449 = vmatpush3.bf16.msra.mxu0 %v5446_v27 }
  0xeb   :  { %5451 = vmatprep.subr.bf16.mxu0 %v5450_v32 }
  0xec   :  { %542 = vbcast.lane.b32.xlu1 %v6366_v16, 256  ;;  %512 = vbcast.lane.b32.xlu0 %v6326_v38, 272 }
  0xee   :  { %5453 = vmatpush3.bf16.msra.mxu0 %v5450_v32  ;;  %v6533_v32 = vrot.slane %v6313_v34, %v6333_v39 }
  0xef   :  { %5455 = vmatprep.subr.bf16.mxu0 %v5454_v36 }
  0xf0   :  { %1802 = vbcast.lane.b32.xlu1 %v6295_v26, 288  ;;  %546 = vbcast.lane.b32.xlu0 %v6366_v16, 264  ;;  %9997 = vst [vmem:[#allocation44_spill] sm:$0xff] %v6533_v32 }
  0xf2   :  { %5457 = vmatpush3.bf16.msra.mxu0 %v5454_v36  ;;  %v6543_v36 = vrot.slane %v6322_v37, %v6277_v15 }
  0xf4   :  { %1898 = vbcast.lane.b32.xlu1 %v6306_v31, 288  ;;  %1806 = vbcast.lane.b32.xlu0 %v6295_v26, 296  ;;  %10000 = vst [vmem:[#allocation47_spill] sm:$0xff] %v6543_v36 }
  0xf8   :  { %1914 = vbcast.lane.b32.xlu1 %v6326_v38, 288  ;;  %1902 = vbcast.lane.b32.xlu0 %v6306_v31, 296 }
  0xfc   :  { %345 = vbcast.lane.b32.xlu1 %v6258_v8, 280  ;;  %1918 = vbcast.lane.b32.xlu0 %v6326_v38, 296 }
 0x100   :  { %398 = vbcast.lane.b32.xlu1 %v6339_v40, 272  ;;  %364 = vbcast.lane.b32.xlu0 %v6274_v14, 280 }
 0x104   :  { %432 = vbcast.lane.b32.xlu1 %v6388_v61, 264  ;;  %428 = vbcast.lane.b32.xlu0 %v6388_v61, 256 }
 0x108   :  { %561 = vbcast.lane.b32.xlu1 %v6396_v12, 256  ;;  %531 = vbcast.lane.b32.xlu0 %v6345_v41, 272 }
 0x10c   :  { %637 = vbcast.lane.b32.xlu1 %v6404_v19, 256  ;;  %565 = vbcast.lane.b32.xlu0 %v6396_v12, 264 }
 0x110   :  { %656 = vbcast.lane.b32.xlu1 %v6411_v23, 256  ;;  %641 = vbcast.lane.b32.xlu0 %v6404_v19, 264 }
 0x114   :  { %1778 = vbcast.lane.b32.xlu1 %v6258_v8, 304  ;;  %660 = vbcast.lane.b32.xlu0 %v6411_v23, 264 }
 0x118   :  { %1818 = vbcast.lane.b32.xlu1 %v6339_v40, 288  ;;  %1794 = vbcast.lane.b32.xlu0 %v6274_v14, 304 }
 0x11c   :  { %1930 = vbcast.lane.b32.xlu1 %v6345_v41, 288  ;;  %1822 = vbcast.lane.b32.xlu0 %v6339_v40, 296 }
 0x120   :  { %383 = vbcast.lane.b32.xlu1 %v6295_v26, 280  ;;  %1934 = vbcast.lane.b32.xlu0 %v6345_v41, 296 }
 0x124   :  { %447 = vbcast.lane.b32.xlu1 %v6428_v43, 256  ;;  %417 = vbcast.lane.b32.xlu0 %v6358_v54, 272 }
 0x126   :  { %v6440_v45 = vpop.permute.xlu1 %337  ;;  %v6442_v46 = vpop.permute.xlu0 %333 }
 0x127   :  { %vm937_vm1 = vcmp.gt.f32.partialorder %v6440_v45, 0.0  ;;  %vm936_vm2 = vcmp.gt.f32.partialorder %v6442_v46, 0.0 }
 0x128   :  { %497 = vbcast.lane.b32.xlu1 %v6306_v31, 280  ;;  %451 = vbcast.lane.b32.xlu0 %v6428_v43, 264 }
 0x12a   :  { %v6450_v49 = vpop.permute.xlu1 %356  ;;  %v6452_v50 = vpop.permute.xlu0 %352 }
 0x12b   :  { %vm941_vm4 = vcmp.gt.f32.partialorder %v6450_v49, 0.0  ;;  %vm940_vm5 = vcmp.gt.f32.partialorder %v6452_v50, 0.0 }
 0x12c   :  { %550 = vbcast.lane.b32.xlu1 %v6366_v16, 272  ;;  %516 = vbcast.lane.b32.xlu0 %v6326_v38, 280 }
 0x12e   :  { %v6466_v53 = vpop.permute.xlu1 %375  ;;  %v6468_v55 = vpop.permute.xlu0 %371 }
 0x12f   :  { %vm945_vm9 = vcmp.gt.f32.partialorder %v6466_v53, 0.0  ;;  %vm944_vm10 = vcmp.gt.f32.partialorder %v6468_v55, 0.0 }
 0x130   :  { %584 = vbcast.lane.b32.xlu1 %v6438_v44, 264  ;;  %580 = vbcast.lane.b32.xlu0 %v6438_v44, 256 }
 0x132   :  { %v6472_v58 = vpop.permute.xlu1 %489  ;;  %v6474_v59 = vpop.permute.xlu0 %485 }
 0x133   :  { %vm969_vm11 = vcmp.gt.f32.partialorder %v6472_v58, 0.0  ;;  %vm968_vm12 = vcmp.gt.f32.partialorder %v6474_v59, 0.0  ;;  %v6891_v58 = vld [vmem:[#allocation2] sm:$0xff] }
 0x134   :  { %679 = vbcast.lane.b32.xlu1 %v6448_v48, 264  ;;  %675 = vbcast.lane.b32.xlu0 %v6448_v48, 256  ;;  %v1328_v59 = vsel %vm944_vm10, %v6891_v58, -1e+30 }
 0x138   :  { %793 = vbcast.lane.b32.xlu1 %v6458_v51, 264  ;;  %789 = vbcast.lane.b32.xlu0 %v6458_v51, 256 }
 0x13c   :  { %812 = vbcast.lane.b32.xlu1 %v6464_v52, 264  ;;  %808 = vbcast.lane.b32.xlu0 %v6464_v52, 256 }
 0x140   :  { %1834 = vbcast.lane.b32.xlu1 %v6358_v54, 288  ;;  %1810 = vbcast.lane.b32.xlu0 %v6295_v26, 304 }
 0x143   :  { %v6478_v60 = vpop.permute.xlu1 %316  ;;  %v6480_v62 = vpop.permute.xlu0 %306 }
 0x144   :  { %1906 = vbcast.lane.b32.xlu1 %v6306_v31, 304  ;;  %1838 = vbcast.lane.b32.xlu0 %v6358_v54, 296 }
 0x147   :  { %v6484_v63 = vpop.permute.xlu1 %321  ;;  %v6486_v9 = vpop.permute.xlu0 %311 }
 0x148   :  { %1946 = vbcast.lane.b32.xlu1 %v6366_v16, 288  ;;  %1922 = vbcast.lane.b32.xlu0 %v6326_v38, 304 }
 0x14b   :  { %v6493_v17 = vpop.permute.xlu1 %508  ;;  %v6495_v18 = vpop.permute.xlu0 %504 }
 0x14c   :  { %402 = vbcast.lane.b32.xlu1 %v6339_v40, 280  ;;  %1950 = vbcast.lane.b32.xlu0 %v6366_v16, 296  ;;  %vm973_vm13 = vcmp.gt.f32.partialorder %v6493_v17, 0.0  ;;  %vm972_vm14 = vcmp.gt.f32.partialorder %v6495_v18, 0.0 }
 0x14f   :  { %v6503_v21 = vpop.permute.xlu1 %360  ;;  %v6505_v22 = vpop.permute.xlu0 %341 }
 0x150   :  { %466 = vbcast.lane.b32.xlu1 %v6501_v20, 256  ;;  %436 = vbcast.lane.b32.xlu0 %v6388_v61, 272  ;;  %vm938_vm3 = vcmp.gt.f32.partialorder %v6505_v22, 0.0  ;;  %vm942_vm7 = vcmp.gt.f32.partialorder %v6503_v21, 0.0 }
 0x151   :  { %v1326_v50 = vsel %vm942_vm7, %v6262_v10, -1e+30 }
 0x153   :  { %v6509_v2 = vpop.permute.xlu1 %394  ;;  %v6511_v24 = vpop.permute.xlu0 %390 }
 0x154   :  { %535 = vbcast.lane.b32.xlu1 %v6345_v41, 280  ;;  %470 = vbcast.lane.b32.xlu0 %v6501_v20, 264  ;;  %vm949_vm15 = vcmp.gt.f32.partialorder %v6509_v2, 0.0  ;;  %vm948_vm0 = vcmp.gt.f32.partialorder %v6511_v24, 0.0 }
 0x157   :  { %v6519_v25 = vpop.permute.xlu1 %527  ;;  %v6521_v27 = vpop.permute.xlu0 %523 }
 0x158   :  { %9994 = vst [vmem:[#allocation41_spill] sm:$0xff] %v6521_v27  ;;  %599 = vbcast.lane.b32.xlu1 %v6517_v5, 256  ;;  %569 = vbcast.lane.b32.xlu0 %v6396_v12, 272 }
 0x15b   :  { %v6525_v28 = vpop.permute.xlu1 %1774  ;;  %v6527_v30 = vpop.permute.xlu0 %1770 }
 0x15c   :  { %9995 = vst [vmem:[#allocation42_spill] sm:$0xff] %v6525_v28  ;;  %9996 = vst [vmem:[#allocation43_spill] sm:$0xff] %v6527_v30  ;;  %645 = vbcast.lane.b32.xlu1 %v6404_v19, 272  ;;  %603 = vbcast.lane.b32.xlu0 %v6517_v5, 264 }
 0x15f   :  { %v6535_v33 = vpop.permute.xlu1 %1790  ;;  %v6537_v35 = vpop.permute.xlu0 %1786  ;;  %v10092_v2 = vld [vmem:[#allocation41_spill] sm:$0xff] }
 0x160   :  { %9998 = vst [vmem:[#allocation45_spill] sm:$0xff] %v6535_v33  ;;  %9999 = vst [vmem:[#allocation46_spill] sm:$0xff] %v6537_v35  ;;  %694 = vbcast.lane.b32.xlu1 %v6533_v32, 256  ;;  %664 = vbcast.lane.b32.xlu0 %v6411_v23, 272 }
 0x163   :  { %v6545_v0 = vpop.permute.xlu1 %409  ;;  %v6547_v1 = vpop.permute.xlu0 %379  ;;  %v10093_v24 = vld [vmem:[#allocation42_spill] sm:$0xff] }
 0x164   :  { %10001 = vst [vmem:[#allocation48_spill] sm:$0xff] %v6545_v0  ;;  %10002 = vst [vmem:[#allocation49_spill] sm:$0xff] %v6547_v1  ;;  %827 = vbcast.lane.b32.xlu1 %v6543_v36, 256  ;;  %698 = vbcast.lane.b32.xlu0 %v6533_v32, 264 }
 0x167   :  { %v6551_v57 = vpop.permute.xlu1 %493  ;;  %v6553_v4 = vpop.permute.xlu0 %413 }
 0x168   :  { %10003 = vst [vmem:[#allocation50_spill] sm:$0xff] %v6551_v57  ;;  %10004 = vst [vmem:[#allocation51_spill] sm:$0xff] %v6553_v4  ;;  %1782 = vbcast.lane.b32.xlu1 %v6258_v8, 312  ;;  %831 = vbcast.lane.b32.xlu0 %v6543_v36, 264 }
 0x16b   :  { %v6557_v3 = vpop.permute.xlu1 %542  ;;  %v6559_v15 = vpop.permute.xlu0 %512 }
 0x16c   :  { %10005 = vst [vmem:[#allocation52_spill] sm:$0xff] %v6557_v3  ;;  %10006 = vst [vmem:[#allocation53_spill] sm:$0xff] %v6559_v15  ;;  %1826 = vbcast.lane.b32.xlu1 %v6339_v40, 304  ;;  %1798 = vbcast.lane.b32.xlu0 %v6274_v14, 312 }
 0x16f   :  { %v6563_v0 = vpop.permute.xlu1 %1802  ;;  %v6565_v1 = vpop.permute.xlu0 %546 }
 0x170   :  { %10007 = vst [vmem:[#allocation54_spill] sm:$0xff] %v6563_v0  ;;  %10008 = vst [vmem:[#allocation55_spill] sm:$0xff] %v6565_v1  ;;  %1854 = vbcast.lane.b32.xlu1 %v6388_v61, 296  ;;  %1850 = vbcast.lane.b32.xlu0 %v6388_v61, 288 }
 0x173   :  { %v6569_v4 = vpop.permute.xlu1 %1898  ;;  %v6571_v8 = vpop.permute.xlu0 %1806 }
 0x174   :  { %10009 = vst [vmem:[#allocation56_spill] sm:$0xff] %v6569_v4  ;;  %10010 = vst [vmem:[#allocation57_spill] sm:$0xff] %v6571_v8  ;;  %1962 = vbcast.lane.b32.xlu1 %v6396_v12, 288  ;;  %1938 = vbcast.lane.b32.xlu0 %v6345_v41, 304 }
 0x177   :  { %v6575_v3 = vpop.permute.xlu1 %1914  ;;  %v6577_v15 = vpop.permute.xlu0 %1902 }
 0x178   :  { %10011 = vst [vmem:[#allocation58_spill] sm:$0xff] %v6575_v3  ;;  %10012 = vst [vmem:[#allocation59_spill] sm:$0xff] %v6577_v15  ;;  %2026 = vbcast.lane.b32.xlu1 %v6404_v19, 288  ;;  %1966 = vbcast.lane.b32.xlu0 %v6396_v12, 296 }
 0x17b   :  { %v6581_v14 = vpop.permute.xlu1 %345  ;;  %v6583_v1 = vpop.permute.xlu0 %1918 }
 0x17c   :  { %10013 = vst [vmem:[#allocation60_spill] sm:$0xff] %v6583_v1  ;;  %2042 = vbcast.lane.b32.xlu1 %v6411_v23, 288  ;;  %2030 = vbcast.lane.b32.xlu0 %v6404_v19, 296  ;;  %v6601_v1 = vrot.slane %v6300_v29, %v6491_v13  ;;  %vm939_vm6 = vcmp.gt.f32.partialorder %v6581_v14, 0.0 }
 0x17d   :  { %v1323_v49 = vsel %vm939_vm6, %v6264_v11, -1e+30 }
 0x17e   :  { %10017 = vst [vmem:[#allocation64_spill] sm:$0xff] %v6601_v1 }
 0x17f   :  { %v6587_v8 = vpop.permute.xlu1 %398  ;;  %v6589_v4 = vpop.permute.xlu0 %364 }
 0x180   :  { %10014 = vst [vmem:[#allocation61_spill] sm:$0xff] %v6587_v8  ;;  %421 = vbcast.lane.b32.xlu1 %v6358_v54, 280  ;;  %2046 = vbcast.lane.b32.xlu0 %v6411_v23, 296  ;;  %vm943_vm8 = vcmp.gt.f32.partialorder %v6589_v4, 0.0  ;;  %v6880_v4 = vld [vmem:[#allocation2 + $0x18] sm:$0xff] }
 0x183   :  { %v6593_v15 = vpop.permute.xlu1 %432  ;;  %v6595_v3 = vpop.permute.xlu0 %428 }
 0x184   :  { %10015 = vst [vmem:[#allocation62_spill] sm:$0xff] %v6593_v15  ;;  %10016 = vst [vmem:[#allocation63_spill] sm:$0xff] %v6595_v3  ;;  %554 = vbcast.lane.b32.xlu1 %v6366_v16, 280  ;;  %455 = vbcast.lane.b32.xlu0 %v6428_v43, 272  ;;  %v6616_v3 = vrot.slane %v6313_v34, %v6352_v47 }
 0x187   :  { %v6603_v0 = vpop.permute.xlu1 %561  ;;  %v6605_v8 = vpop.permute.xlu0 %531 }
 0x188   :  { %10018 = vst [vmem:[#allocation65_spill] sm:$0xff] %v6603_v0  ;;  %10019 = vst [vmem:[#allocation66_spill] sm:$0xff] %v6605_v8  ;;  %618 = vbcast.lane.b32.xlu1 %v6601_v1, 256  ;;  %588 = vbcast.lane.b32.xlu0 %v6438_v44, 272 }
 0x18b   :  { %v6609_v57 = vpop.permute.xlu1 %637  ;;  %v6611_v15 = vpop.permute.xlu0 %565 }
 0x18c   :  { %10020 = vst [vmem:[#allocation67_spill] sm:$0xff] %v6609_v57  ;;  %10021 = vst [vmem:[#allocation68_spill] sm:$0xff] %v6611_v15  ;;  %683 = vbcast.lane.b32.xlu1 %v6448_v48, 272  ;;  %622 = vbcast.lane.b32.xlu0 %v6601_v1, 264  ;;  %v6632_v15 = vrot.slane %v6322_v37, %v6333_v39 }
 0x18e   :  { %10026 = vst [vmem:[#allocation73_spill] sm:$0xff] %v6632_v15 }
 0x18f   :  { %v6619_v29 = vpop.permute.xlu1 %656  ;;  %v6621_v0 = vpop.permute.xlu0 %641 }
 0x190   :  { %10022 = vst [vmem:[#allocation69_spill] sm:$0xff] %v6619_v29  ;;  %10023 = vst [vmem:[#allocation70_spill] sm:$0xff] %v6621_v0  ;;  %717 = vbcast.lane.b32.xlu1 %v6616_v3, 264  ;;  %713 = vbcast.lane.b32.xlu0 %v6616_v3, 256 }
 0x193   :  { %v6625_v8 = vpop.permute.xlu1 %1778  ;;  %v6627_v57 = vpop.permute.xlu0 %660 }
 0x194   :  { %10024 = vst [vmem:[#allocation71_spill] sm:$0xff] %v6625_v8  ;;  %10025 = vst [vmem:[#allocation72_spill] sm:$0xff] %v6627_v57  ;;  %816 = vbcast.lane.b32.xlu1 %v6464_v52, 272  ;;  %797 = vbcast.lane.b32.xlu0 %v6458_v51, 272  ;;  %v5147_v0 = vpop.f32.mrb[0].mxu1 }
 0x195   :  { %v277_v8 = vpop.f32.mrb[1].mxu1  ;;  %v325_v35 = vmul.f32 %v5147_v0, %v6486_v9 }
 0x196   :  { %v324_v57 = vmul.f32 %v6480_v62, %v277_v8 }
 0x197   :  { %v6635_v13 = vpop.permute.xlu1 %1818  ;;  %v6637_v29 = vpop.permute.xlu0 %1794 }
 0x198   :  { %10027 = vst [vmem:[#allocation74_spill] sm:$0xff] %v6635_v13  ;;  %10028 = vst [vmem:[#allocation75_spill] sm:$0xff] %v6637_v29  ;;  %850 = vbcast.lane.b32.xlu1 %v6632_v15, 264  ;;  %846 = vbcast.lane.b32.xlu0 %v6632_v15, 256  ;;  %v5150_v30 = vpop.f32.mrb[2].mxu1 }
 0x199   :  { %5183 = vmatprep.mubr.f32.mxu0 %v324_v57  ;;  %v287_v13 = vpop.f32.mrb[3].mxu1  ;;  %v327_v28 = vmul.f32 %v5150_v30, %v6484_v63 }
 0x19a   :  { %5184 = vmatmul.mubr.f32.vlgmr.msra.gmra.mrb[8].mxu0 %v325_v35  ;;  %v326_v29 = vmul.f32 %v6478_v60, %v287_v13 }
 0x19b   :  { %v6643_v33 = vpop.permute.xlu1 %1930  ;;  %v6645_v39 = vpop.permute.xlu0 %1822 }
 0x19c   :  { %1842 = vbcast.lane.b32.xlu1 %v6358_v54, 304  ;;  %1814 = vbcast.lane.b32.xlu0 %v6295_v26, 312 }
 0x19d   :  { %5186 = vmatprep.mubr.f32.mxu0 %v326_v29 }
 0x19e   :  { %5187 = vmatmul.mubr.f32.gmra.mrb[10].mxu0 %v327_v28 }
 0x19f   :  { %v6651_v27 = vpop.permute.xlu1 %383  ;;  %v6653_v62 = vpop.permute.xlu0 %1934 }
 0x1a0   :  { %1870 = vbcast.lane.b32.xlu1 %v6428_v43, 296  ;;  %1866 = vbcast.lane.b32.xlu0 %v6428_v43, 288 }
 0x1a3   :  { %v6657_v0 = vpop.permute.xlu1 %447  ;;  %v6659_v57 = vpop.permute.xlu0 %417 }
 0x1a4   :  { %1926 = vbcast.lane.b32.xlu1 %v6326_v38, 312  ;;  %1910 = vbcast.lane.b32.xlu0 %v6306_v31, 312 }
 0x1a7   :  { %v6663_v26 = vpop.permute.xlu1 %497  ;;  %v6665_v60 = vpop.permute.xlu0 %451 }
 0x1a8   :  { %1978 = vbcast.lane.b32.xlu1 %v6438_v44, 288  ;;  %1954 = vbcast.lane.b32.xlu0 %v6366_v16, 304 }
 0x1ab   :  { %v6669_v63 = vpop.permute.xlu1 %550  ;;  %v6671_v9 = vpop.permute.xlu0 %516 }
 0x1ac   :  { %2058 = vbcast.lane.b32.xlu1 %v6448_v48, 288  ;;  %1982 = vbcast.lane.b32.xlu0 %v6438_v44, 296 }
 0x1af   :  { %v6675_v13 = vpop.permute.xlu1 %584  ;;  %v6677_v38 = vpop.permute.xlu0 %580 }
 0x1b0   :  { %10029 = vst [vmem:[#allocation76_spill] sm:$0xff] %v6675_v13  ;;  %10030 = vst [vmem:[#allocation77_spill] sm:$0xff] %v6677_v38  ;;  %2154 = vbcast.lane.b32.xlu1 %v6458_v51, 288  ;;  %2062 = vbcast.lane.b32.xlu0 %v6448_v48, 296 }
 0x1b3   :  { %v6681_v31 = vpop.permute.xlu1 %679  ;;  %v6683_v28 = vpop.permute.xlu0 %675 }
 0x1b4   :  { %10031 = vst [vmem:[#allocation78_spill] sm:$0xff] %v6681_v31  ;;  %10032 = vst [vmem:[#allocation79_spill] sm:$0xff] %v6683_v28  ;;  %2170 = vbcast.lane.b32.xlu1 %v6464_v52, 288  ;;  %2158 = vbcast.lane.b32.xlu0 %v6458_v51, 296 }
 0x1b7   :  { %v6687_v30 = vpop.permute.xlu1 %793  ;;  %v6689_v35 = vpop.permute.xlu0 %789 }
 0x1b8   :  { %10033 = vst [vmem:[#allocation80_spill] sm:$0xff] %v6687_v30  ;;  %10034 = vst [vmem:[#allocation81_spill] sm:$0xff] %v6689_v35  ;;  %440 = vbcast.lane.b32.xlu1 %v6388_v61, 280  ;;  %2174 = vbcast.lane.b32.xlu0 %v6464_v52, 296 }
 0x1bb   :  { %v6693_v8 = vpop.permute.xlu1 %812  ;;  %v6695_v29 = vpop.permute.xlu0 %808 }
 0x1bc   :  { %10035 = vst [vmem:[#allocation82_spill] sm:$0xff] %v6693_v8  ;;  %10036 = vst [vmem:[#allocation83_spill] sm:$0xff] %v6695_v29  ;;  %573 = vbcast.lane.b32.xlu1 %v6396_v12, 280  ;;  %474 = vbcast.lane.b32.xlu0 %v6501_v20, 272  ;;  %v6712_v29 = vrot.slane %v6313_v34, %v6379_v56 }
 0x1bf   :  { %v6699_v28 = vpop.permute.xlu1 %1834  ;;  %v6701_v31 = vpop.permute.xlu0 %1810 }
 0x1c0   :  { %10037 = vst [vmem:[#allocation84_spill] sm:$0xff] %v6699_v28  ;;  %10038 = vst [vmem:[#allocation85_spill] sm:$0xff] %v6701_v31  ;;  %649 = vbcast.lane.b32.xlu1 %v6404_v19, 280  ;;  %607 = vbcast.lane.b32.xlu0 %v6517_v5, 272  ;;  %v6722_v31 = vrot.slane %v6322_v37, %v6352_v47 }
 0x1c2   :  { %10043 = vst [vmem:[#allocation90_spill] sm:$0xff] %v6722_v31 }
 0x1c3   :  { %v6705_v35 = vpop.permute.xlu1 %1906  ;;  %v6707_v30 = vpop.permute.xlu0 %1838 }
 0x1c4   :  { %10039 = vst [vmem:[#allocation86_spill] sm:$0xff] %v6705_v35  ;;  %10040 = vst [vmem:[#allocation87_spill] sm:$0xff] %v6707_v30  ;;  %702 = vbcast.lane.b32.xlu1 %v6533_v32, 272  ;;  %668 = vbcast.lane.b32.xlu0 %v6411_v23, 280 }
 0x1c7   :  { %v6715_v8 = vpop.permute.xlu1 %1946  ;;  %v6717_v28 = vpop.permute.xlu0 %1922 }
 0x1c8   :  { %10041 = vst [vmem:[#allocation88_spill] sm:$0xff] %v6715_v8  ;;  %10042 = vst [vmem:[#allocation89_spill] sm:$0xff] %v6717_v28  ;;  %736 = vbcast.lane.b32.xlu1 %v6712_v29, 264  ;;  %732 = vbcast.lane.b32.xlu0 %v6712_v29, 256 }
 0x1cb   :  { %v6725_v30 = vpop.permute.xlu1 %402  ;;  %v6727_v35 = vpop.permute.xlu0 %1950 }
 0x1cc   :  { %10044 = vst [vmem:[#allocation91_spill] sm:$0xff] %v6727_v35  ;;  %865 = vbcast.lane.b32.xlu1 %v6722_v31, 256  ;;  %835 = vbcast.lane.b32.xlu0 %v6543_v36, 272 }
 0x1cf   :  { %v6731_v38 = vpop.permute.xlu1 %466  ;;  %v6733_v8 = vpop.permute.xlu0 %436 }
 0x1d0   :  { %10045 = vst [vmem:[#allocation92_spill] sm:$0xff] %v6731_v38  ;;  %10046 = vst [vmem:[#allocation93_spill] sm:$0xff] %v6733_v8  ;;  %1830 = vbcast.lane.b32.xlu1 %v6339_v40, 312  ;;  %869 = vbcast.lane.b32.xlu0 %v6722_v31, 264 }
 0x1d3   :  { %v6737_v47 = vpop.permute.xlu1 %535  ;;  %v6739_v28 = vpop.permute.xlu0 %470 }
 0x1d4   :  { %10047 = vst [vmem:[#allocation94_spill] sm:$0xff] %v6739_v28  ;;  %1882 = vbcast.lane.b32.xlu1 %v6501_v20, 288  ;;  %1858 = vbcast.lane.b32.xlu0 %v6388_v61, 304 }
 0x1d7   :  { %v6743_v35 = vpop.permute.xlu1 %599  ;;  %v6745_v13 = vpop.permute.xlu0 %569 }
 0x1d8   :  { %10048 = vst [vmem:[#allocation95_spill] sm:$0xff] %v6743_v35  ;;  %10049 = vst [vmem:[#allocation96_spill] sm:$0xff] %v6745_v13  ;;  %1942 = vbcast.lane.b32.xlu1 %v6345_v41, 312  ;;  %1886 = vbcast.lane.b32.xlu0 %v6501_v20, 296 }
 0x1db   :  { %v6749_v38 = vpop.permute.xlu1 %645  ;;  %v6751_v40 = vpop.permute.xlu0 %603 }
 0x1dc   :  { %10050 = vst [vmem:[#allocation97_spill] sm:$0xff] %v6749_v38  ;;  %10051 = vst [vmem:[#allocation98_spill] sm:$0xff] %v6751_v40  ;;  %1994 = vbcast.lane.b32.xlu1 %v6517_v5, 288  ;;  %1970 = vbcast.lane.b32.xlu0 %v6396_v12, 304 }
 0x1df   :  { %v6755_v28 = vpop.permute.xlu1 %694  ;;  %v6757_v8 = vpop.permute.xlu0 %664 }
 0x1e0   :  { %10052 = vst [vmem:[#allocation99_spill] sm:$0xff] %v6755_v28  ;;  %10053 = vst [vmem:[#allocation100_spill] sm:$0xff] %v6757_v8  ;;  %2034 = vbcast.lane.b32.xlu1 %v6404_v19, 304  ;;  %1998 = vbcast.lane.b32.xlu0 %v6517_v5, 296  ;;  %v6773_v8 = vpop.f32.mrb[0].mxu0 }
 0x1e1   :  { %10058 = vst [vmem:[#allocation105_spill] sm:$0xff] %v6773_v8  ;;  %v6775_v28 = vpop.f32.mrb[1].mxu0 }
 0x1e2   :  { %10059 = vst [vmem:[#allocation106_spill] sm:$0xff] %v6775_v28 }
 0x1e3   :  { %v6761_v35 = vpop.permute.xlu1 %827  ;;  %v6763_v41 = vpop.permute.xlu0 %698 }
 0x1e4   :  { %10054 = vst [vmem:[#allocation101_spill] sm:$0xff] %v6761_v35  ;;  %10055 = vst [vmem:[#allocation102_spill] sm:$0xff] %v6763_v41  ;;  %2074 = vbcast.lane.b32.xlu1 %v6533_v32, 288  ;;  %2050 = vbcast.lane.b32.xlu0 %v6411_v23, 304  ;;  %v6782_v41 = vpop.f32.mrb[2].mxu0 }
 0x1e5   :  { %10062 = vst [vmem:[#allocation109_spill] sm:$0xff] %v6782_v41 }
 0x1e7   :  { %v6767_v40 = vpop.permute.xlu1 %1782  ;;  %v6769_v38 = vpop.permute.xlu0 %831 }
 0x1e8   :  { %10056 = vst [vmem:[#allocation103_spill] sm:$0xff] %v6767_v40  ;;  %10057 = vst [vmem:[#allocation104_spill] sm:$0xff] %v6769_v38  ;;  %2186 = vbcast.lane.b32.xlu1 %v6543_v36, 288  ;;  %2078 = vbcast.lane.b32.xlu0 %v6533_v32, 296  ;;  %v6785_v40 = vpop.f32.mrb[3].mxu0 }
 0x1e9   :  { %10063 = vst [vmem:[#allocation110_spill] sm:$0xff] %v6785_v40  ;;  %v6787_v38 = vpop.f32.mrb[4].mxu0  ;;  %v6808_v40 = vrot.slane %v6313_v34, %v6422_v42  ;;  %v6824_v34 = vrot.slane %v6322_v37, %v6379_v56 }
 0x1ea   :  { %10064 = vst [vmem:[#allocation111_spill] sm:$0xff] %v6787_v38  ;;  %v6794_v28 = vpop.f32.mrb[5].mxu0 }
 0x1eb   :  { %v6777_v13 = vpop.permute.xlu1 %1826  ;;  %v6779_v35 = vpop.permute.xlu0 %1798  ;;  %10067 = vst [vmem:[#allocation114_spill] sm:$0xff] %v6794_v28  ;;  %10072 = vst [vmem:[#allocation119_spill] sm:$0xff] %v6808_v40 }
 0x1ec   :  { %10060 = vst [vmem:[#allocation107_spill] sm:$0xff] %v6777_v13  ;;  %10061 = vst [vmem:[#allocation108_spill] sm:$0xff] %v6779_v35  ;;  %459 = vbcast.lane.b32.xlu1 %v6428_v43, 280  ;;  %2190 = vbcast.lane.b32.xlu0 %v6543_v36, 296  ;;  %v6797_v8 = vpop.f32.mrb[6].mxu0 }
 0x1ed   :  { %10068 = vst [vmem:[#allocation115_spill] sm:$0xff] %v6797_v8  ;;  %v6799_v13 = vpop.f32.mrb[7].mxu0  ;;  %10077 = vst [vmem:[#allocation124_spill] sm:$0xff] %v6824_v34 }
 0x1ee   :  { %10069 = vst [vmem:[#allocation116_spill] sm:$0xff] %v6799_v13 }
 0x1ef   :  { %v6789_v19 = vpop.permute.xlu1 %1854  ;;  %v6791_v23 = vpop.permute.xlu0 %1850 }
 0x1f0   :  { %10065 = vst [vmem:[#allocation112_spill] sm:$0xff] %v6789_v19  ;;  %10066 = vst [vmem:[#allocation113_spill] sm:$0xff] %v6791_v23  ;;  %626 = vbcast.lane.b32.xlu1 %v6601_v1, 272  ;;  %592 = vbcast.lane.b32.xlu0 %v6438_v44, 280 }
 0x1f3   :  { %v6801_v41 = vpop.permute.xlu1 %1962  ;;  %v6803_v35 = vpop.permute.xlu0 %1938 }
 0x1f4   :  { %10070 = vst [vmem:[#allocation117_spill] sm:$0xff] %v6801_v41  ;;  %10071 = vst [vmem:[#allocation118_spill] sm:$0xff] %v6803_v35  ;;  %721 = vbcast.lane.b32.xlu1 %v6616_v3, 272  ;;  %687 = vbcast.lane.b32.xlu0 %v6448_v48, 280 }
 0x1f7   :  { %v6811_v38 = vpop.permute.xlu1 %2026  ;;  %v6813_v28 = vpop.permute.xlu0 %1966 }
 0x1f8   :  { %10073 = vst [vmem:[#allocation120_spill] sm:$0xff] %v6811_v38  ;;  %10074 = vst [vmem:[#allocation121_spill] sm:$0xff] %v6813_v28  ;;  %755 = vbcast.lane.b32.xlu1 %v6808_v40, 264  ;;  %751 = vbcast.lane.b32.xlu0 %v6808_v40, 256 }
 0x1fb   :  { %v6817_v13 = vpop.permute.xlu1 %2042  ;;  %v6819_v8 = vpop.permute.xlu0 %2030 }
 0x1fc   :  { %10075 = vst [vmem:[#allocation122_spill] sm:$0xff] %v6817_v13  ;;  %10076 = vst [vmem:[#allocation123_spill] sm:$0xff] %v6819_v8  ;;  %820 = vbcast.lane.b32.xlu1 %v6464_v52, 280  ;;  %801 = vbcast.lane.b32.xlu0 %v6458_v51, 280 }
 0x1ff   :  { %v6827_v41 = vpop.permute.xlu1 %421  ;;  %v6829_v38 = vpop.permute.xlu0 %2046 }
 0x200   :  { %10078 = vst [vmem:[#allocation125_spill] sm:$0xff] %v6827_v41  ;;  %10079 = vst [vmem:[#allocation126_spill] sm:$0xff] %v6829_v38  ;;  %884 = vbcast.lane.b32.xlu1 %v6824_v34, 256  ;;  %854 = vbcast.lane.b32.xlu0 %v6632_v15, 272 }
 0x203   :  { %v6833_v28 = vpop.permute.xlu1 %554  ;;  %v6835_v13 = vpop.permute.xlu0 %455 }
 0x204   :  { %10080 = vst [vmem:[#allocation127_spill] sm:$0xff] %v6833_v28  ;;  %10081 = vst [vmem:[#allocation128_spill] sm:$0xff] %v6835_v13  ;;  %1846 = vbcast.lane.b32.xlu1 %v6358_v54, 312  ;;  %888 = vbcast.lane.b32.xlu0 %v6824_v34, 264  ;;  %v1321_v54 = vsel %vm937_vm1, %v6254_v7, -1e+30 }
 0x205   :  { %vm977_vm1 = vcmp.gt.f32.partialorder %v6519_v25, 0.0  ;;  %v10094_v25 = vld [vmem:[#allocation43_spill] sm:$0xff] }
 0x206   :  { %v10101_v13 = vld [vmem:[#allocation51_spill] sm:$0xff] }
 0x207   :  { %v6839_v37 = vpop.permute.xlu1 %618  ;;  %v6841_v56 = vpop.permute.xlu0 %588 }
 0x208   :  { %10082 = vst [vmem:[#allocation129_spill] sm:$0xff] %v6839_v37  ;;  %10083 = vst [vmem:[#allocation130_spill] sm:$0xff] %v6841_v56  ;;  %1958 = vbcast.lane.b32.xlu1 %v6366_v16, 312  ;;  %1874 = vbcast.lane.b32.xlu0 %v6428_v43, 304  ;;  %v1320_v37 = vsel %vm936_vm2, %v6252_v6, -1e+30 }
 0x209   :  { %v1322_v16 = vsel %vm938_vm3, %v6262_v10, -1e+30  ;;  %v1448_v22 = vmax.f32 %v1320_v37, %v1321_v54  ;;  %v1327_v37 = vsel %vm943_vm8, %v6880_v4, -1e+30  ;;  %v6884_v10 = vld [vmem:[#allocation2 + $0x8] sm:$0xff]  ;;  %vm976_vm2 = vcmp.gt.f32.partialorder %v10092_v2, 0.0 }
 0x20a   :  { %v6887_v53 = vsel %vm945_vm9, %v6884_v10, -1e+30  ;;  %vm2281_vm3 = vcmp.gt.f32.partialorder %v10093_v24, 0.0  ;;  %vm953_vm9 = vcmp.gt.f32.partialorder %v10101_v13, 0.0  ;;  %v10108_v13 = vld [vmem:[#allocation55_spill] sm:$0xff] }
 0x20b   :  { %v6847_v38 = vpop.permute.xlu1 %683  ;;  %v6849_v8 = vpop.permute.xlu0 %622  ;;  %v1449_v21 = vmax.f32 %v1448_v22, %v1322_v16  ;;  %v6904_v22 = vsel %vm973_vm13, %v6884_v10, -1e+30  ;;  %v1466_v18 = vmax.f32 %v1328_v59, %v6887_v53  ;;  %v6924_v53 = vsel %vm977_vm1, %v6884_v10, -1e+30  ;;  %v10097_v59 = vld [vmem:[#allocation49_spill] sm:$0xff] }
 0x20c   :  { %10084 = vst [vmem:[#allocation131_spill] sm:$0xff] %v6847_v38  ;;  %10085 = vst [vmem:[#allocation132_spill] sm:$0xff] %v6849_v8  ;;  %2010 = vbcast.lane.b32.xlu1 %v6601_v1, 288  ;;  %1986 = vbcast.lane.b32.xlu0 %v6438_v44, 304  ;;  %v1325_v8 = vsel %vm941_vm4, %v6254_v7, -1e+30 }
 0x20d   :  { %v1324_v38 = vsel %vm940_vm5, %v6252_v6, -1e+30  ;;  %v1450_v11 = vmax.f32 %v1449_v21, %v1323_v49  ;;  %v6916_v21 = vsel %vm949_vm15, %v6884_v10, -1e+30  ;;  %vm2280_vm4 = vcmp.gt.f32.partialorder %v10094_v25, 0.0  ;;  %v10107_v44 = vld [vmem:[#allocation54_spill] sm:$0xff] }
 0x20e   :  { %v1457_v14 = vmax.f32 %v1324_v38, %v1325_v8  ;;  %v1353_v38 = vsel %vm969_vm11, %v6884_v10, -1e+30  ;;  %v1352_v8 = vsel %vm968_vm12, %v6891_v58, -1e+30  ;;  %vm946_vm7 = vcmp.gt.f32.partialorder %v10097_v59, 0.0 }
 0x20f   :  { %v6861_v45 = vpop.permute.xlu1 %717  ;;  %v6863_v46 = vpop.permute.xlu0 %713  ;;  %v1451_v49 = vrot.slane %v1450_v11, 4  ;;  %vm947_vm12 = vcmp.gt.f32.partialorder %v6651_v27, 0.0  ;;  %vm981_vm15 = vcmp.gt.f32.partialorder %v10108_v13, 0.0  ;;  %vm971_vm1 = vcmp.gt.f32.partialorder %v6663_v26, 0.0 }
 0x210   :  { %10086 = vst [vmem:[#allocation133_spill] sm:$0xff] %v6861_v45  ;;  %10087 = vst [vmem:[#allocation134_spill] sm:$0xff] %v6863_v46  ;;  %2066 = vbcast.lane.b32.xlu1 %v6448_v48, 304  ;;  %2014 = vbcast.lane.b32.xlu0 %v6601_v1, 296  ;;  %v1458_v55 = vmax.f32 %v1457_v14, %v1326_v50  ;;  %v6910_v50 = vsel %vm972_vm14, %v6891_v58, -1e+30 }
 0x211   :  { %v6919_v14 = vsel %vm948_vm0, %v6891_v58, -1e+30  ;;  %v1452_v46 = vmax.f32 %v1450_v11, %v1451_v49  ;;  %v6942_v45 = vld [vmem:[#allocation2 + $0x20] sm:$0xff]  ;;  %vm2288_vm14 = vcmp.gt.f32.partialorder %v10107_v44, 0.0  ;;  %v1331_v35 = vsel %vm947_vm12, %v6880_v4, -1e+30 }
 0x212   :  { %v1459_v54 = vmax.f32 %v1458_v55, %v1327_v37  ;;  %v10095_v37 = vld [vmem:[#allocation45_spill] sm:$0xff]  ;;  %v10096_v55 = vld [vmem:[#allocation46_spill] sm:$0xff]  ;;  %v5704_v44 = vld [vmem:[%s9977_s15 + $0x10] sm:$0xff]  ;;  %v7027_v26 = vsel %vm981_vm15, %v6884_v10, -1e+30 }
 0x213   :  { %v6875_v7 = vpop.permute.xlu1 %816  ;;  %v6877_v6 = vpop.permute.xlu0 %797  ;;  %vm2285_vm5 = vcmp.gt.f32.partialorder %v10095_v37, 0.0  ;;  %vm2284_vm6 = vcmp.gt.f32.partialorder %v10096_v55, 0.0  ;;  %v10103_v37 = vld [vmem:[#allocation53_spill] sm:$0xff]  ;;  %v1453_v59 = vrot.slane %v1452_v46, 2 }
 0x214   :  { %10088 = vst [vmem:[#allocation135_spill] sm:$0xff] %v6875_v7  ;;  %10089 = vst [vmem:[#allocation136_spill] sm:$0xff] %v6877_v6  ;;  %2094 = vbcast.lane.b32.xlu1 %v6616_v3, 296  ;;  %2090 = vbcast.lane.b32.xlu0 %v6616_v3, 288  ;;  %v1460_v2 = vrot.slane %v1459_v54, 4  ;;  %v6935_v6 = vld [vmem:[#allocation2 + $0x28] sm:$0xff] }
 0x215   :  { %v6938_v7 = vsel %vm2281_vm3, %v6935_v6, -1e+30  ;;  %v6952_v56 = vsel %vm2285_vm5, %v6935_v6, -1e+30  ;;  %v6961_v11 = vsel %vm2284_vm6, %v6942_v45, -1e+30 }
 0x216   :  { %vm974_vm11 = vcmp.gt.f32.partialorder %v10103_v37, 0.0  ;;  %v10112_v37 = vld [vmem:[#allocation38_spill] sm:$0xff]  ;;  %vm975_vm5 = vcmp.gt.f32.partialorder %v6671_v9, 0.0  ;;  %v7078_v9 = vld [vmem:[%s9977_s15 + $0x18] sm:$0xff] }
 0x217   :  { %v6899_v16 = vpop.permute.xlu1 %850  ;;  %v6901_v17 = vpop.permute.xlu0 %846 }
 0x218   :  { %10090 = vst [vmem:[#allocation137_spill] sm:$0xff] %v6899_v16  ;;  %10091 = vst [vmem:[#allocation138_spill] sm:$0xff] %v6901_v17  ;;  %2178 = vbcast.lane.b32.xlu1 %v6464_v52, 304  ;;  %2162 = vbcast.lane.b32.xlu0 %v6458_v51, 304  ;;  %v6933_v16 = vsel %vm976_vm2, %v6891_v58, -1e+30  ;;  %v1520_v52 = vmax.f32 %v1352_v8, %v1353_v38 }
 0x219   :  { %v10100_v51 = vld [vmem:[#allocation50_spill] sm:$0xff]  ;;  %v10102_v38 = vld [vmem:[#allocation48_spill] sm:$0xff] }
 0x21a   :  { %vm970_vm8 = vcmp.gt.f32.partialorder %v10100_v51, 0.0  ;;  %v1529_v51 = vmax.f32 %v6910_v50, %v6904_v22  ;;  %vm952_vm10 = vcmp.gt.f32.partialorder %v10102_v38, 0.0  ;;  %v6964_v8 = vld [vmem:[#allocation2 + $0x10] sm:$0xff]  ;;  %v1461_v22 = vmax.f32 %v1459_v54, %v1460_v2 }
 0x21b   :  { %v6928_v24 = vpop.permute.xlu1 %1842  ;;  %v6930_v17 = vpop.permute.xlu0 %1814  ;;  %v1330_v49 = vsel %vm946_vm7, %v6964_v8, -1e+30  ;;  %v1354_v25 = vsel %vm970_vm8, %v6964_v8, -1e+30  ;;  %v6991_v2 = vsel %vm952_vm10, %v6891_v58, -1e+30 }
 0x21c   :  { %10098 = vst [vmem:[#allocation41_spill] sm:$0xff] %v6928_v24  ;;  %10099 = vst [vmem:[#allocation42_spill] sm:$0xff] %v6930_v17  ;;  %2206 = vbcast.lane.b32.xlu1 %v6632_v15, 296  ;;  %v6947_v24 = vsel %vm2280_vm4, %v6942_v45, -1e+30  ;;  %2202 = vbcast.lane.b32.xlu0 %v6632_v15, 288  ;;  %v1467_v48 = vmax.f32 %v1466_v18, %v1330_v49 }
 0x21d   :  { %v6980_v17 = vsel %vm953_vm9, %v6884_v10, -1e+30  ;;  %v1358_v27 = vsel %vm974_vm11, %v6964_v8, -1e+30  ;;  %v1462_v38 = vrot.slane %v1461_v22, 2 }
 0x21f   :  { %v6973_v50 = vpop.permute.xlu1 %1870  ;;  %v6975_v55 = vpop.permute.xlu0 %1866 }
 0x220   :  { %10104 = vst [vmem:[#allocation43_spill] sm:$0xff] %v6973_v50  ;;  %10105 = vst [vmem:[#allocation45_spill] sm:$0xff] %v6975_v55  ;;  %611 = vbcast.lane.b32.xlu1 %v6517_v5, 280  ;;  %478 = vbcast.lane.b32.xlu0 %v6501_v20, 280  ;;  %v1521_v55 = vmax.f32 %v1520_v52, %v1354_v25  ;;  %v10106_v50 = vld [vmem:[#allocation52_spill] sm:$0xff]  ;;  %v1454_v25 = vmax.f32 %v1452_v46, %v1453_v59  ;;  %v10115_v46 = vld [vmem:[#allocation58_spill] sm:$0xff] }
 0x221   :  { %vm980_vm13 = vcmp.gt.f32.partialorder %v10106_v50, 0.0  ;;  %v10111_v52 = vld [vmem:[#allocation56_spill] sm:$0xff]  ;;  %v7014_v50 = vrot.slane %v5704_v44, %v10112_v37  ;;  %vm2316_vm3 = vcmp.gt.f32.partialorder %v10115_v46, 0.0  ;;  %v10116_v59 = vld [vmem:[#allocation59_spill] sm:$0xff]  ;;  %v1468_v44 = vmax.f32 %v1467_v48, %v1331_v35 }
 0x222   :  { %vm2312_vm0 = vcmp.gt.f32.partialorder %v10111_v52, 0.0  ;;  %v7017_v54 = vsel %vm980_vm13, %v6891_v58, -1e+30  ;;  %v10114_v52 = vld [vmem:[#allocation57_spill] sm:$0xff]  ;;  %vm2313_vm4 = vcmp.gt.f32.partialorder %v10116_v59, 0.0  ;;  %v1455_v43 = vrot.slane %v1454_v25, 1 }
 0x223   :  { %v7003_v18 = vpop.permute.xlu1 %1926  ;;  %v7005_v49 = vpop.permute.xlu0 %1910  ;;  %10113 = vst [vmem:[#allocation50_spill] sm:$0xff] %v7014_v50  ;;  %vm2289_vm2 = vcmp.gt.f32.partialorder %v10114_v52, 0.0  ;;  %v7032_v23 = vsel %vm2312_vm0, %v6942_v45, -1e+30  ;;  %v10119_v46 = vld [vmem:[#allocation60_spill] sm:$0xff]  ;;  %v10120_v59 = vld [vmem:[#allocation61_spill] sm:$0xff]  ;;  %v7082_v48 = vrot.slane %v7078_v9, %v6422_v42 }
 0x224   :  { %10109 = vst [vmem:[#allocation46_spill] sm:$0xff] %v7003_v18  ;;  %10110 = vst [vmem:[#allocation49_spill] sm:$0xff] %v7005_v49  ;;  %740 = vbcast.lane.b32.xlu1 %v6712_v29, 272  ;;  %v1530_v18 = vmax.f32 %v1529_v51, %v1358_v27  ;;  %v7020_v49 = vsel %vm2288_vm14, %v6942_v45, -1e+30  ;;  %706 = vbcast.lane.b32.xlu0 %v6533_v32, 280  ;;  %v1463_v51 = vmax.f32 %v1461_v22, %v1462_v38 }
 0x225   :  { %v1355_v27 = vsel %vm971_vm1, %v6880_v4, -1e+30  ;;  %v7041_v13 = vsel %vm2289_vm2, %v6935_v6, -1e+30  ;;  %vm2317_vm6 = vcmp.gt.f32.partialorder %v10119_v46, 0.0  ;;  %vm950_vm7 = vcmp.gt.f32.partialorder %v10120_v59, 0.0 }
 0x226   :  { %v7049_v35 = vsel %vm2316_vm3, %v6942_v45, -1e+30  ;;  %v7052_v22 = vsel %vm2313_vm4, %v6935_v6, -1e+30  ;;  %v10122_v38 = vld [vmem:[#allocation62_spill] sm:$0xff]  ;;  %v1469_v46 = vrot.slane %v1468_v44, 4  ;;  %v7070_v37 = vmax.f32 %v1454_v25, %v1455_v43 }
 0x227   :  { %v7036_v52 = vpop.permute.xlu1 %1978  ;;  %v7038_v19 = vpop.permute.xlu0 %1954  ;;  %10121 = vst [vmem:[#allocation53_spill] sm:$0xff] %v7052_v22  ;;  %vm957_vm8 = vcmp.gt.f32.partialorder %v10122_v38, 0.0  ;;  %v1359_v59 = vsel %vm975_vm5, %v6880_v4, -1e+30  ;;  %v7063_v34 = vsel %vm2317_vm6, %v6935_v6, -1e+30  ;;  %v10132_v38 = vmax.f32 %v6919_v14, %v6916_v21 }
 0x228   :  { %10117 = vst [vmem:[#allocation51_spill] sm:$0xff] %v7036_v52  ;;  %10118 = vst [vmem:[#allocation48_spill] sm:$0xff] %v7038_v19  ;;  %774 = vbcast.lane.b32.xlu1 %v7014_v50, 264  ;;  %770 = vbcast.lane.b32.xlu0 %v7014_v50, 256  ;;  %v10123_v52 = vld [vmem:[#allocation63_spill] sm:$0xff]  ;;  %v1522_v19 = vmax.f32 %v1521_v55, %v1355_v27  ;;  %v1464_v28 = vrot.slane %v1463_v51, 1  ;;  %v1470_v1 = vmax.f32 %v1468_v44, %v1469_v46 }
 0x229   :  { %vm956_vm9 = vcmp.gt.f32.partialorder %v10123_v52, 0.0  ;;  %v1334_v40 = vsel %vm950_vm7, %v6964_v8, -1e+30  ;;  %10126 = vst [vmem:[#allocation55_spill] sm:$0xff] %v7070_v37  ;;  %v10127_v55 = vld [vmem:[#allocation65_spill] sm:$0xff]  ;;  %v10128_v27 = vld [vmem:[#allocation66_spill] sm:$0xff]  ;;  %v10145_v37 = vmax.f32 %v6947_v24, %v6938_v7 }
 0x22a   :  { %vm984_vm10 = vcmp.gt.f32.partialorder %v10127_v55, 0.0  ;;  %vm978_vm11 = vcmp.gt.f32.partialorder %v10128_v27, 0.0  ;;  %10129 = vst [vmem:[#allocation56_spill] sm:$0xff] %v7078_v9  ;;  %10130 = vst [vmem:[#allocation57_spill] sm:$0xff] %v7082_v48  ;;  %v7089_v43 = vsel %vm957_vm8, %v6884_v10, -1e+30  ;;  %v7103_v41 = vmax.f32 %v10132_v38, %v1334_v40 }
 0x22b   :  { %v7066_v15 = vpop.permute.xlu1 %2058  ;;  %v7068_v50 = vpop.permute.xlu0 %1982  ;;  %v7094_v25 = vsel %vm956_vm9, %v6891_v58, -1e+30  ;;  %v10131_v9 = vld [vmem:[#allocation68_spill] sm:$0xff]  ;;  %v7105_v22 = vmax.f32 %v1463_v51, %v1464_v28  ;;  %v1362_v52 = vsel %vm978_vm11, %v6964_v8, -1e+30  ;;  %v10135_v28 = vld [vmem:[#allocation67_spill] sm:$0xff]  ;;  %v10141_v40 = vmax.f32 %v6933_v16, %v6924_v53 }
 0x22c   :  { %10124 = vst [vmem:[#allocation52_spill] sm:$0xff] %v7066_v15  ;;  %10125 = vst [vmem:[#allocation54_spill] sm:$0xff] %v7068_v50  ;;  %873 = vbcast.lane.b32.xlu1 %v6722_v31, 272  ;;  %v1531_v15 = vmax.f32 %v1530_v18, %v1359_v59  ;;  %839 = vbcast.lane.b32.xlu0 %v6543_v36, 280  ;;  %vm985_vm12 = vcmp.gt.f32.partialorder %v10131_v9, 0.0  ;;  %v1523_v50 = vrot.slane %v1522_v19, 4 }
 0x22d   :  { %v7110_v18 = vsel %vm984_vm10, %v6891_v58, -1e+30  ;;  %vm1000_vm13 = vcmp.gt.f32.partialorder %v10135_v28, 0.0  ;;  %v10136_v21 = vld [vmem:[#allocation69_spill] sm:$0xff]  ;;  %v7126_v14 = vsel %vm985_vm12, %v6884_v10, -1e+30  ;;  %v1539_v42 = vmax.f32 %v10141_v40, %v1362_v52 }
 0x22e   :  { %vm1004_vm14 = vcmp.gt.f32.partialorder %v10136_v21, 0.0  ;;  %v10137_v51 = vld [vmem:[#allocation70_spill] sm:$0xff]  ;;  %v10138_v55 = vld [vmem:[#allocation71_spill] sm:$0xff]  ;;  %v1532_v27 = vrot.slane %v1531_v15, 4  ;;  %v10139_v9 = vld [vmem:[#allocation72_spill] sm:$0xff]  ;;  %v1471_v46 = vrot.slane %v1470_v1, 2  ;;  %v1524_v28 = vmax.f32 %v1522_v19, %v1523_v50 }
 0x22f   :  { %v7115_v59 = vpop.permute.xlu1 %2154  ;;  %v7117_v44 = vpop.permute.xlu0 %2062  ;;  %vm1001_vm15 = vcmp.gt.f32.partialorder %v10137_v51, 0.0  ;;  %vm2282_vm0 = vcmp.gt.f32.partialorder %v10138_v55, 0.0  ;;  %vm1005_vm1 = vcmp.gt.f32.partialorder %v10139_v9, 0.0  ;;  %v10140_v38 = vld [vmem:[#allocation75_spill] sm:$0xff]  ;;  %v7141_v51 = vsel %vm1004_vm14, %v6891_v58, -1e+30 }
 0x230   :  { %10133 = vst [vmem:[#allocation58_spill] sm:$0xff] %v7115_v59  ;;  %10134 = vst [vmem:[#allocation59_spill] sm:$0xff] %v7117_v44  ;;  %907 = vbcast.lane.b32.xlu1 %v7082_v48, 264  ;;  %903 = vbcast.lane.b32.xlu0 %v7082_v48, 256  ;;  %vm2286_vm2 = vcmp.gt.f32.partialorder %v10140_v38, 0.0  ;;  %v7152_v50 = vld [vmem:[#allocation2 + $0x30] sm:$0xff]  ;;  %v1533_v21 = vmax.f32 %v1531_v15, %v1532_v27  ;;  %v1472_v55 = vmax.f32 %v1470_v1, %v1471_v46 }
 0x231   :  { %v7138_v59 = vsel %vm1000_vm13, %v6891_v58, -1e+30  ;;  %v7150_v19 = vsel %vm1001_vm15, %v6884_v10, -1e+30  ;;  %v2666_v16 = vsel %vm2282_vm0, %v7152_v50, -1e+30 }
 0x232   :  { %v10144_v53 = vld [vmem:[#allocation74_spill] sm:$0xff]  ;;  %v7162_v52 = vsel %vm1005_vm1, %v6884_v10, -1e+30  ;;  %v2670_v40 = vsel %vm2286_vm2, %v7152_v50, -1e+30  ;;  %vm2293_vm4 = vcmp.gt.f32.partialorder %v6645_v39, 0.0 }
 0x233   :  { %v7143_v44 = vpop.permute.xlu1 %2170  ;;  %v7145_v48 = vpop.permute.xlu0 %2158  ;;  %vm2292_vm3 = vcmp.gt.f32.partialorder %v10144_v53, 0.0  ;;  %vm2320_vm5 = vcmp.gt.f32.partialorder %v6643_v33, 0.0  ;;  %v1525_v53 = vrot.slane %v1524_v28, 2  ;;  %vm951_vm6 = vcmp.gt.f32.partialorder %v6725_v30, 0.0  ;;  %v10154_v1 = vld [vmem:[#allocation30_spill] sm:$0xff] }
 0x234   :  { %10142 = vst [vmem:[#allocation60_spill] sm:$0xff] %v7143_v44  ;;  %10143 = vst [vmem:[#allocation61_spill] sm:$0xff] %v7145_v48  ;;  %1890 = vbcast.lane.b32.xlu1 %v6501_v20, 304  ;;  %1862 = vbcast.lane.b32.xlu0 %v6388_v61, 312  ;;  %v7176_v44 = vmax.f32 %v10145_v37, %v2666_v16  ;;  %v7179_v38 = vsel %vm2292_vm3, %v6942_v45, -1e+30  ;;  %v10147_v30 = vmax.f32 %v6961_v11, %v6952_v56 }
 0x235   :  { %vm979_vm7 = vcmp.gt.f32.partialorder %v6737_v47, 0.0  ;;  %v7189_v61 = vsel %vm2293_vm4, %v6935_v6, -1e+30  ;;  %vm2321_vm8 = vcmp.gt.f32.partialorder %v6653_v62, 0.0  ;;  %vm960_vm9 = vcmp.gt.f32.partialorder %v6657_v0, 0.0  ;;  %v10151_v47 = vld [vmem:[#allocation77_spill] sm:$0xff] }
 0x236   :  { %v7197_v7 = vmax.f32 %v10147_v30, %v2670_v40  ;;  %v7202_v24 = vsel %vm2320_vm5, %v6942_v45, -1e+30  ;;  %v1534_v37 = vrot.slane %v1533_v21, 2  ;;  %v1335_v46 = vsel %vm951_vm6, %v6880_v4, -1e+30  ;;  %v10152_v40 = vld [vmem:[#allocation31_spill] sm:$0xff] }
 0x237   :  { %v7182_v15 = vpop.permute.xlu1 %440  ;;  %v7184_v39 = vpop.permute.xlu0 %2174  ;;  %v1473_v62 = vrot.slane %v1472_v55, 1  ;;  %vm954_vm10 = vcmp.gt.f32.partialorder %v6659_v57, 0.0  ;;  %v1526_v0 = vmax.f32 %v1524_v28, %v1525_v53  ;;  %v1363_v56 = vsel %vm979_vm7, %v6880_v4, -1e+30  ;;  %v10150_v57 = vld [vmem:[#allocation76_spill] sm:$0xff]  ;;  %v10153_v11 = vld [vmem:[#allocation78_spill] sm:$0xff] }
 0x238   :  { %10146 = vst [vmem:[#allocation62_spill] sm:$0xff] %v7184_v39  ;;  %2002 = vbcast.lane.b32.xlu1 %v6517_v5, 304  ;;  %1974 = vbcast.lane.b32.xlu0 %v6396_v12, 312  ;;  %v7213_v33 = vsel %vm2321_vm8, %v6935_v6, -1e+30  ;;  %vm961_vm11 = vcmp.gt.f32.partialorder %v6665_v60, 0.0  ;;  %v1477_v28 = vmax.f32 %v7103_v41, %v1335_v46  ;;  %v1535_v30 = vmax.f32 %v1533_v21, %v1534_v37 }
 0x239   :  { %v7216_v27 = vsel %vm960_vm9, %v6891_v58, -1e+30  ;;  %vm982_vm12 = vcmp.gt.f32.partialorder %v6669_v63, 0.0  ;;  %vm989_vm13 = vcmp.gt.f32.partialorder %v10150_v57, 0.0  ;;  %vm988_vm14 = vcmp.gt.f32.partialorder %v10151_v47, 0.0  ;;  %v10156_v57 = vld [vmem:[#allocation79_spill] sm:$0xff] }
 0x23a   :  { %v1338_v53 = vsel %vm954_vm10, %v6964_v8, -1e+30  ;;  %vm1009_vm15 = vcmp.gt.f32.partialorder %v10153_v11, 0.0  ;;  %v1540_v60 = vmax.f32 %v1539_v42, %v1363_v56  ;;  %v7231_v9 = vmax.f32 %v1472_v55, %v1473_v62  ;;  %v10160_v47 = vld [vmem:[#allocation108_spill] sm:$0xff]  ;;  %v10165_v48 = vld [vmem:[#allocation81_spill] sm:$0xff] }
 0x23b   :  { %v7219_v12 = vpop.permute.xlu1 %573  ;;  %v7221_v16 = vpop.permute.xlu0 %474  ;;  %v7234_v63 = vsel %vm961_vm11, %v6884_v10, -1e+30  ;;  %vm1008_vm0 = vcmp.gt.f32.partialorder %v10156_v57, 0.0  ;;  %v1366_v46 = vsel %vm982_vm12, %v6964_v8, -1e+30  ;;  %v10159_v37 = vmax.f32 %v6991_v2, %v6980_v17  ;;  %v10164_v39 = vld [vmem:[#allocation80_spill] sm:$0xff] }
 0x23c   :  { %10148 = vst [vmem:[#allocation63_spill] sm:$0xff] %v7219_v12  ;;  %10149 = vst [vmem:[#allocation65_spill] sm:$0xff] %v7221_v16  ;;  %2054 = vbcast.lane.b32.xlu1 %v10152_v40, 312  ;;  %2038 = vbcast.lane.b32.xlu0 %v10154_v1, 312  ;;  %v1527_v16 = vrot.slane %v1526_v0, 1  ;;  %v1478_v11 = vrot.slane %v1477_v28, 4 }
 0x23d   :  { %10155 = vst [vmem:[#allocation66_spill] sm:$0xff] %v7231_v9  ;;  %v7241_v21 = vsel %vm989_vm13, %v6884_v10, -1e+30  ;;  %v7244_v42 = vsel %vm988_vm14, %v6891_v58, -1e+30  ;;  %v7253_v62 = vmax.f32 %v10159_v37, %v1338_v53  ;;  %vm2287_vm1 = vcmp.gt.f32.partialorder %v10160_v47, 0.0 }
 0x23e   :  { %v7256_v56 = vsel %vm1009_vm15, %v6884_v10, -1e+30  ;;  %v1536_v57 = vrot.slane %v1535_v30, 1  ;;  %v7263_v41 = vsel %vm1008_vm0, %v6891_v58, -1e+30  ;;  %v7267_v2 = vmax.f32 %v1526_v0, %v1527_v16  ;;  %v10163_v47 = vld [vmem:[#allocation103_spill] sm:$0xff] }
 0x23f   :  { %v7246_v1 = vpop.permute.xlu1 %649  ;;  %v7248_v55 = vpop.permute.xlu0 %607  ;;  %v10162_v53 = vmax.f32 %v7017_v54, %v7027_v26  ;;  %vm2283_vm2 = vcmp.gt.f32.partialorder %v10163_v47, 0.0  ;;  %vm1033_vm3 = vcmp.gt.f32.partialorder %v10164_v39, 0.0  ;;  %vm1032_vm4 = vcmp.gt.f32.partialorder %v10165_v48, 0.0  ;;  %v7279_v5 = vld [vmem:[#allocation2 + $0x38] sm:$0xff]  ;;  %v10168_v26 = vld [vmem:[#allocation82_spill] sm:$0xff]  ;;  %v10176_v47 = vld [vmem:[#allocation84_spill] sm:$0xff] }
 0x240   :  { %10157 = vst [vmem:[#allocation68_spill] sm:$0xff] %v7246_v1  ;;  %10158 = vst [vmem:[#allocation67_spill] sm:$0xff] %v7248_v55  ;;  %2106 = vbcast.lane.b32.xlu1 %v6712_v29, 288  ;;  %v1541_v55 = vrot.slane %v1540_v60, 4  ;;  %2082 = vbcast.lane.b32.xlu0 %v6533_v32, 304  ;;  %vm1037_vm5 = vcmp.gt.f32.partialorder %v10168_v26, 0.0  ;;  %v7291_v40 = vmax.f32 %v1535_v30, %v1536_v57 }
 0x241   :  { %10161 = vst [vmem:[#allocation69_spill] sm:$0xff] %v7267_v2  ;;  %v7272_v37 = vmax.f32 %v10162_v53, %v1366_v46  ;;  %v2671_v17 = vsel %vm2287_vm1, %v7279_v5, -1e+30  ;;  %v10169_v46 = vld [vmem:[#allocation83_spill] sm:$0xff]  ;;  %v1479_v53 = vmax.f32 %v1477_v28, %v1478_v11  ;;  %v10171_v9 = vld [vmem:[#allocation85_spill] sm:$0xff]  ;;  %vm2296_vm10 = vcmp.gt.f32.partialorder %v10176_v47, 0.0 }
 0x242   :  { %vm1036_vm6 = vcmp.gt.f32.partialorder %v10169_v46, 0.0  ;;  %10170 = vst [vmem:[#allocation72_spill] sm:$0xff] %v7291_v40  ;;  %vm2290_vm7 = vcmp.gt.f32.partialorder %v10171_v9, 0.0  ;;  %v1542_v32 = vmax.f32 %v1540_v60, %v1541_v55  ;;  %v7302_v26 = vsel %vm1033_vm3, %v6884_v10, -1e+30  ;;  %v10172_v55 = vld [vmem:[#allocation86_spill] sm:$0xff] }
 0x243   :  { %v7282_v0 = vpop.permute.xlu1 %702  ;;  %v7284_v16 = vpop.permute.xlu0 %668  ;;  %v7307_v28 = vsel %vm1032_vm4, %v6891_v58, -1e+30  ;;  %v2803_v9 = vmax.f32 %v7197_v7, %v2671_v17  ;;  %v7311_v30 = vsel %vm1037_vm5, %v6884_v10, -1e+30  ;;  %v7314_v60 = vsel %vm1036_vm6, %v6891_v58, -1e+30 }
 0x244   :  { %10166 = vst [vmem:[#allocation70_spill] sm:$0xff] %v7282_v0  ;;  %10167 = vst [vmem:[#allocation71_spill] sm:$0xff] %v7284_v16  ;;  %2194 = vbcast.lane.b32.xlu1 %v6543_v36, 304  ;;  %v2667_v0 = vsel %vm2283_vm2, %v7279_v5, -1e+30  ;;  %2110 = vbcast.lane.b32.xlu0 %v6712_v29, 296  ;;  %v10180_v17 = vmax.f32 %v7020_v49, %v7041_v13 }
 0x245   :  { %vm2314_vm8 = vcmp.gt.f32.partialorder %v10172_v55, 0.0  ;;  %v10173_v11 = vld [vmem:[#allocation87_spill] sm:$0xff]  ;;  %v2674_v48 = vsel %vm2290_vm7, %v7152_v50, -1e+30  ;;  %v1480_v46 = vrot.slane %v1479_v53, 2  ;;  %v2794_v7 = vmax.f32 %v7176_v44, %v2667_v0  ;;  %v10177_v54 = vld [vmem:[#allocation89_spill] sm:$0xff] }
 0x246   :  { %vm2297_vm9 = vcmp.gt.f32.partialorder %v10173_v11, 0.0  ;;  %vm2318_vm11 = vcmp.gt.f32.partialorder %v10177_v54, 0.0  ;;  %v1543_v11 = vrot.slane %v1542_v32, 2  ;;  %v2804_v44 = vrot.slane %v2803_v9, 4  ;;  %v10181_v54 = vld [vmem:[#allocation88_spill] sm:$0xff]  ;;  %v10182_v36 = vld [vmem:[#allocation91_spill] sm:$0xff] }
 0x247   :  { %v7318_v39 = vpop.permute.xlu1 %736  ;;  %v7320_v57 = vpop.permute.xlu0 %732  ;;  %v7338_v0 = vsel %vm2296_vm10, %v6942_v45, -1e+30  ;;  %v7343_v55 = vmax.f32 %v10180_v17, %v2674_v48  ;;  %vm2324_vm12 = vcmp.gt.f32.partialorder %v10181_v54, 0.0  ;;  %vm2325_vm13 = vcmp.gt.f32.partialorder %v10182_v36, 0.0  ;;  %v10185_v20 = vld [vmem:[#allocation93_spill] sm:$0xff]  ;;  %v10198_v36 = vld [vmem:[#allocation56_spill] sm:$0xff] }
 0x248   :  { %10174 = vst [vmem:[#allocation75_spill] sm:$0xff] %v7318_v39  ;;  %10175 = vst [vmem:[#allocation74_spill] sm:$0xff] %v7320_v57  ;;  %2222 = vbcast.lane.b32.xlu1 %v6722_v31, 296  ;;  %2218 = vbcast.lane.b32.xlu0 %v6722_v31, 288  ;;  %v2698_v57 = vsel %vm2314_vm8, %v7152_v50, -1e+30  ;;  %v1481_v16 = vmax.f32 %v1479_v53, %v1480_v46  ;;  %v1544_v17 = vmax.f32 %v1542_v32, %v1543_v11 }
 0x249   :  { %v7335_v39 = vsel %vm2297_vm9, %v6935_v6, -1e+30  ;;  %10179 = vst [vmem:[#allocation77_spill] sm:$0xff] %v7338_v0  ;;  %v2702_v40 = vsel %vm2318_vm11, %v7152_v50, -1e+30  ;;  %vm958_vm14 = vcmp.gt.f32.partialorder %v10185_v20, 0.0 }
 0x24a   :  { %10178 = vst [vmem:[#allocation76_spill] sm:$0xff] %v7335_v39  ;;  %v2795_v1 = vrot.slane %v2794_v7, 4  ;;  %v10186_v49 = vld [vmem:[#allocation53_spill] sm:$0xff]  ;;  %v7364_v53 = vsel %vm2324_vm12, %v6942_v45, -1e+30  ;;  %v10192_v46 = vld [vmem:[#allocation94_spill] sm:$0xff] }
 0x24b   :  { %v7347_v2 = vpop.permute.xlu1 %865  ;;  %v7349_v47 = vpop.permute.xlu0 %835  ;;  %v10187_v13 = vmax.f32 %v7032_v23, %v10186_v49  ;;  %v10188_v54 = vld [vmem:[#allocation125_spill] sm:$0xff]  ;;  %10190 = vst [vmem:[#allocation30_spill] sm:$0xff] %v7364_v53  ;;  %v7367_v20 = vsel %vm2325_vm13, %v6935_v6, -1e+30  ;;  %vm965_vm0 = vcmp.gt.f32.partialorder %v10192_v46, 0.0  ;;  %v10193_v23 = vmax.f32 %v7049_v35, %v7063_v34  ;;  %v10194_v49 = vld [vmem:[#allocation92_spill] sm:$0xff] }
 0x24c   :  { %10183 = vst [vmem:[#allocation31_spill] sm:$0xff] %v7347_v2  ;;  %10184 = vst [vmem:[#allocation78_spill] sm:$0xff] %v7349_v47  ;;  %725 = vbcast.lane.b32.xlu1 %v6616_v3, 280  ;;  %vm955_vm15 = vcmp.gt.f32.partialorder %v10188_v54, 0.0  ;;  %v10189_v2 = vld [vmem:[#allocation64_spill] sm:$0xff]  ;;  %v2805_v47 = vmax.f32 %v2803_v9, %v2804_v44  ;;  %vm964_vm1 = vcmp.gt.f32.partialorder %v10194_v49, 0.0  ;;  %v2796_v9 = vmax.f32 %v2794_v7, %v2795_v1 }
 0x24d   :  { %v7357_v48 = vmax.f32 %v10187_v13, %v2698_v57  ;;  %630 = vbcast.lane.b32.xlu0 %v10189_v2, 280  ;;  %10191 = vst [vmem:[#allocation79_spill] sm:$0xff] %v7367_v20  ;;  %v7373_v57 = vmax.f32 %v10193_v23, %v2702_v40  ;;  %v1342_v32 = vsel %vm958_vm14, %v6964_v8, -1e+30  ;;  %v10197_v54 = vld [vmem:[#allocation38_spill] sm:$0xff]  ;;  %v1482_v0 = vrot.slane %v1481_v16, 1 }
 0x24e   :  { %v7383_v39 = vrot.slane %v10198_v36, %v10197_v54  ;;  %v10199_v46 = vld [vmem:[#allocation96_spill] sm:$0xff]  ;;  %v1339_v34 = vsel %vm955_vm15, %v6880_v4, -1e+30  ;;  %v10200_v35 = vld [vmem:[#allocation73_spill] sm:$0xff]  ;;  %v1545_v44 = vrot.slane %v1544_v17, 1  ;;  %v10202_v49 = vld [vmem:[#allocation127_spill] sm:$0xff]  ;;  %v10207_v54 = vmax.f32 %v7094_v25, %v7089_v43 }
 0x24f   :  { %v7377_v11 = vpop.permute.xlu1 %1830  ;;  %v7379_v13 = vpop.permute.xlu0 %869  ;;  %vm986_vm2 = vcmp.gt.f32.partialorder %v10199_v46, 0.0  ;;  %v7391_v23 = vsel %vm965_vm0, %v6884_v10, -1e+30  ;;  %vm983_vm3 = vcmp.gt.f32.partialorder %v10202_v49, 0.0  ;;  %v7396_v36 = vsel %vm964_vm1, %v6891_v58, -1e+30 }
 0x250   :  { %10195 = vst [vmem:[#allocation108_spill] sm:$0xff] %v7377_v11  ;;  %10196 = vst [vmem:[#allocation103_spill] sm:$0xff] %v7379_v13  ;;  %858 = vbcast.lane.b32.xlu1 %v10200_v35, 280  ;;  %v10203_v13 = vld [vmem:[#allocation119_spill] sm:$0xff]  ;;  %v10206_v1 = vld [vmem:[#allocation97_spill] sm:$0xff]  ;;  %v2806_v7 = vrot.slane %v2805_v47, 2  ;;  %v7403_v40 = vmax.f32 %v10207_v54, %v1342_v32  ;;  %v1486_v49 = vmax.f32 %v7253_v62, %v1339_v34 }
 0x251   :  { %10201 = vst [vmem:[#allocation80_spill] sm:$0xff] %v7391_v23  ;;  %759 = vbcast.lane.b32.xlu0 %v10203_v13, 272  ;;  %10204 = vst [vmem:[#allocation81_spill] sm:$0xff] %v7396_v36  ;;  %v10205_v46 = vld [vmem:[#allocation95_spill] sm:$0xff]  ;;  %vm1002_vm5 = vcmp.gt.f32.partialorder %v10206_v1, 0.0  ;;  %v10208_v53 = vld [vmem:[#allocation98_spill] sm:$0xff]  ;;  %v7412_v12 = vmax.f32 %v1481_v16, %v1482_v0  ;;  %v7418_v25 = vmax.f32 %v1544_v17, %v1545_v44 }
 0x252   :  { %vm992_vm4 = vcmp.gt.f32.partialorder %v10205_v46, 0.0  ;;  %v1370_v20 = vsel %vm986_vm2, %v6964_v8, -1e+30  ;;  %vm993_vm6 = vcmp.gt.f32.partialorder %v10208_v53, 0.0  ;;  %v2797_v1 = vrot.slane %v2796_v9, 2  ;;  %v10213_v32 = vld [vmem:[#allocation99_spill] sm:$0xff] }
 0x253   :  { %v7408_v11 = vpop.permute.xlu1 %1882  ;;  %v7410_v31 = vpop.permute.xlu0 %1858  ;;  %10211 = vst [vmem:[#allocation85_spill] sm:$0xff] %v7412_v12  ;;  %v1367_v43 = vsel %vm983_vm3, %v6880_v4, -1e+30  ;;  %10212 = vst [vmem:[#allocation86_spill] sm:$0xff] %v7418_v25  ;;  %v7421_v53 = vsel %vm992_vm4, %v6891_v58, -1e+30  ;;  %v10215_v16 = vmax.f32 %v7110_v18, %v7126_v14  ;;  %v2807_v17 = vmax.f32 %v2805_v47, %v2806_v7 }
 0x254   :  { %10209 = vst [vmem:[#allocation82_spill] sm:$0xff] %v7408_v11  ;;  %10210 = vst [vmem:[#allocation83_spill] sm:$0xff] %v7410_v31  ;;  %922 = vbcast.lane.b32.xlu1 %v7383_v39, 256  ;;  %v1386_v62 = vsel %vm1002_vm5, %v6964_v8, -1e+30  ;;  %vm1012_vm7 = vcmp.gt.f32.partialorder %v10213_v32, 0.0  ;;  %v1549_v32 = vmax.f32 %v7272_v37, %v1367_v43  ;;  %v10220_v14 = vmax.f32 %v7138_v59, %v7150_v19 }
 0x255   :  { %v10214_v54 = vld [vmem:[#allocation124_spill] sm:$0xff]  ;;  %v7429_v0 = vmax.f32 %v10215_v16, %v1370_v20  ;;  %v7432_v34 = vsel %vm993_vm6, %v6884_v10, -1e+30  ;;  %v10217_v44 = vld [vmem:[#allocation102_spill] sm:$0xff]  ;;  %v1487_v11 = vrot.slane %v1486_v49, 4  ;;  %v2798_v7 = vmax.f32 %v2796_v9, %v2797_v1  ;;  %v10224_v9 = vld [vmem:[#allocation107_spill] sm:$0xff] }
 0x256   :  { %892 = vbcast.lane.b32.xlu0 %v10214_v54, 272  ;;  %v10216_v46 = vld [vmem:[#allocation100_spill] sm:$0xff]  ;;  %vm1013_vm9 = vcmp.gt.f32.partialorder %v10217_v44, 0.0  ;;  %v7446_v20 = vmax.f32 %v10220_v14, %v1386_v62  ;;  %v7449_v47 = vsel %vm1012_vm7, %v6891_v58, -1e+30  ;;  %vm2294_vm12 = vcmp.gt.f32.partialorder %v10224_v9, 0.0 }
 0x257   :  { %vm1006_vm8 = vcmp.gt.f32.partialorder %v10216_v46, 0.0  ;;  %v10218_v31 = vld [vmem:[#allocation104_spill] sm:$0xff]  ;;  %v7438_v23 = vpop.permute.xlu1 %1942  ;;  %v7440_v36 = vpop.permute.xlu0 %1886  ;;  %v10221_v46 = vld [vmem:[#allocation33_spill] sm:$0xff]  ;;  %v7461_v59 = vsel %vm1013_vm9, %v6884_v10, -1e+30  ;;  %v2808_v1 = vrot.slane %v2807_v17, 1  ;;  %v10229_v18 = vmax.f32 %v7141_v51, %v7162_v52 }
 0x258   :  { %vm1041_vm10 = vcmp.gt.f32.partialorder %v10218_v31, 0.0  ;;  %10219 = vst [vmem:[#allocation87_spill] sm:$0xff] %v7440_v36  ;;  %1878 = vbcast.lane.b32.xlu1 %v10221_v46, 312  ;;  %v1390_v43 = vsel %vm1006_vm8, %v6964_v8, -1e+30  ;;  %v10222_v36 = vld [vmem:[#allocation101_spill] sm:$0xff] }
 0x259   :  { %vm1040_vm11 = vcmp.gt.f32.partialorder %v10222_v36, 0.0  ;;  %v7466_v19 = vsel %vm1041_vm10, %v6884_v10, -1e+30  ;;  %vm9967_vm13 = vcmask 1041409   ;;  %v10225_v62 = vld [vmem:[#allocation112_spill] sm:$0xff]  ;;  %v10226_v14 = vld [vmem:[#allocation113_spill] sm:$0xff]  ;;  %v1488_v36 = vmax.f32 %v1486_v49, %v1487_v11 }
 0x25a   :  { %926 = vbcast.lane.b32.xlu0 %v7383_v39, 264  ;;  %10223 = vst [vmem:[#allocation84_spill] sm:$0xff] %v7466_v19  ;;  %vm2301_vm14 = vcmp.gt.f32.partialorder %v10225_v62, 0.0  ;;  %vm2300_vm15 = vcmp.gt.f32.partialorder %v10226_v14, 0.0  ;;  %v1550_v46 = vrot.slane %v1549_v32, 4  ;;  %v7478_v31 = vmax.f32 %v10229_v18, %v1390_v43  ;;  %v10231_v12 = vld [vmem:[#allocation118_spill] sm:$0xff] }
 0x25b   :  { %v7471_v16 = vpop.permute.xlu1 %1994  ;;  %v7473_v44 = vpop.permute.xlu0 %1970  ;;  %v7481_v37 = vsel %vm1040_vm11, %v6891_v58, -1e+30  ;;  %v2799_v25 = vrot.slane %v2798_v7, 1  ;;  %vm2322_vm0 = vcmp.gt.f32.partialorder %v10231_v12, 0.0  ;;  %v2678_v51 = vsel %vm2294_vm12, %v7152_v50, -1e+30 }
 0x25c   :  { %10227 = vst [vmem:[#allocation89_spill] sm:$0xff] %v7471_v16  ;;  %10228 = vst [vmem:[#allocation88_spill] sm:$0xff] %v7473_v44  ;;  %2018 = vbcast.lane.b32.xlu1 %v10189_v2, 304  ;;  %v10232_v52 = vld [vmem:[#allocation117_spill] sm:$0xff]  ;;  %v10233_v18 = vld [vmem:[#allocation34_spill] sm:$0xff]  ;;  %v2809_v43 = vmax.f32 %v2807_v17, %v2808_v1  ;;  %v1489_v44 = vrot.slane %v1488_v36, 2  ;;  %v1551_v16 = vmax.f32 %v1549_v32, %v1550_v46 }
 0x25d   :  { %10230 = vst [vmem:[#allocation91_spill] sm:$0xff] %v7481_v37  ;;  %vm2328_vm1 = vcmp.gt.f32.partialorder %v10232_v52, 0.0  ;;  %v7497_v12 = vsel %vm2301_vm14, %v6935_v6, -1e+30  ;;  %v7502_v11 = vsel %vm2300_vm15, %v6942_v45, -1e+30  ;;  %v2800_v1 = vmax.f32 %v2798_v7, %v2799_v25 }
 0x25e   :  { %1990 = vbcast.lane.b32.xlu0 %v10233_v18, 312  ;;  %10234 = vst [vmem:[#allocation93_spill] sm:$0xff] %v7497_v12  ;;  %10235 = vst [vmem:[#allocation53_spill] sm:$0xff] %v7502_v11  ;;  %v10236_v49 = vld [vmem:[#allocation121_spill] sm:$0xff]  ;;  %v2706_v9 = vsel %vm2322_vm0, %v7152_v50, -1e+30  ;;  %v10240_v62 = vmax.f32 %v7179_v38, %v7189_v61  ;;  %v1490_v12 = vmax.f32 %v1488_v36, %v1489_v44 }
 0x25f   :  { %vm2329_vm2 = vcmp.gt.f32.partialorder %v10236_v49, 0.0  ;;  %v10237_v52 = vld [vmem:[#allocation42_spill] sm:$0xff]  ;;  %v7507_v18 = vpop.permute.xlu1 %2034  ;;  %v7509_v17 = vpop.permute.xlu0 %1998  ;;  %v7517_v14 = vsel %vm2328_vm1, %v6942_v45, -1e+30  ;;  %v10243_v46 = vld [vmem:[#allocation120_spill] sm:$0xff]  ;;  %v10246_v38 = vld [vmem:[#allocation35_spill] sm:$0xff] }
 0x260   :  { %vm2291_vm3 = vcmp.gt.f32.partialorder %v10237_v52, 0.0  ;;  %10238 = vst [vmem:[#allocation125_spill] sm:$0xff] %v7507_v18  ;;  %10239 = vst [vmem:[#allocation64_spill] sm:$0xff] %v7509_v17  ;;  %v7514_v19 = vmax.f32 %v10240_v62, %v2678_v51  ;;  %v10242_v49 = vld [vmem:[#allocation46_spill] sm:$0xff]  ;;  %2098 = vbcast.lane.b32.xlu1 %v6616_v3, 304  ;;  %vm2344_vm5 = vcmp.gt.f32.partialorder %v10243_v46, 0.0  ;;  %v10248_v51 = vmax.f32 %v7202_v24, %v7213_v33 }
 0x261   :  { %10241 = vst [vmem:[#allocation94_spill] sm:$0xff] %v7517_v14  ;;  %vm2319_vm4 = vcmp.gt.f32.partialorder %v10242_v49, 0.0  ;;  %v7525_v52 = vsel %vm2329_vm2, %v6935_v6, -1e+30  ;;  %v10245_v25 = vld [vmem:[#allocation122_spill] sm:$0xff]  ;;  %v10249_v32 = vld [vmem:[#allocation49_spill] sm:$0xff] }
 0x262   :  { %10244 = vst [vmem:[#allocation92_spill] sm:$0xff] %v7525_v52  ;;  %vm2348_vm6 = vcmp.gt.f32.partialorder %v10245_v25, 0.0  ;;  %2070 = vbcast.lane.b32.xlu0 %v10246_v38, 312  ;;  %v10247_v61 = vmax.f32 %v7105_v22, -1e+30  ;;  %v7534_v62 = vmax.f32 %v10248_v51, %v2706_v9  ;;  %vm2315_vm7 = vcmp.gt.f32.partialorder %v10249_v32, 0.0 }
 0x263   :  { %v2675_v49 = vsel %vm2291_vm3, %v7279_v5, -1e+30  ;;  %v10250_v46 = vld [vmem:[#allocation123_spill] sm:$0xff]  ;;  %v1552_v11 = vrot.slane %v1551_v16, 2  ;;  %v2703_v25 = vsel %vm2319_vm4, %v7279_v5, -1e+30  ;;  %v7540_v17 = vpop.permute.xlu1 %2074  ;;  %v7542_v38 = vpop.permute.xlu0 %2050 }
 0x264   :  { %v3081_v7 = vmax.f32 %v10247_v61, %v2809_v43  ;;  %vm2345_vm8 = vcmp.gt.f32.partialorder %v10250_v46, 0.0  ;;  %10251 = vst [vmem:[#allocation56_spill] sm:$0xff] %v7540_v17  ;;  %10252 = vst [vmem:[#allocation96_spill] sm:$0xff] %v7542_v38  ;;  %v10253_v22 = vld [vmem:[#allocation55_spill] sm:$0xff]  ;;  %v7547_v24 = vsel %vm2344_vm5, %v6942_v45, -1e+30  ;;  %v2812_v32 = vmax.f32 %v7343_v55, %v2675_v49 }
 0x265   :  { %v10254_v43 = vmax.f32 %v10253_v22, -1e+30  ;;  %10255 = vst [vmem:[#allocation73_spill] sm:$0xff] %v7547_v24  ;;  %v7552_v9 = vsel %vm2348_vm6, %v6942_v45, -1e+30  ;;  %2126 = vbcast.lane.b32.xlu1 %v10203_v13, 296 }
 0x266   :  { %10256 = vst [vmem:[#allocation127_spill] sm:$0xff] %v7552_v9  ;;  %v10257_v36 = vld [vmem:[#allocation126_spill] sm:$0xff]  ;;  %v10258_v44 = vld [vmem:[#allocation128_spill] sm:$0xff]  ;;  %v2699_v51 = vsel %vm2315_vm7, %v7279_v5, -1e+30  ;;  %2122 = vbcast.lane.b32.xlu0 %v10203_v13, 288  ;;  %v10281_v9 = vmax.f32 %v7263_v41, %v7256_v56 }
 0x267   :  { %v3080_v61 = vmax.f32 %v10254_v43, %v2800_v1  ;;  %vm2349_vm9 = vcmp.gt.f32.partialorder %v10257_v36, 0.0  ;;  %vm962_vm10 = vcmp.gt.f32.partialorder %v10258_v44, 0.0  ;;  %v7566_v22 = vsel %vm2345_vm8, %v6935_v6, -1e+30  ;;  %v10260_v43 = vld [vmem:[#allocation130_spill] sm:$0xff]  ;;  %v10261_v17 = vld [vmem:[#allocation131_spill] sm:$0xff]  ;;  %v7572_v49 = vpop.permute.xlu1 %2186  ;;  %v7574_v52 = vpop.permute.xlu0 %2078 }
 0x268   :  { %10259 = vst [vmem:[#allocation119_spill] sm:$0xff] %v7566_v22  ;;  %vm990_vm11 = vcmp.gt.f32.partialorder %v10260_v43, 0.0  ;;  %v2875_v36 = vmax.f32 %v7373_v57, %v2703_v25  ;;  %v1491_v33 = vrot.slane %v1490_v12, 1  ;;  %v1553_v44 = vmax.f32 %v1551_v16, %v1552_v11  ;;  %v10262_v55 = vld [vmem:[#allocation132_spill] sm:$0xff]  ;;  %10263 = vst [vmem:[#allocation95_spill] sm:$0xff] %v7572_v49  ;;  %v10267_v57 = vld [vmem:[#allocation37_spill] sm:$0xff] }
 0x269   :  { %v7561_v1 = vsel %vm9967_vm13, %v3081_v7, %v3080_v61  ;;  %vm1010_vm12 = vcmp.gt.f32.partialorder %v10261_v17, 0.0  ;;  %vm997_vm14 = vcmp.gt.f32.partialorder %v10262_v55, 0.0  ;;  %10264 = vst [vmem:[#allocation97_spill] sm:$0xff] %v7574_v52  ;;  %v7577_v7 = vsel %vm2349_vm9, %v6935_v6, -1e+30  ;;  %v10266_v61 = vld [vmem:[#allocation133_spill] sm:$0xff] }
 0x26a   :  { %10265 = vst [vmem:[#allocation98_spill] sm:$0xff] %v7577_v7  ;;  %v1346_v46 = vsel %vm962_vm10, %v6964_v8, -1e+30  ;;  %vm1017_vm15 = vcmp.gt.f32.partialorder %v10266_v61, 0.0  ;;  %v2866_v43 = vmax.f32 %v7357_v48, %v2699_v51  ;;  %2182 = vbcast.lane.b32.xlu1 %v10267_v57, 312  ;;  %v10268_v17 = vld [vmem:[#allocation134_spill] sm:$0xff]  ;;  %v7593_v51 = vmax.f32 %v1490_v12, %v1491_v33 }
 0x26b   :  { %v1374_v11 = vsel %vm990_vm11, %v6964_v8, -1e+30  ;;  %vm1016_vm0 = vcmp.gt.f32.partialorder %v10268_v17, 0.0  ;;  %v2813_v25 = vrot.slane %v2812_v32, 4  ;;  %v10269_v55 = vld [vmem:[#allocation36_spill] sm:$0xff]  ;;  %v10270_v52 = vld [vmem:[#allocation129_spill] sm:$0xff]  ;;  %v7599_v17 = vpop.permute.xlu1 %459  ;;  %v7601_v24 = vpop.permute.xlu0 %2190  ;;  %v10278_v33 = vmax.f32 %v7216_v27, %v7234_v63 }
 0x26c   :  { %2166 = vbcast.lane.b32.xlu0 %v10269_v55, 312  ;;  %vm996_vm1 = vcmp.gt.f32.partialorder %v10270_v52, 0.0  ;;  %v1394_v49 = vsel %vm1010_vm12, %v6964_v8, -1e+30  ;;  %v7591_v61 = vsel %vm997_vm14, %v6884_v10, -1e+30  ;;  %v10280_v55 = vmax.f32 %v7244_v42, %v7241_v21 }
 0x26d   :  { %10271 = vst [vmem:[#allocation99_spill] sm:$0xff] %v7591_v61  ;;  %v2876_v48 = vrot.slane %v2875_v36, 4  ;;  %10272 = vst [vmem:[#allocation124_spill] sm:$0xff] %v7593_v51  ;;  %v1554_v57 = vrot.slane %v1553_v44, 1  ;;  %v7596_v16 = vsel %vm1017_vm15, %v6884_v10, -1e+30  ;;  %v7613_v18 = vmax.f32 %v10278_v33, %v1346_v46 }
 0x26e   :  { %10273 = vst [vmem:[#allocation100_spill] sm:$0xff] %v7596_v16  ;;  %v10274_v22 = vld [vmem:[#allocation135_spill] sm:$0xff]  ;;  %10275 = vst [vmem:[#allocation102_spill] sm:$0xff] %v7601_v24  ;;  %v7606_v14 = vsel %vm1016_vm0, %v6891_v58, -1e+30  ;;  %v10277_v38 = vld [vmem:[#allocation136_spill] sm:$0xff]  ;;  %v7623_v24 = vmax.f32 %v10280_v55, %v1374_v11  ;;  %v2814_v7 = vmax.f32 %v2812_v32, %v2813_v25  ;;  %v7629_v37 = vmax.f32 %v10281_v9, %v1394_v49 }
 0x26f   :  { %vm1038_vm2 = vcmp.gt.f32.partialorder %v10274_v22, 0.0  ;;  %10276 = vst [vmem:[#allocation104_spill] sm:$0xff] %v7606_v14  ;;  %vm1034_vm3 = vcmp.gt.f32.partialorder %v10277_v38, 0.0  ;;  %v2867_v12 = vrot.slane %v2866_v43, 4  ;;  %2234 = vbcast.lane.b32.xlu1 %v10214_v54, 288  ;;  %v2877_v52 = vmax.f32 %v2875_v36, %v2876_v48  ;;  %v7645_v56 = vpop.permute.xlu1 %626  ;;  %v7647_v9 = vpop.permute.xlu0 %592  ;;  %v10284_v36 = vld [vmem:[#allocation137_spill] sm:$0xff] }
 0x270   :  { %v7618_v22 = vsel %vm996_vm1, %v6891_v58, -1e+30  ;;  %2210 = vbcast.lane.b32.xlu0 %v10200_v35, 304  ;;  %v1422_v63 = vsel %vm1038_vm2, %v6964_v8, -1e+30  ;;  %v7638_v32 = vmax.f32 %v1553_v44, %v1554_v57  ;;  %10283 = vst [vmem:[#allocation107_spill] sm:$0xff] %v7645_v56  ;;  %v10286_v25 = vmax.f32 %v7314_v60, %v7311_v30 }
 0x271   :  { %10279 = vst [vmem:[#allocation33_spill] sm:$0xff] %v7618_v22  ;;  %v4986_v21 = vld [vmem:[%s9710_s4] ss:$0 sm:$0xff]  ;;  %v1418_v41 = vsel %vm1034_vm3, %v6964_v8, -1e+30  ;;  %vm1045_vm4 = vcmp.gt.f32.partialorder %v10284_v36, 0.0  ;;  %v2868_v11 = vmax.f32 %v2866_v43, %v2867_v12  ;;  %v10288_v43 = vmax.f32 %v7307_v28, %v7302_v26 }
 0x272   :  { %10282 = vst [vmem:[#allocation101_spill] sm:$0xff] %v7638_v32  ;;  %v10285_v49 = vld [vmem:[#allocation138_spill] sm:$0xff]  ;;  %vm959_vm6 = vcmp.gt.f32.partialorder %v7182_v15, 0.0  ;;  %v5185_v44 = vpop.f32.mrb[8].mxu0  ;;  %v7656_v48 = vmax.f32 %v10286_v25, %v1422_v63  ;;  %v10287_v8 = vld [vmem:[#allocation41_spill] sm:$0xff]  ;;  %v2815_v38 = vrot.slane %v2814_v7, 2 }
 0x273   :  { %vm1044_vm5 = vcmp.gt.f32.partialorder %v10285_v49, 0.0  ;;  %744 = vbcast.lane.b32.xlu1 %v6712_v29, 280  ;;  %vm2298_vm7 = vcmp.gt.f32.partialorder %v10287_v8, 0.0  ;;  %v3427_v57 = vadd.f32 %v5185_v44, %v4986_v21  ;;  %v3421_v55 = vpop.f32.mrb[9].mxu0  ;;  %v7663_v12 = vmax.f32 %v10288_v43, %v1418_v41  ;;  %v10289_v33 = vld [vmem:[#allocation63_spill] sm:$0xff]  ;;  %v10292_v44 = vld [vmem:[#allocation109_spill] sm:$0xff]  ;;  %v7678_v28 = vpop.permute.xlu1 %721 }
 0x274   :  { %2238 = vbcast.lane.b32.xlu0 %v10214_v54, 296  ;;  %v2878_v15 = vrot.slane %v2877_v52, 2  ;;  %vm987_vm8 = vcmp.gt.f32.partialorder %v10289_v33, 0.0  ;;  %v3422_v42 = vadd.f32 %v4986_v21, %v3421_v55  ;;  %v7669_v30 = vsel %vm1045_vm4, %v6884_v10, -1e+30  ;;  %10293 = vst [vmem:[#allocation118_spill] sm:$0xff] %v7678_v28  ;;  %v7680_v41 = vpop.permute.xlu0 %687 }
 0x275   :  { %10290 = vst [vmem:[#allocation112_spill] sm:$0xff] %v7669_v30  ;;  %v7674_v60 = vsel %vm1044_vm5, %v6891_v58, -1e+30  ;;  %v1343_v63 = vsel %vm959_vm6, %v6880_v4, -1e+30  ;;  %v3441_v26 = vadd.f32 %v3427_v57, %v10292_v44  ;;  %v10294_v8 = vld [vmem:[#allocation43_spill] sm:$0xff]  ;;  %v2816_v58 = vmax.f32 %v2814_v7, %v2815_v38 }
 0x276   :  { %10291 = vst [vmem:[#allocation113_spill] sm:$0xff] %v7674_v60  ;;  %v2682_v25 = vsel %vm2298_vm7, %v7152_v50, -1e+30  ;;  %vm2305_vm9 = vcmp.gt.f32.partialorder %v10294_v8, 0.0  ;;  %v2869_v36 = vrot.slane %v2868_v11, 2  ;;  %v10295_v10 = vld [vmem:[#allocation105_spill] sm:$0xff]  ;;  %v2879_v16 = vmax.f32 %v2877_v52, %v2878_v15 }
 0x277   :  { %v3440_v55 = vadd.f32 %v3422_v42, %v10295_v10  ;;  %v5188_v43 = vpop.f32.mrb[10].mxu0  ;;  %v10296_v46 = vld [vmem:[#allocation90_spill] sm:$0xff]  ;;  %v10297_v49 = vld [vmem:[#allocation45_spill] sm:$0xff]  ;;  %v1371_v57 = vsel %vm987_vm8, %v6880_v4, -1e+30  ;;  %v1495_v14 = vmax.f32 %v7403_v40, %v1343_v63  ;;  %v10299_v61 = vld [vmem:[#allocation68_spill] sm:$0xff]  ;;  %v7694_v38 = vpop.permute.xlu1 %755 }
 0x278   :  { %877 = vbcast.lane.b32.xlu1 %v10296_v46, 280  ;;  %vm2304_vm10 = vcmp.gt.f32.partialorder %v10297_v49, 0.0  ;;  %v3437_v44 = vadd.f32 %v5188_v43, %v4986_v21  ;;  %v10298_v27 = vld [vmem:[#allocation50_spill] sm:$0xff]  ;;  %v3431_v51 = vpop.f32.mrb[11].mxu0  ;;  %vm1003_vm11 = vcmp.gt.f32.partialorder %v10299_v61, 0.0  ;;  %v3557_v42 = vmax.f32 %v3441_v26, 0.0  ;;  %v7696_v56 = vpop.permute.xlu0 %751 }
 0x279   :  { %778 = vbcast.lane.b32.xlu0 %v10298_v27, 272  ;;  %v3556_v10 = vmax.f32 %v3440_v55, 0.0  ;;  %v10300_v22 = vld [vmem:[#allocation115_spill] sm:$0xff]  ;;  %v3432_v7 = vadd.f32 %v4986_v21, %v3431_v51  ;;  %10301 = vst [vmem:[#allocation117_spill] sm:$0xff] %v7694_v38  ;;  %10302 = vst [vmem:[#allocation34_spill] sm:$0xff] %v7696_v56  ;;  %v7701_v33 = vld [vmem:[%s9714_s8] sm:$0xff]  ;;  %v2870_v15 = vmax.f32 %v2868_v11, %v2869_v36 }
 0x27a   :  { %v3443_v28 = vadd.f32 %v3437_v44, %v10300_v22  ;;  %vm3568_vm12 = vcmask 261120   ;;  %v1558_v63 = vmax.f32 %v7429_v0, %v1371_v57  ;;  %v10303_v22 = vld [vmem:[#allocation39_spill] sm:$0xff]  ;;  %v2817_v51 = vrot.slane %v2816_v58, 1  ;;  %v10305_v44 = vld [vmem:[#allocation57_spill] sm:$0xff]  ;;  %v10307_v40 = vld [vmem:[#allocation76_spill] sm:$0xff] }
 0x27b   :  { %5235 = vmatprep.mubr.msk.f32.mxu0 %vm3568_vm12, %v7701_v33  ;;  %v1387_v21 = vsel %vm1003_vm11, %v6880_v4, -1e+30  ;;  %v10304_v55 = vld [vmem:[#allocation111_spill] sm:$0xff]  ;;  %v10306_v52 = vld [vmem:[#allocation77_spill] sm:$0xff]  ;;  %v7723_v0 = vsel %vm2305_vm9, %v6935_v6, -1e+30 }
 0x27c   :  { %1894 = vbcast.lane.b32.xlu1 %v10303_v22, 312  ;;  %v3559_v26 = vmax.f32 %v3443_v28, 0.0  ;;  %v3442_v43 = vadd.f32 %v3432_v7, %v10304_v55  ;;  %v10308_v11 = vmax.f32 %v10306_v52, %v10307_v40  ;;  %10309 = vst [vmem:[#allocation121_spill] sm:$0xff] %v7723_v0  ;;  %v7728_v61 = vsel %vm2304_vm10, %v6942_v45, -1e+30  ;;  %v10311_v4 = vld [vmem:[#allocation48_spill] sm:$0xff]  ;;  %v7731_v52 = vpop.permute.xlu1 %820 }
 0x27d   :  { %911 = vbcast.lane.b32.xlu0 %v10305_v44, 272  ;;  %10310 = vst [vmem:[#allocation42_spill] sm:$0xff] %v7728_v61  ;;  %vm2326_vm14 = vcmp.gt.f32.partialorder %v10311_v4, 0.0  ;;  %vm9966_vm15 = vcmask 1042434   ;;  %v2880_v28 = vrot.slane %v2879_v16, 1  ;;  %v1496_v57 = vrot.slane %v1495_v14, 4 }
 0x27e   :  { %v7718_v36 = vmax.f32 %v10308_v11, %v2682_v25  ;;  %v3558_v7 = vmax.f32 %v3442_v43, 0.0  ;;  %v5490_v22 = vpack.c.bf16 %v3557_v42, %v3556_v10  ;;  %v7733_v25 = vpop.permute.xlu0 %801  ;;  %v2871_v40 = vrot.slane %v2870_v15, 1  ;;  %v10312_v55 = vld [vmem:[#allocation71_spill] sm:$0xff]  ;;  %v10313_v49 = vld [vmem:[#allocation44_spill] sm:$0xff]  ;;  %v10325_v32 = vld [vmem:[#allocation30_spill] sm:$0xff] }
 0x27f   :  { %v1559_v8 = vrot.slane %v1558_v63, 4  ;;  %v1594_v6 = vmax.f32 %v7446_v20, %v1387_v21  ;;  %vm1007_vm0 = vcmp.gt.f32.partialorder %v10312_v55, 0.0  ;;  %v2818_v11 = vmax.f32 %v2816_v58, %v2817_v51  ;;  %v10314_v30 = vld [vmem:[#allocation51_spill] sm:$0xff]  ;;  %v10315_v42 = vld [vmem:[#allocation40_spill] sm:$0xff]  ;;  %v10317_v20 = vld [vmem:[#allocation54_spill] sm:$0xff] }
 0x280   :  { %2086 = vbcast.lane.b32.xlu1 %v10313_v49, 312  ;;  %vm2332_vm1 = vcmp.gt.f32.partialorder %v10314_v30, 0.0  ;;  %5491 = vmatprep.subr.bf16.mxu0 %v5490_v22  ;;  %v5494_v10 = vpack.c.bf16 %v3559_v26, %v3558_v7  ;;  %v2710_v43 = vsel %vm2326_vm14, %v7152_v50, -1e+30  ;;  %v10316_v60 = vld [vmem:[#allocation52_spill] sm:$0xff]  ;;  %vm2333_vm3 = vcmp.gt.f32.partialorder %v10317_v20, 0.0  ;;  %v7754_v4 = vpop.permute.xlu1 %884 }
 0x281   :  { %2006 = vbcast.lane.b32.xlu0 %v10315_v42, 312  ;;  %vm2352_vm2 = vcmp.gt.f32.partialorder %v10316_v60, 0.0  ;;  %v10318_v21 = vld [vmem:[#allocation59_spill] sm:$0xff]  ;;  %5493 = vmatpush3.bf16.msra.mxu0 %v5490_v22  ;;  %v2881_v58 = vmax.f32 %v2879_v16, %v2880_v28  ;;  %v1497_v51 = vmax.f32 %v1495_v14, %v1496_v57  ;;  %v7748_v49 = vld [vmem:[#allocation2 + $0x18] sm:$0xff]  ;;  %v10319_v26 = vld [vmem:[#allocation108_spill] sm:$0xff]  ;;  %10320 = vst [vmem:[#allocation46_spill] sm:$0xff] %v7754_v4 }
 0x282   :  { %vm2353_vm4 = vcmp.gt.f32.partialorder %v10318_v21, 0.0  ;;  %v1391_v42 = vsel %vm1007_vm0, %v7748_v49, -1e+30  ;;  %vm2295_vm5 = vcmp.gt.f32.partialorder %v10319_v26, 0.0  ;;  %5495 = vmatprep.subr.bf16.mxu0 %v5494_v10  ;;  %v7756_v50 = vpop.permute.xlu0 %854  ;;  %v2872_v7 = vmax.f32 %v2870_v15, %v2871_v40  ;;  %v10323_v28 = vld [vmem:[#allocation66_spill] sm:$0xff]  ;;  %v10326_v0 = vld [vmem:[#allocation79_spill] sm:$0xff] }
 0x283   :  { %10321 = vst [vmem:[#allocation120_spill] sm:$0xff] %v7756_v50  ;;  %v7761_v22 = vsel %vm2332_vm1, %v6942_v45, -1e+30  ;;  %v1560_v14 = vmax.f32 %v1558_v63, %v1559_v8  ;;  %v1595_v16 = vrot.slane %v1594_v6, 4  ;;  %v10324_v57 = vmax.f32 %v10323_v28, -1e+30 }
 0x284   :  { %10322 = vst [vmem:[#allocation122_spill] sm:$0xff] %v7761_v22  ;;  %2138 = vbcast.lane.b32.xlu1 %v10298_v27, 288  ;;  %v10327_v61 = vmax.f32 %v10325_v32, %v10326_v0  ;;  %v7771_v4 = vld [vmem:[#allocation2 + $0x20] sm:$0xff]  ;;  %v7778_v45 = vld [vmem:[#allocation2 + $0x28] sm:$0xff]  ;;  %v1603_v60 = vmax.f32 %v7478_v31, %v1391_v42  ;;  %v2679_v0 = vsel %vm2295_vm5, %v7279_v5, -1e+30  ;;  %v7800_v28 = vpop.permute.xlu1 %1846 }
 0x285   :  { %v3082_v55 = vmax.f32 %v10324_v57, %v2818_v11  ;;  %v7776_v30 = vsel %vm2352_vm2, %v7771_v4, -1e+30  ;;  %v7783_v15 = vsel %vm2333_vm3, %v7778_v45, -1e+30  ;;  %2114 = vbcast.lane.b32.xlu0 %v6712_v29, 304  ;;  %v10330_v63 = vld [vmem:[#allocation58_spill] sm:$0xff]  ;;  %5497 = vmatpush3.bf16.msra.mxu0 %v5494_v10  ;;  %v1596_v38 = vmax.f32 %v1594_v6, %v1595_v16 }
 0x286   :  { %v7769_v56 = vmax.f32 %v10327_v61, %v2710_v43  ;;  %10328 = vst [vmem:[#allocation35_spill] sm:$0xff] %v7776_v30  ;;  %10329 = vst [vmem:[#allocation49_spill] sm:$0xff] %v7783_v15  ;;  %vm2376_vm6 = vcmp.gt.f32.partialorder %v10330_v63, 0.0  ;;  %v7790_v32 = vsel %vm2353_vm4, %v7778_v45, -1e+30  ;;  %v10332_v61 = vld [vmem:[#allocation72_spill] sm:$0xff]  ;;  %v7802_v21 = vpop.permute.xlu0 %888 }
 0x287   :  { %10331 = vst [vmem:[#allocation123_spill] sm:$0xff] %v7790_v32  ;;  %v10333_v40 = vmax.f32 %v10332_v61, -1e+30  ;;  %v10334_v11 = vld [vmem:[#allocation61_spill] sm:$0xff]  ;;  %v1498_v43 = vrot.slane %v1497_v51, 2  ;;  %v10335_v20 = vld [vmem:[#allocation62_spill] sm:$0xff]  ;;  %v7826_v6 = vsel %vm9966_vm15, %v3082_v55, %v7561_v1 }
 0x288   :  { %vm2377_vm7 = vcmp.gt.f32.partialorder %v10334_v11, 0.0  ;;  %vm2381_vm8 = vcmp.gt.f32.partialorder %v10335_v20, 0.0  ;;  %v10336_v57 = vld [vmem:[#allocation69_spill] sm:$0xff]  ;;  %v10338_v42 = vld [vmem:[#allocation60_spill] sm:$0xff]  ;;  %v1561_v26 = vrot.slane %v1560_v14, 2  ;;  %v10339_v10 = vld [vmem:[#allocation47_spill] sm:$0xff] }
 0x289   :  { %v3089_v8 = vmax.f32 %v10333_v40, %v2881_v58  ;;  %v10337_v50 = vmax.f32 %v10336_v57, -1e+30  ;;  %vm2380_vm9 = vcmp.gt.f32.partialorder %v10338_v42, 0.0  ;;  %2198 = vbcast.lane.b32.xlu1 %v10339_v10, 312  ;;  %v7811_v58 = vld [vmem:[%s9714_s8 + $0x8] sm:$0xff]  ;;  %2142 = vbcast.lane.b32.xlu0 %v10298_v27, 296  ;;  %v1499_v55 = vmax.f32 %v1497_v51, %v1498_v43  ;;  %v7848_v57 = vpop.permute.xlu1 %1958 }
 0x28a   :  { %v7818_v40 = vsel %vm2376_vm6, %v7771_v4, -1e+30  ;;  %5236 = vmatmul.mubr.msk.f32.vlgmr.msra.gmra.mrb[12].mxu0 %vm3568_vm12, %v7811_v58  ;;  %v7836_v16 = vsel %vm2381_vm8, %v7778_v45, -1e+30  ;;  %vm2323_vm10 = vcmp.gt.f32.partialorder %v7438_v23, 0.0  ;;  %v10343_v63 = vmov 0.0   ;;  %v7850_v20 = vpop.permute.xlu0 %1874 }
 0x28b   :  { %v3088_v31 = vmax.f32 %v10337_v50, %v2872_v7  ;;  %10340 = vst [vmem:[#allocation55_spill] sm:$0xff] %v7818_v40  ;;  %v2821_v50 = vmax.f32 %v7514_v19, %v2679_v0  ;;  %v7831_v7 = vsel %vm2377_vm7, %v7778_v45, -1e+30  ;;  %10342 = vst [vmem:[#allocation128_spill] sm:$0xff] %v7836_v16  ;;  %v1604_v19 = vrot.slane %v1603_v60, 4  ;;  %4528 = vmatprep.mubr.f32.mxu0 %v10343_v63  ;;  %v10345_v11 = vld [vmem:[#allocation65_spill] sm:$0xff] }
 0x28c   :  { %10341 = vst [vmem:[#allocation126_spill] sm:$0xff] %v7831_v7  ;;  %v7845_v1 = vsel %vm2380_vm9, %v7771_v4, -1e+30  ;;  %vm966_vm11 = vcmp.gt.f32.partialorder %v10345_v11, 0.0  ;;  %v1562_v61 = vmax.f32 %v1560_v14, %v1561_v26  ;;  %v1597_v63 = vrot.slane %v1596_v38, 2  ;;  %v10346_v15 = vld [vmem:[#allocation67_spill] sm:$0xff] }
 0x28d   :  { %10344 = vst [vmem:[#allocation130_spill] sm:$0xff] %v7845_v1  ;;  %v7853_v10 = vsel %vm9967_vm13, %v3089_v8, %v3088_v31  ;;  %vm994_vm12 = vcmp.gt.f32.partialorder %v10346_v15, 0.0  ;;  %2250 = vbcast.lane.b32.xlu1 %v10305_v44, 288  ;;  %v2822_v43 = vrot.slane %v2821_v50, 4  ;;  %v2707_v11 = vsel %vm2323_vm10, %v7279_v5, -1e+30  ;;  %v7876_v51 = vpop.permute.xlu1 %2010 }
 0x28e   :  { %2226 = vbcast.lane.b32.xlu0 %v10296_v46, 304  ;;  %v7865_v8 = vld [vmem:[#allocation2 + $0x10] sm:$0xff]  ;;  %v1605_v15 = vmax.f32 %v1603_v60, %v1604_v19  ;;  %v5712_v31 = vld [vmem:[%s9979_s7 + $0x8] sm:$0xff]  ;;  %v5713_v26 = vld [vmem:[%s9979_s7] sm:$0xff]  ;;  %v1500_v42 = vrot.slane %v1499_v55, 1  ;;  %10348 = vst [vmem:[#allocation131_spill] sm:$0xff] %v7876_v51  ;;  %v7878_v0 = vpop.permute.xlu0 %1986  ;;  %v1598_v7 = vmax.f32 %v1596_v38, %v1597_v63  ;;  %v2884_v40 = vmax.f32 %v7534_v62, %v2707_v11 }
 0x28f   :  { %v1350_v14 = vsel %vm966_vm11, %v7865_v8, -1e+30  ;;  %vm3113_vm14 = vcmp.gt.f32.partialorder %v5712_v31, 0.0  ;;  %vm3112_vm0 = vcmp.gt.f32.partialorder %v5713_v26, 0.0  ;;  %v1378_v5 = vsel %vm994_vm12, %v7865_v8, -1e+30 }
 0x290   :  { %v10347_v23 = vld [vmem:[#allocation70_spill] sm:$0xff]  ;;  %v5714_v60 = vld [vmem:[%s9979_s7 + $0x18] sm:$0xff]  ;;  %v1563_v19 = vrot.slane %v1562_v61, 1  ;;  %v5715_v16 = vld [vmem:[%s9979_s7 + $0x10] sm:$0xff]  ;;  %v2823_v51 = vmax.f32 %v2821_v50, %v2822_v43  ;;  %v10353_v63 = vmax.f32 %v7421_v53, %v7432_v34  ;;  %v1599_v26 = vrot.slane %v1598_v7, 1 }
 0x291   :  { %vm1014_vm1 = vcmp.gt.f32.partialorder %v10347_v23, 0.0  ;;  %vm3115_vm2 = vcmp.gt.f32.partialorder %v5714_v60, 0.0  ;;  %763 = vbcast.lane.b32.xlu1 %v10203_v13, 280  ;;  %vm3114_vm3 = vcmp.gt.f32.partialorder %v5715_v16, 0.0  ;;  %v10349_v1 = vld [vmem:[#allocation81_spill] sm:$0xff]  ;;  %v10350_v32 = vld [vmem:[#allocation80_spill] sm:$0xff] }
 0x292   :  { %v10351_v30 = vmax.f32 %v10349_v1, %v10350_v32  ;;  %2254 = vbcast.lane.b32.xlu0 %v10305_v44, 296  ;;  %v10352_v60 = vmov 0   ;;  %v7905_v16 = vmax.f32 %v10353_v63, %v1378_v5  ;;  %v1606_v32 = vrot.slane %v1605_v15, 2  ;;  %v10356_v43 = vld [vmem:[#allocation75_spill] sm:$0xff]  ;;  %v10357_v11 = vld [vmem:[#allocation74_spill] sm:$0xff]  ;;  %v7919_v31 = vpop.permute.xlu0 %2014 }
 0x293   :  { %v7896_v38 = vsel %vm3113_vm14, 1, %v10352_v60  ;;  %v7900_v62 = vsel %vm3112_vm0, 1, %v10352_v60  ;;  %v7911_v50 = vsel %vm3115_vm2, 1, %v10352_v60  ;;  %v7913_v1 = vmax.f32 %v1499_v55, %v1500_v42  ;;  %10359 = vst [vmem:[#allocation134_spill] sm:$0xff] %v7919_v31  ;;  %v10362_v5 = vld [vmem:[#allocation78_spill] sm:$0xff]  ;;  %v10373_v31 = vld [vmem:[#allocation25_spill] sm:$0xff] }
 0x294   :  { %v7891_v22 = vmax.f32 %v10351_v30, %v1350_v14  ;;  %v1398_v30 = vsel %vm1014_vm1, %v7865_v8, -1e+30  ;;  %10354 = vst [vmem:[#allocation132_spill] sm:$0xff] %v7911_v50  ;;  %vm1021_vm4 = vcmp.gt.f32.partialorder %v10356_v43, 0.0  ;;  %vm1020_vm5 = vcmp.gt.f32.partialorder %v10357_v11, 0.0  ;;  %v7917_v14 = vpop.permute.xlu1 %2066 }
 0x295   :  { %10355 = vst [vmem:[#allocation133_spill] sm:$0xff] %v7913_v1  ;;  %10358 = vst [vmem:[#allocation37_spill] sm:$0xff] %v7917_v14  ;;  %v7922_v53 = vsel %vm3114_vm3, 1, %v10352_v60  ;;  %v7924_v34 = vmax.f32 %v1562_v61, %v1563_v19  ;;  %vm1042_vm6 = vcmp.gt.f32.partialorder %v10362_v5, 0.0  ;;  %v2885_v23 = vrot.slane %v2884_v40, 4  ;;  %930 = vbcast.lane.b32.xlu1 %v7383_v39, 272 }
 0x296   :  { %10360 = vst [vmem:[#allocation36_spill] sm:$0xff] %v7922_v53  ;;  %v10363_v55 = vmax.f32 %v7449_v47, %v7461_v59  ;;  %v2824_v63 = vrot.slane %v2823_v51, 2  ;;  %vm963_vm7 = vcmp.gt.f32.partialorder %v7599_v17, 0.0  ;;  %896 = vbcast.lane.b32.xlu0 %v10214_v54, 280  ;;  %v10365_v60 = vld [vmem:[#allocation24_spill] sm:$0xff]  ;;  %v1607_v19 = vmax.f32 %v1605_v15, %v1606_v32  ;;  %v7939_v53 = vld [vmem:[#allocation2 + $0x8] sm:$0xff]  ;;  %v7961_v43 = vpop.permute.xlu0 %2090 }
 0x297   :  { %10361 = vst [vmem:[#allocation129_spill] sm:$0xff] %v7924_v34  ;;  %v7937_v61 = vrot.slane %v7701_v33, %v10365_v60  ;;  %v7944_v50 = vsel %vm1021_vm4, %v7939_v53, -1e+30  ;;  %v7946_v47 = vld [vmem:[#allocation2] sm:$0xff]  ;;  %v1426_v15 = vsel %vm1042_vm6, %v7865_v8, -1e+30  ;;  %v7968_v14 = vmax.f32 %v1598_v7, %v1599_v26 }
 0x298   :  { %v7931_v42 = vmax.f32 %v10363_v55, %v1398_v30  ;;  %10367 = vst [vmem:[#allocation137_spill] sm:$0xff] %v7944_v50  ;;  %v7951_v59 = vsel %vm1020_vm5, %v7946_v47, -1e+30  ;;  %v10369_v30 = vld [vmem:[#allocation103_spill] sm:$0xff]  ;;  %v7959_v32 = vpop.permute.xlu1 %2094  ;;  %10372 = vst [vmem:[#allocation63_spill] sm:$0xff] %v7961_v43  ;;  %v2825_v1 = vmax.f32 %v2823_v51, %v2824_v63  ;;  %v1608_v7 = vrot.slane %v1607_v19, 1 }
 0x299   :  { %10366 = vst [vmem:[#allocation136_spill] sm:$0xff] %v7937_v61  ;;  %10368 = vst [vmem:[#allocation138_spill] sm:$0xff] %v7951_v59  ;;  %vm1049_vm8 = vcmp.gt.f32.partialorder %v10369_v30, 0.0  ;;  %v10370_v61 = vld [vmem:[#allocation31_spill] sm:$0xff]  ;;  %v2886_v30 = vmax.f32 %v2884_v40, %v2885_v23  ;;  %v1347_v55 = vsel %vm963_vm7, %v7748_v49, -1e+30 }
 0x29a   :  { %10364 = vst [vmem:[#allocation135_spill] sm:$0xff] %v7931_v42  ;;  %vm1048_vm9 = vcmp.gt.f32.partialorder %v10370_v61, 0.0  ;;  %10371 = vst [vmem:[#allocation41_spill] sm:$0xff] %v7959_v32  ;;  %v7965_v42 = vrot.slane %v7701_v33, %v10373_v31  ;;  %2102 = vbcast.lane.b32.xlu1 %v6616_v3, 312  ;;  %v7977_v43 = vsel %vm1049_vm8, %v7939_v53, -1e+30  ;;  %v7997_v11 = vpop.permute.xlu0 %2162 }
 0x29b   :  { %10375 = vst [vmem:[#allocation43_spill] sm:$0xff] %v7968_v14  ;;  %10376 = vst [vmem:[#allocation105_spill] sm:$0xff] %v7977_v43  ;;  %v10377_v32 = vld [vmem:[#allocation82_spill] sm:$0xff]  ;;  %2022 = vbcast.lane.b32.xlu0 %v10189_v2, 312  ;;  %v7984_v40 = vsel %vm1048_vm9, %v7946_v47, -1e+30 }
 0x29c   :  { %10374 = vst [vmem:[#allocation109_spill] sm:$0xff] %v7965_v42  ;;  %vm2308_vm10 = vcmp.gt.f32.partialorder %v10377_v32, 0.0  ;;  %10378 = vst [vmem:[#allocation90_spill] sm:$0xff] %v7984_v40  ;;  %v10379_v17 = vld [vmem:[#allocation91_spill] sm:$0xff]  ;;  %v10380_v26 = vld [vmem:[#allocation84_spill] sm:$0xff]  ;;  %vm991_vm11 = vcmp.gt.f32.partialorder %v7647_v9, 0.0  ;;  %v1504_v32 = vmax.f32 %v7613_v18, %v1347_v55  ;;  %v7995_v2 = vpop.permute.xlu1 %2178 }
 0x29d   :  { %v10381_v3 = vmax.f32 %v10379_v17, %v10380_v26  ;;  %v10383_v51 = vld [vmem:[#allocation83_spill] sm:$0xff]  ;;  %10385 = vst [vmem:[#allocation50_spill] sm:$0xff] %v7995_v2  ;;  %10386 = vst [vmem:[#allocation68_spill] sm:$0xff] %v7997_v11  ;;  %v10387_v61 = vld [vmem:[#allocation26_spill] sm:$0xff]  ;;  %v8007_v9 = vsel %vm2308_vm10, %v7771_v4, -1e+30  ;;  %v8017_v17 = vmax.f32 %v1607_v19, %v1608_v7 }
 0x29e   :  { %vm2302_vm12 = vcmp.gt.f32.partialorder %v10383_v51, 0.0  ;;  %v10384_v63 = vld [vmem:[#allocation87_spill] sm:$0xff]  ;;  %v8001_v5 = vrot.slane %v7701_v33, %v10387_v61  ;;  %10389 = vst [vmem:[#allocation39_spill] sm:$0xff] %v8007_v9  ;;  %v2887_v26 = vrot.slane %v2886_v30, 2  ;;  %2214 = vbcast.lane.b32.xlu1 %v10200_v35, 312  ;;  %v2826_v18 = vrot.slane %v2825_v1, 1  ;;  %v8035_v50 = vpop.permute.xlu0 %2202 }
 0x29f   :  { %v7989_v23 = vmax.f32 %v10381_v3, %v1426_v15  ;;  %vm2309_vm14 = vcmp.gt.f32.partialorder %v10384_v63, 0.0  ;;  %v1375_v55 = vsel %vm991_vm11, %v7748_v49, -1e+30  ;;  %vm1011_vm0 = vcmp.gt.f32.partialorder %v7680_v41, 0.0  ;;  %2130 = vbcast.lane.b32.xlu0 %v10203_v13, 304  ;;  %10391 = vst [vmem:[#allocation57_spill] sm:$0xff] %v8017_v17 }
 0x2a0   :  { %10388 = vst [vmem:[#allocation115_spill] sm:$0xff] %v8001_v5  ;;  %v8015_v3 = vrot.slane %v7811_v58, %v10365_v60  ;;  %v8019_v15 = vld [vmem:[#allocation2 + $0x30] sm:$0xff]  ;;  %v8027_v35 = vsel %vm2309_vm14, %v7778_v45, -1e+30  ;;  %v10393_v34 = vld [vmem:[#allocation89_spill] sm:$0xff]  ;;  %v1505_v19 = vrot.slane %v1504_v32, 4  ;;  %v8033_v7 = vpop.permute.xlu1 %2206  ;;  %v2888_v51 = vmax.f32 %v2886_v30, %v2887_v26 }
 0x2a1   :  { %10382 = vst [vmem:[#allocation45_spill] sm:$0xff] %v7989_v23  ;;  %v2686_v14 = vsel %vm2302_vm12, %v8019_v15, -1e+30  ;;  %10392 = vst [vmem:[#allocation77_spill] sm:$0xff] %v8027_v35  ;;  %vm2336_vm1 = vcmp.gt.f32.partialorder %v10393_v34, 0.0  ;;  %v10394_v43 = vld [vmem:[#allocation88_spill] sm:$0xff]  ;;  %v1567_v59 = vmax.f32 %v7623_v24, %v1375_v55  ;;  %v2827_v34 = vmax.f32 %v2825_v1, %v2826_v18 }
 0x2a2   :  { %10390 = vst [vmem:[#allocation111_spill] sm:$0xff] %v8015_v3  ;;  %vm2330_vm2 = vcmp.gt.f32.partialorder %v10394_v43, 0.0  ;;  %v10395_v40 = vld [vmem:[#allocation125_spill] sm:$0xff]  ;;  %v10396_v60 = vld [vmem:[#allocation64_spill] sm:$0xff]  ;;  %vm9965_vm5 = vcmask 1043459   ;;  %10397 = vst [vmem:[#allocation76_spill] sm:$0xff] %v8033_v7  ;;  %v8054_v24 = vrot.slane %v7811_v58, %v10373_v31  ;;  %v8074_v43 = vpop.permute.xlu0 %478 }
 0x2a3   :  { %vm2346_vm3 = vcmp.gt.f32.partialorder %v10395_v40, 0.0  ;;  %vm2337_vm4 = vcmp.gt.f32.partialorder %v10396_v60, 0.0  ;;  %10398 = vst [vmem:[#allocation48_spill] sm:$0xff] %v8035_v50  ;;  %v1395_v63 = vsel %vm1011_vm0, %v7748_v49, -1e+30  ;;  %vm1039_vm6 = vcmp.gt.f32.partialorder %v7731_v52, 0.0 }
 0x2a4   :  { %2266 = vbcast.lane.b32.xlu1 %v7383_v39, 288  ;;  %v10399_v3 = vld [vmem:[#allocation53_spill] sm:$0xff]  ;;  %v8049_v7 = vsel %vm2336_vm1, %v7771_v4, -1e+30  ;;  %2242 = vbcast.lane.b32.xlu0 %v10214_v54, 304  ;;  %10404 = vst [vmem:[#allocation51_spill] sm:$0xff] %v8054_v24  ;;  %v1612_v31 = vmax.f32 %v7629_v37, %v1395_v63 }
 0x2a5   :  { %v10400_v5 = vld [vmem:[#allocation93_spill] sm:$0xff]  ;;  %10403 = vst [vmem:[#allocation44_spill] sm:$0xff] %v8049_v7  ;;  %v2714_v52 = vsel %vm2330_vm2, %v8019_v15, -1e+30  ;;  %v2730_v1 = vsel %vm2346_vm3, %v8019_v15, -1e+30 }
 0x2a6   :  { %v10401_v42 = vmax.f32 %v10399_v3, %v10400_v5  ;;  %v1423_v30 = vsel %vm1039_vm6, %v7748_v49, -1e+30  ;;  %vm1035_vm7 = vcmp.gt.f32.partialorder %v7733_v25, 0.0  ;;  %v8072_v5 = vpop.permute.xlu1 %611  ;;  %v3444_v26 = vld [vmem:[#allocation7] sm:$0xff]  ;;  %v3445_v18 = vld [vmem:[#allocation7 + $0x8] sm:$0xff]  ;;  %v2889_v40 = vrot.slane %v2888_v51, 1 }
 0x2a7   :  { %v10406_v55 = vld [vmem:[#allocation96_spill] sm:$0xff]  ;;  %v1568_v3 = vrot.slane %v1567_v59, 4  ;;  %v5458_v60 = vpack.c.bf16 %v3445_v18, %v3444_v26  ;;  %v10409_v63 = vld [vmem:[#allocation94_spill] sm:$0xff]  ;;  %v10413_v24 = vld [vmem:[#allocation73_spill] sm:$0xff]  ;;  %v1675_v26 = vmax.f32 %v7656_v48, %v1423_v30  ;;  %vm2299_vm9 = vcmp.gt.f32.partialorder %v7800_v28, 0.0 }
 0x2a8   :  { %v8046_v11 = vmax.f32 %v10401_v42, %v2686_v14  ;;  %v8067_v14 = vsel %vm2337_vm4, %v7778_v45, -1e+30  ;;  %v1506_v42 = vmax.f32 %v1504_v32, %v1505_v19  ;;  %vm2350_vm8 = vcmp.gt.f32.partialorder %v10406_v55, 0.0  ;;  %782 = vbcast.lane.b32.xlu1 %v10298_v27, 280  ;;  %v10407_v32 = vld [vmem:[#allocation85_spill] sm:$0xff]  ;;  %v10410_v41 = vld [vmem:[#allocation92_spill] sm:$0xff] }
 0x2a9   :  { %10405 = vst [vmem:[#allocation40_spill] sm:$0xff] %v8067_v14  ;;  %v10408_v19 = vmax.f32 %v10407_v32, -1e+30  ;;  %v10411_v35 = vmax.f32 %v10409_v63, %v10410_v41  ;;  %v10414_v50 = vld [vmem:[#allocation119_spill] sm:$0xff]  ;;  %2270 = vbcast.lane.b32.xlu0 %v7383_v39, 296  ;;  %vm2327_vm10 = vcmp.gt.f32.partialorder %v7848_v57, 0.0  ;;  %5459 = vmatprep.subr.bf16.mxu1 %v5458_v60  ;;  %v1569_v18 = vmax.f32 %v1567_v59, %v1568_v3 }
 0x2aa   :  { %10402 = vst [vmem:[#allocation71_spill] sm:$0xff] %v8046_v11  ;;  %v10415_v11 = vmax.f32 %v10413_v24, %v10414_v50  ;;  %v10417_v55 = vld [vmem:[#allocation27_spill] sm:$0xff]  ;;  %v1613_v24 = vrot.slane %v1612_v31, 4  ;;  %v8104_v41 = vpop.permute.xlu1 %740  ;;  %5461 = vmatpush3.bf16.msra.mxu1 %v5458_v60  ;;  %v3446_v48 = vld [vmem:[#allocation7 + $0x10] sm:$0xff]  ;;  %v3447_v25 = vld [vmem:[#allocation7 + $0x18] sm:$0xff]  ;;  %v8112_v32 = vrot.slane %v7811_v58, %v10387_v61 }
 0x2ab   :  { %v3083_v37 = vmax.f32 %v10408_v19, %v2827_v34  ;;  %v8083_v9 = vmax.f32 %v10411_v35, %v2714_v52  ;;  %v8093_v23 = vrot.slane %v7701_v33, %v10417_v55  ;;  %v1419_v34 = vsel %vm1035_vm7, %v7748_v49, -1e+30  ;;  %v8106_v52 = vpop.permute.xlu0 %706  ;;  %v10419_v30 = vld [vmem:[#allocation56_spill] sm:$0xff]  ;;  %v8115_v63 = vld [vmem:[#allocation2 + $0x38] sm:$0xff]  ;;  %v10425_v50 = vld [vmem:[#allocation95_spill] sm:$0xff] }
 0x2ac   :  { %v8088_v2 = vmax.f32 %v10415_v11, %v2730_v1  ;;  %v2734_v11 = vsel %vm2350_vm8, %v8019_v15, -1e+30  ;;  %v1507_v35 = vrot.slane %v1506_v42, 2  ;;  %v2890_v1 = vmax.f32 %v2888_v51, %v2889_v40  ;;  %2118 = vbcast.lane.b32.xlu1 %v6712_v29, 312  ;;  %10420 = vst [vmem:[#allocation108_spill] sm:$0xff] %v8112_v32  ;;  %v10421_v29 = vld [vmem:[#allocation127_spill] sm:$0xff] }
 0x2ad   :  { %10412 = vst [vmem:[#allocation52_spill] sm:$0xff] %v8083_v9  ;;  %10418 = vst [vmem:[#allocation59_spill] sm:$0xff] %v8093_v23  ;;  %vm2356_vm11 = vcmp.gt.f32.partialorder %v10419_v30, 0.0  ;;  %v1666_v19 = vmax.f32 %v7663_v12, %v1419_v34  ;;  %v2683_v60 = vsel %vm2299_vm9, %v8115_v63, -1e+30  ;;  %915 = vbcast.lane.b32.xlu0 %v10305_v44, 280  ;;  %v5462_v59 = vpack.c.bf16 %v3447_v25, %v3446_v48 }
 0x2ae   :  { %10416 = vst [vmem:[#allocation54_spill] sm:$0xff] %v8088_v2  ;;  %v2711_v51 = vsel %vm2327_vm10, %v8115_v63, -1e+30  ;;  %v10422_v40 = vld [vmem:[#allocation98_spill] sm:$0xff]  ;;  %vm2384_vm12 = vcmp.gt.f32.partialorder %v10425_v50, 0.0  ;;  %v1676_v12 = vrot.slane %v1675_v26, 4  ;;  %v8132_v34 = vsel %vm9965_vm5, %v3083_v37, %v7826_v6  ;;  %v8136_v14 = vpop.permute.xlu1 %774 }
 0x2af   :  { %v10423_v3 = vmax.f32 %v10421_v29, %v10422_v40  ;;  %v10426_v28 = vld [vmem:[#allocation97_spill] sm:$0xff]  ;;  %v1508_v32 = vmax.f32 %v1506_v42, %v1507_v35  ;;  %v10427_v57 = vld [vmem:[#allocation102_spill] sm:$0xff]  ;;  %v1614_v23 = vmax.f32 %v1612_v31, %v1613_v24  ;;  %10428 = vst [vmem:[#allocation30_spill] sm:$0xff] %v8136_v14  ;;  %v8138_v48 = vpop.permute.xlu0 %770  ;;  %5463 = vmatprep.subr.bf16.mxu1 %v5462_v59  ;;  %v3449_v25 = vld [vmem:[#allocation7 + $0x28] sm:$0xff]  ;;  %v8143_v29 = vsel %vm2356_vm11, %v7771_v4, -1e+30 }
 0x2b0   :  { %vm2357_vm14 = vcmp.gt.f32.partialorder %v10426_v28, 0.0  ;;  %vm2385_vm0 = vcmp.gt.f32.partialorder %v10427_v57, 0.0  ;;  %10429 = vst [vmem:[#allocation79_spill] sm:$0xff] %v8138_v48  ;;  %v2830_v6 = vmax.f32 %v7718_v36, %v2683_v60  ;;  %v2893_v37 = vmax.f32 %v7769_v56, %v2711_v51  ;;  %2230 = vbcast.lane.b32.xlu1 %v10296_v46, 312  ;;  %v10430_v42 = vld [vmem:[#allocation28_spill] sm:$0xff]  ;;  %5465 = vmatpush3.bf16.msra.mxu1 %v5462_v59  ;;  %v10432_v35 = vld [vmem:[#allocation86_spill] sm:$0xff] }
 0x2b1   :  { %v8127_v61 = vmax.f32 %v10423_v3, %v2734_v11  ;;  %v3448_v11 = vld [vmem:[#allocation7 + $0x20] sm:$0xff]  ;;  %v8150_v31 = vrot.slane %v7701_v33, %v10430_v42  ;;  %v10433_v24 = vmax.f32 %v10432_v35, -1e+30  ;;  %v1570_v3 = vrot.slane %v1569_v18, 2  ;;  %2146 = vbcast.lane.b32.xlu0 %v10298_v27, 304  ;;  %v10437_v51 = vld [vmem:[#allocation107_spill] sm:$0xff] }
 0x2b2   :  { %v1667_v7 = vrot.slane %v1666_v19, 4  ;;  %v5466_v30 = vpack.c.bf16 %v3449_v25, %v3448_v11  ;;  %v8158_v36 = vsel %vm2384_vm12, %v7771_v4, -1e+30  ;;  %v8163_v46 = vsel %vm2357_vm14, %v7778_v45, -1e+30  ;;  %v10438_v59 = vld [vmem:[#allocation118_spill] sm:$0xff]  ;;  %v8172_v50 = vpop.permute.xlu1 %873 }
 0x2b3   :  { %10424 = vst [vmem:[#allocation66_spill] sm:$0xff] %v8127_v61  ;;  %10431 = vst [vmem:[#allocation58_spill] sm:$0xff] %v8150_v31  ;;  %v3090_v40 = vmax.f32 %v10433_v24, %v2890_v1  ;;  %v8168_v56 = vsel %vm2385_vm0, %v7778_v45, -1e+30  ;;  %v1677_v1 = vmax.f32 %v1675_v26, %v1676_v12  ;;  %v1509_v60 = vrot.slane %v1508_v32, 1  ;;  %v8174_v25 = vpop.permute.xlu0 %839  ;;  %v3450_v28 = vld [vmem:[#allocation7 + $0x30] sm:$0xff] }
 0x2b4   :  { %10434 = vst [vmem:[#allocation72_spill] sm:$0xff] %v8158_v36  ;;  %10435 = vst [vmem:[#allocation61_spill] sm:$0xff] %v8163_v46  ;;  %vm998_vm1 = vcmp.gt.f32.partialorder %v10437_v51, 0.0  ;;  %vm1018_vm2 = vcmp.gt.f32.partialorder %v10438_v59, 0.0  ;;  %v1615_v11 = vrot.slane %v1614_v23, 2  ;;  %5467 = vmatprep.subr.bf16.mxu1 %v5466_v30  ;;  %v3451_v35 = vld [vmem:[#allocation7 + $0x38] sm:$0xff]  ;;  %v1571_v12 = vmax.f32 %v1569_v18, %v1570_v3 }
 0x2b5   :  { %10436 = vst [vmem:[#allocation62_spill] sm:$0xff] %v8168_v56  ;;  %10439 = vst [vmem:[#allocation69_spill] sm:$0xff] %v8172_v50  ;;  %v10440_v24 = vld [vmem:[#allocation117_spill] sm:$0xff]  ;;  %v10441_v31 = vld [vmem:[#allocation34_spill] sm:$0xff]  ;;  %v2831_v57 = vrot.slane %v2830_v6, 4  ;;  %v2894_v2 = vrot.slane %v2893_v37, 4  ;;  %5469 = vmatpush3.bf16.msra.mxu1 %v5466_v30  ;;  %v8181_v26 = vsel %vm9966_vm15, %v3090_v40, %v7853_v10  ;;  %v1668_v50 = vmax.f32 %v1666_v19, %v1667_v7 }
 0x2b6   :  { %vm1025_vm3 = vcmp.gt.f32.partialorder %v10440_v24, 0.0  ;;  %vm1024_vm4 = vcmp.gt.f32.partialorder %v10441_v31, 0.0  ;;  %934 = vbcast.lane.b32.xlu1 %v7383_v39, 280  ;;  %2258 = vbcast.lane.b32.xlu0 %v10305_v44, 304  ;;  %v5470_v61 = vpack.c.bf16 %v3451_v35, %v3450_v28  ;;  %v1382_v9 = vsel %vm998_vm1, %v7865_v8, -1e+30  ;;  %v8204_v40 = vpop.permute.xlu1 %907 }
 0x2b7   :  { %v1402_v30 = vsel %vm1018_vm2, %v7865_v8, -1e+30  ;;  %v1678_v14 = vrot.slane %v1677_v1, 2  ;;  %v1616_v18 = vmax.f32 %v1614_v23, %v1615_v11  ;;  %v8197_v7 = vsel %vm1025_vm3, %v7939_v53, -1e+30  ;;  %v8206_v3 = vpop.permute.xlu0 %903  ;;  %v3452_v51 = vld [vmem:[#allocation7 + $0x40] sm:$0xff] }
 0x2b8   :  { %10442 = vst [vmem:[#allocation60_spill] sm:$0xff] %v8197_v7  ;;  %v8202_v19 = vsel %vm1024_vm4, %v7946_v47, -1e+30  ;;  %5471 = vmatprep.subr.bf16.mxu1 %v5470_v61  ;;  %v3453_v59 = vld [vmem:[#allocation7 + $0x48] sm:$0xff]  ;;  %v8209_v23 = vmax.f32 %v1508_v32, %v1509_v60  ;;  %v2832_v11 = vmax.f32 %v2830_v6, %v2831_v57  ;;  %v2895_v35 = vmax.f32 %v2893_v37, %v2894_v2  ;;  %v10446_v56 = vld [vmem:[#allocation33_spill] sm:$0xff]  ;;  %v10449_v32 = vld [vmem:[#allocation104_spill] sm:$0xff] }
 0x2b9   :  { %10443 = vst [vmem:[#allocation47_spill] sm:$0xff] %v8202_v19  ;;  %5473 = vmatpush3.bf16.msra.mxu1 %v5470_v61  ;;  %v1572_v24 = vrot.slane %v1571_v12, 1  ;;  %v1669_v31 = vrot.slane %v1668_v50, 2  ;;  %v8215_v10 = vrot.slane %v7811_v58, %v10417_v55  ;;  %v5474_v48 = vpack.c.bf16 %v3453_v59, %v3452_v51  ;;  %v10447_v36 = vld [vmem:[#allocation99_spill] sm:$0xff]  ;;  %v10450_v6 = vld [vmem:[#allocation100_spill] sm:$0xff] }
 0x2ba   :  { %10444 = vst [vmem:[#allocation65_spill] sm:$0xff] %v8209_v23  ;;  %2246 = vbcast.lane.b32.xlu1 %v10214_v54, 312  ;;  %2134 = vbcast.lane.b32.xlu0 %v10203_v13, 312  ;;  %v10448_v46 = vmax.f32 %v10446_v56, %v10447_v36  ;;  %v10451_v2 = vmax.f32 %v10449_v32, %v10450_v6  ;;  %v1617_v13 = vrot.slane %v1616_v18, 1  ;;  %v10452_v60 = vld [vmem:[#allocation120_spill] sm:$0xff]  ;;  %vm1053_vm7 = vcmp.gt.f32.partialorder %v7802_v21, 0.0  ;;  %v8231_v55 = vpop.permute.xlu1 %1890 }
 0x2bb   :  { %10445 = vst [vmem:[#allocation67_spill] sm:$0xff] %v8215_v10  ;;  %v1679_v61 = vmax.f32 %v1677_v1, %v1678_v14  ;;  %vm1046_vm6 = vcmp.gt.f32.partialorder %v10452_v60, 0.0  ;;  %v8233_v57 = vpop.permute.xlu0 %1862  ;;  %5475 = vmatprep.subr.bf16.mxu1 %v5474_v48  ;;  %v3455_v56 = vld [vmem:[#allocation7 + $0x58] sm:$0xff]  ;;  %v2833_v51 = vrot.slane %v2832_v11, 2  ;;  %v2896_v14 = vrot.slane %v2895_v35, 2  ;;  %v3457_v60 = vld [vmem:[#allocation7 + $0x68] sm:$0xff] }
 0x2bc   :  { %v8220_v28 = vmax.f32 %v10448_v46, %v1382_v9  ;;  %v8225_v37 = vmax.f32 %v10451_v2, %v1402_v30  ;;  %v10453_v9 = vld [vmem:[#allocation29_spill] sm:$0xff]  ;;  %v3454_v46 = vld [vmem:[#allocation7 + $0x50] sm:$0xff]  ;;  %vm995_vm8 = vcmp.gt.f32.partialorder %v8072_v5, 0.0  ;;  %v8242_v1 = vmax.f32 %v1571_v12, %v1572_v24  ;;  %v10456_v2 = vld [vmem:[#allocation46_spill] sm:$0xff] }
 0x2bd   :  { %v8237_v36 = vrot.slane %v7701_v33, %v10453_v9  ;;  %5477 = vmatpush3.bf16.msra.mxu1 %v5474_v48  ;;  %v1670_v59 = vmax.f32 %v1668_v50, %v1669_v31  ;;  %vm967_vm9 = vcmp.gt.f32.partialorder %v8074_v43, 0.0  ;;  %v5478_v32 = vpack.c.bf16 %v3455_v56, %v3454_v46  ;;  %v3456_v31 = vld [vmem:[#allocation7 + $0x60] sm:$0xff]  ;;  %v10462_v43 = vld [vmem:[#allocation113_spill] sm:$0xff] }
 0x2be   :  { %2150 = vbcast.lane.b32.xlu1 %v10298_v27, 312  ;;  %10455 = vst [vmem:[#allocation81_spill] sm:$0xff] %v8242_v1  ;;  %2274 = vbcast.lane.b32.xlu0 %v7383_v39, 304  ;;  %v1680_v6 = vrot.slane %v1679_v61, 1  ;;  %vm1052_vm10 = vcmp.gt.f32.partialorder %v10456_v2, 0.0  ;;  %v8255_v5 = vmax.f32 %v1616_v18, %v1617_v13  ;;  %vm2306_vm11 = vcmp.gt.f32.partialorder %v7850_v20, 0.0  ;;  %v8259_v50 = vpop.permute.xlu1 %2002 }
 0x2bf   :  { %10454 = vst [vmem:[#allocation70_spill] sm:$0xff] %v8237_v36  ;;  %v1430_v30 = vsel %vm1046_vm6, %v7865_v8, -1e+30  ;;  %v8253_v27 = vsel %vm1053_vm7, %v7939_v53, -1e+30  ;;  %v8261_v12 = vpop.permute.xlu0 %1974  ;;  %v8265_v24 = vrot.slane %v7811_v58, %v10430_v42  ;;  %5479 = vmatprep.subr.bf16.mxu1 %v5478_v32  ;;  %v2834_v21 = vmax.f32 %v2832_v11, %v2833_v51  ;;  %v10463_v51 = vld [vmem:[#allocation112_spill] sm:$0xff] }
 0x2c0   :  { %10457 = vst [vmem:[#allocation80_spill] sm:$0xff] %v8253_v27  ;;  %10458 = vst [vmem:[#allocation75_spill] sm:$0xff] %v8255_v5  ;;  %v1379_v48 = vsel %vm995_vm8, %v7748_v49, -1e+30  ;;  %v2897_v46 = vmax.f32 %v2895_v35, %v2896_v14  ;;  %v1351_v18 = vsel %vm967_vm9, %v7748_v49, -1e+30  ;;  %v5482_v11 = vpack.c.bf16 %v3457_v60, %v3456_v31 }
 0x2c1   :  { %10459 = vst [vmem:[#allocation74_spill] sm:$0xff] %v8265_v24  ;;  %vm1015_vm12 = vcmp.gt.f32.partialorder %v8106_v52, 0.0  ;;  %5481 = vmatpush3.bf16.msra.mxu1 %v5478_v32  ;;  %v1671_v56 = vrot.slane %v1670_v59, 1  ;;  %v8276_v42 = vsel %vm1052_vm10, %v7946_v47, -1e+30  ;;  %v8279_v35 = vmax.f32 %v1679_v61, %v1680_v6  ;;  %v3459_v60 = vld [vmem:[#allocation7 + $0x78] sm:$0xff] }
 0x2c2   :  { %2278 = vbcast.lane.b32.xlu1 %v7383_v39, 312  ;;  %10460 = vst [vmem:[#allocation78_spill] sm:$0xff] %v8276_v42  ;;  %2262 = vbcast.lane.b32.xlu0 %v10305_v44, 312  ;;  %v10464_v14 = vmax.f32 %v10462_v43, %v10463_v51  ;;  %v2690_v39 = vsel %vm2306_vm11, %v8019_v15, -1e+30  ;;  %v1576_v32 = vmax.f32 %v7905_v16, %v1379_v48  ;;  %v8295_v6 = vpop.permute.xlu1 %2054  ;;  %v2835_v20 = vrot.slane %v2834_v21, 1 }
 0x2c3   :  { %10461 = vst [vmem:[#allocation24_spill] sm:$0xff] %v8279_v35  ;;  %v1513_v44 = vmax.f32 %v7891_v22, %v1351_v18  ;;  %v1399_v61 = vsel %vm1015_vm12, %v7748_v49, -1e+30  ;;  %v8297_v31 = vpop.permute.xlu0 %2038  ;;  %5483 = vmatprep.subr.bf16.mxu1 %v5482_v11  ;;  %v2898_v43 = vrot.slane %v2897_v46, 1  ;;  %vm1043_vm14 = vcmp.gt.f32.partialorder %v8174_v25, 0.0  ;;  %v10465_v16 = vld [vmem:[#allocation32_spill] sm:$0xff] }
 0x2c4   :  { %v8284_v52 = vmax.f32 %v10464_v14, %v1430_v30  ;;  %v3458_v30 = vld [vmem:[#allocation7 + $0x70] sm:$0xff]  ;;  %v8303_v48 = vrot.slane %v7701_v33, %v10465_v16  ;;  %v8305_v22 = vmax.f32 %v1670_v59, %v1671_v56  ;;  %v10468_v18 = vld [vmem:[#allocation42_spill] sm:$0xff]  ;;  %v10469_v51 = vld [vmem:[#allocation121_spill] sm:$0xff]  ;;  %vm2334_vm0 = vcmp.gt.f32.partialorder %v7878_v0, 0.0 }
 0x2c5   :  { %5485 = vmatpush3.bf16.msra.mxu1 %v5482_v11  ;;  %v10470_v14 = vmax.f32 %v10468_v18, %v10469_v51  ;;  %v5486_v13 = vpack.c.bf16 %v3459_v60, %v3458_v30  ;;  %vm9964_vm1 = vcmask 1044484   ;;  %v10471_v54 = vld [vmem:[#allocation37_spill] sm:$0xff]  ;;  %v1577_v5 = vrot.slane %v1576_v32, 4  ;;  %v10473_v59 = vld [vmem:[#allocation131_spill] sm:$0xff]  ;;  %v10475_v51 = vld [vmem:[#allocation132_spill] sm:$0xff] }
 0x2c6   :  { %3124 = vperm.xlu1 %5677, %v7896_v38   ;;  %10466 = vst [vmem:[#allocation103_spill] sm:$0xff] %v8303_v48  ;;  %10467 = vst [vmem:[#allocation31_spill] sm:$0xff] %v8305_v22  ;;  %3121 = vperm.xlu0 %5676, %v7900_v62   ;;  %vm2354_vm2 = vcmp.gt.f32.partialorder %v10471_v54, 0.0  ;;  %v10472_v48 = vld [vmem:[#allocation135_spill] sm:$0xff]  ;;  %vm2340_vm3 = vcmp.gt.f32.partialorder %v10473_v59, 0.0  ;;  %v1514_v56 = vrot.slane %v1513_v44, 4  ;;  %v8322_v18 = vpop.permute.xlu1 %2106  ;;  %v2836_v30 = vmax.f32 %v2834_v21, %v2835_v20 }
 0x2c7   :  { %v8310_v2 = vmax.f32 %v10470_v14, %v2690_v39  ;;  %v1621_v11 = vmax.f32 %v10472_v48, %v1399_v61  ;;  %v1427_v39 = vsel %vm1043_vm14, %v7748_v49, -1e+30  ;;  %vm2303_vm4 = vcmp.gt.f32.partialorder %v8233_v57, 0.0  ;;  %v8324_v62 = vpop.permute.xlu0 %2082  ;;  %5487 = vmatprep.subr.bf16.mxu1 %v5486_v13  ;;  %v10474_v48 = vld [vmem:[#allocation134_spill] sm:$0xff]  ;;  %v10476_v38 = vld [vmem:[#allocation41_spill] sm:$0xff]  ;;  %v10477_v35 = vld [vmem:[#allocation63_spill] sm:$0xff] }
 0x2c8   :  { %v2899_v60 = vmax.f32 %v2897_v46, %v2898_v43  ;;  %v2718_v61 = vsel %vm2334_vm0, %v8019_v15, -1e+30  ;;  %vm2341_vm6 = vcmp.gt.f32.partialorder %v10474_v48, 0.0  ;;  %v2738_v14 = vsel %vm2354_vm2, %v8019_v15, -1e+30  ;;  %v10478_v21 = vld [vmem:[#allocation36_spill] sm:$0xff] }
 0x2c9   :  { %5489 = vmatpush3.bf16.msra.mxu1 %v5486_v13  ;;  %vm2361_vm7 = vcmp.gt.f32.partialorder %v10476_v38, 0.0  ;;  %vm2360_vm8 = vcmp.gt.f32.partialorder %v10477_v35, 0.0  ;;  %v1578_v46 = vmax.f32 %v1576_v32, %v1577_v5  ;;  %v1622_v0 = vrot.slane %v1621_v11, 4  ;;  %v10479_v20 = vld [vmem:[#allocation45_spill] sm:$0xff]  ;;  %v10481_v54 = vld [vmem:[#allocation122_spill] sm:$0xff]  ;;  %v10485_v57 = vld [vmem:[#allocation124_spill] sm:$0xff] }
 0x2ca   :  { %3130 = vperm.xlu1 %5677, %v10475_v51   ;;  %3127 = vperm.xlu0 %5676, %v10478_v21   ;;  %v1684_v43 = vmax.f32 %v10479_v20, %v1427_v39  ;;  %v2687_v13 = vsel %vm2303_vm4, %v8115_v63, -1e+30  ;;  %v8345_v48 = vsel %vm2340_vm3, %v7771_v4, -1e+30  ;;  %v10482_v51 = vld [vmem:[#allocation49_spill] sm:$0xff]  ;;  %v1515_v5 = vmax.f32 %v1513_v44, %v1514_v56  ;;  %v8355_v32 = vpop.permute.xlu1 %2194  ;;  %v10493_v44 = vld [vmem:[#allocation123_spill] sm:$0xff] }
 0x2cb   :  { %10480 = vst [vmem:[#allocation25_spill] sm:$0xff] %v8345_v48  ;;  %v10483_v38 = vmax.f32 %v10481_v54, %v10482_v51  ;;  %v8353_v35 = vsel %vm2341_vm6, %v7778_v45, -1e+30  ;;  %v8357_v39 = vpop.permute.xlu0 %2110  ;;  %v10486_v21 = vmax.f32 %v10485_v57, -1e+30  ;;  %v10487_v22 = vld [vmem:[#allocation101_spill] sm:$0xff] }
 0x2cc   :  { %10484 = vst [vmem:[#allocation82_spill] sm:$0xff] %v8353_v35  ;;  %v10488_v59 = vmax.f32 %v10487_v22, -1e+30  ;;  %v8364_v23 = vsel %vm2361_vm7, %v7778_v45, -1e+30  ;;  %v10491_v54 = vld [vmem:[#allocation136_spill] sm:$0xff] }
 0x2cd   :  { %v8350_v25 = vmax.f32 %v10483_v38, %v2718_v61  ;;  %v3084_v20 = vmax.f32 %v10486_v21, %v2836_v30  ;;  %10489 = vst [vmem:[#allocation91_spill] sm:$0xff] %v8364_v23  ;;  %v8367_v61 = vsel %vm2360_vm8, %v7771_v4, -1e+30  ;;  %v10492_v51 = vld [vmem:[#allocation35_spill] sm:$0xff]  ;;  %v10495_v24 = vld [vmem:[#allocation50_spill] sm:$0xff]  ;;  %v10496_v57 = vld [vmem:[#allocation68_spill] sm:$0xff]  ;;  %v1623_v21 = vmax.f32 %v1621_v11, %v1622_v0 }
 0x2ce   :  { %v3091_v1 = vmax.f32 %v10488_v59, %v2899_v60  ;;  %10490 = vst [vmem:[#allocation84_spill] sm:$0xff] %v8367_v61  ;;  %3675 = vbcast.lane.b32.xlu1 %v10491_v54, 264  ;;  %v10494_v56 = vmax.f32 %v10492_v51, %v10493_v44  ;;  %vm2382_vm9 = vcmp.gt.f32.partialorder %v10495_v24, 0.0  ;;  %vm2378_vm10 = vcmp.gt.f32.partialorder %v10496_v57, 0.0  ;;  %v10497_v30 = vld [vmem:[#allocation71_spill] sm:$0xff]  ;;  %3671 = vbcast.lane.b32.xlu0 %v10491_v54, 256  ;;  %v8384_v44 = vpop.permute.xlu1 %2222 }
 0x2cf   :  { %v2839_v22 = vmax.f32 %v10497_v30, %v2687_v13  ;;  %v1579_v60 = vrot.slane %v1578_v46, 2  ;;  %v1685_v59 = vrot.slane %v1684_v43, 4  ;;  %vm2331_vm11 = vcmp.gt.f32.partialorder %v8261_v12, 0.0  ;;  %v8386_v24 = vpop.permute.xlu0 %2218  ;;  %v10501_v30 = vld [vmem:[#allocation76_spill] sm:$0xff]  ;;  %v10503_v23 = vld [vmem:[#allocation130_spill] sm:$0xff] }
 0x2d0   :  { %v8373_v38 = vmax.f32 %v10494_v56, %v2738_v14  ;;  %v1516_v51 = vrot.slane %v1515_v5, 2  ;;  %v8390_v13 = vrot.slane %v7811_v58, %v10453_v9  ;;  %v8394_v11 = vsel %vm9965_vm5, %v3091_v1, %v8181_v26  ;;  %v10500_v56 = vld [vmem:[#allocation109_spill] sm:$0xff]  ;;  %v10502_v26 = vld [vmem:[#allocation48_spill] sm:$0xff] }
 0x2d1   :  { %10499 = vst [vmem:[#allocation87_spill] sm:$0xff] %v8394_v11  ;;  %v2766_v12 = vsel %vm2382_vm9, %v8019_v15, -1e+30  ;;  %v2762_v0 = vsel %vm2378_vm10, %v8019_v15, -1e+30  ;;  %v8401_v57 = vsel %vm9964_vm1, %v3084_v20, %v8132_v34  ;;  %vm2389_vm12 = vcmp.gt.f32.partialorder %v10501_v30, 0.0 }
 0x2d2   :  { %10498 = vst [vmem:[#allocation83_spill] sm:$0xff] %v8390_v13  ;;  %3694 = vbcast.lane.b32.xlu1 %v10500_v56, 264  ;;  %v2840_v14 = vrot.slane %v2839_v22, 4  ;;  %v2715_v9 = vsel %vm2331_vm11, %v8115_v63, -1e+30  ;;  %vm2351_vm14 = vcmp.gt.f32.partialorder %v8295_v6, 0.0  ;;  %v1580_v1 = vmax.f32 %v1578_v46, %v1579_v60  ;;  %v8419_v6 = vpop.permute.xlu1 %725 }
 0x2d3   :  { %3690 = vbcast.lane.b32.xlu0 %v10500_v56, 256  ;;  %vm2388_vm0 = vcmp.gt.f32.partialorder %v10502_v26, 0.0  ;;  %v1624_v36 = vrot.slane %v1623_v21, 2  ;;  %v1686_v13 = vmax.f32 %v1684_v43, %v1685_v59  ;;  %v10504_v61 = vld [vmem:[#allocation128_spill] sm:$0xff]  ;;  %v10507_v34 = vld [vmem:[#allocation55_spill] sm:$0xff]  ;;  %v10508_v20 = vld [vmem:[#allocation126_spill] sm:$0xff]  ;;  %v1517_v7 = vmax.f32 %v1515_v5, %v1516_v51  ;;  %v8421_v19 = vpop.permute.xlu0 %630 }
 0x2d4   :  { %v10505_v35 = vmax.f32 %v10503_v23, %v10504_v61  ;;  %v10509_v27 = vmax.f32 %v10507_v34, %v10508_v20  ;;  %vm2347_vm2 = vcmp.gt.f32.partialorder %v8297_v31, 0.0  ;;  %vm1022_vm3 = vcmp.gt.f32.partialorder %v8104_v41, 0.0  ;;  %v10511_v46 = vld [vmem:[#allocation30_spill] sm:$0xff]  ;;  %v10512_v43 = vld [vmem:[#allocation52_spill] sm:$0xff]  ;;  %v10513_v61 = vld [vmem:[#allocation115_spill] sm:$0xff] }
 0x2d5   :  { %vm1029_vm4 = vcmp.gt.f32.partialorder %v10511_v46, 0.0  ;;  %v2902_v23 = vmax.f32 %v10512_v43, %v2715_v9  ;;  %v8436_v5 = vsel %vm2388_vm0, %v7771_v4, -1e+30  ;;  %v10515_v60 = vld [vmem:[#allocation79_spill] sm:$0xff]  ;;  %v2841_v41 = vmax.f32 %v2839_v22, %v2840_v14  ;;  %v10516_v4 = vld [vmem:[#allocation66_spill] sm:$0xff] }
 0x2d6   :  { %v8411_v48 = vmax.f32 %v10505_v35, %v2766_v12  ;;  %v8416_v42 = vmax.f32 %v10509_v27, %v2762_v0  ;;  %v2735_v35 = vsel %vm2351_vm14, %v8115_v63, -1e+30  ;;  %3713 = vbcast.lane.b32.xlu1 %v10513_v61, 264  ;;  %v8431_v27 = vsel %vm2389_vm12, %v7778_v45, -1e+30  ;;  %v8448_v34 = vpop.permute.xlu1 %858  ;;  %v10519_v31 = vld [vmem:[#allocation111_spill] sm:$0xff] }
 0x2d7   :  { %10514 = vst [vmem:[#allocation88_spill] sm:$0xff] %v8431_v27  ;;  %vm1028_vm6 = vcmp.gt.f32.partialorder %v10515_v60, 0.0  ;;  %3709 = vbcast.lane.b32.xlu0 %v10513_v61, 256  ;;  %v1581_v59 = vrot.slane %v1580_v1, 1  ;;  %v1625_v51 = vmax.f32 %v1623_v21, %v1624_v36  ;;  %v1687_v12 = vrot.slane %v1686_v13, 2  ;;  %v8450_v22 = vpop.permute.xlu0 %759  ;;  %v10518_v36 = vld [vmem:[#allocation69_spill] sm:$0xff] }
 0x2d8   :  { %10506 = vst [vmem:[#allocation26_spill] sm:$0xff] %v8411_v48  ;;  %10510 = vst [vmem:[#allocation89_spill] sm:$0xff] %v8416_v42  ;;  %v2731_v0 = vsel %vm2347_vm2, %v8115_v63, -1e+30  ;;  %v1518_v30 = vrot.slane %v1517_v7, 1  ;;  %v2947_v26 = vmax.f32 %v10516_v4, %v2735_v35  ;;  %vm1050_vm7 = vcmp.gt.f32.partialorder %v10518_v36, 0.0 }
 0x2d9   :  { %v1406_v45 = vsel %vm1022_vm3, %v7865_v8, -1e+30  ;;  %v8445_v9 = vsel %vm1029_vm4, %v7939_v53, -1e+30  ;;  %10517 = vst [vmem:[#allocation125_spill] sm:$0xff] %v8450_v22  ;;  %v2903_v21 = vrot.slane %v2902_v23, 4  ;;  %v8467_v11 = vrot.slane %v7811_v58, %v10465_v16 }
 0x2da   :  { %v8453_v14 = vsel %vm1028_vm6, %v7946_v47, -1e+30  ;;  %3827 = vbcast.lane.b32.xlu1 %v10519_v31, 264  ;;  %v10520_v20 = vld [vmem:[#allocation38_spill] sm:$0xff]  ;;  %v2842_v35 = vrot.slane %v2841_v41, 2  ;;  %v8469_v36 = vmax.f32 %v1580_v1, %v1581_v59  ;;  %v10526_v48 = vld [vmem:[#allocation137_spill] sm:$0xff]  ;;  %v8476_v17 = vmax.f32 %v1517_v7, %v1518_v30  ;;  %v8481_v27 = vpop.permute.xlu1 %922 }
 0x2db   :  { %v8459_v46 = vrot.slane %v7701_v33, %v10520_v20  ;;  %v10522_v60 = vld [vmem:[#allocation54_spill] sm:$0xff]  ;;  %3823 = vbcast.lane.b32.xlu0 %v10519_v31, 256  ;;  %10523 = vst [vmem:[#allocation53_spill] sm:$0xff] %v8467_v11  ;;  %v1626_v33 = vrot.slane %v1625_v51, 1  ;;  %v2948_v43 = vrot.slane %v2947_v26, 4  ;;  %v8483_v16 = vpop.permute.xlu0 %892  ;;  %vm1057_vm8 = vcmp.gt.f32.partialorder %v8204_v40, 0.0 }
 0x2dc   :  { %v2938_v4 = vmax.f32 %v10522_v60, %v2731_v0  ;;  %10524 = vst [vmem:[#allocation93_spill] sm:$0xff] %v8469_v36  ;;  %v10525_v42 = vld [vmem:[#allocation138_spill] sm:$0xff]  ;;  %10528 = vst [vmem:[#allocation96_spill] sm:$0xff] %v8476_v17  ;;  %v1434_v60 = vsel %vm1050_vm7, %v7865_v8, -1e+30  ;;  %vm1056_vm9 = vcmp.gt.f32.partialorder %v8206_v3, 0.0  ;;  %v2843_v7 = vmax.f32 %v2841_v41, %v2842_v35 }
 0x2dd   :  { %10521 = vst [vmem:[#allocation64_spill] sm:$0xff] %v8459_v46  ;;  %v10527_v10 = vmax.f32 %v10525_v42, %v10526_v48  ;;  %v1688_v46 = vmax.f32 %v1686_v13, %v1687_v12  ;;  %vm2310_vm10 = vcmp.gt.f32.partialorder %v8231_v55, 0.0  ;;  %v10529_v42 = vld [vmem:[#allocation51_spill] sm:$0xff]  ;;  %vm1019_vm11 = vcmp.gt.f32.partialorder %v8419_v6, 0.0  ;;  %v10531_v41 = vld [vmem:[#allocation90_spill] sm:$0xff]  ;;  %v10532_v59 = vld [vmem:[#allocation105_spill] sm:$0xff] }
 0x2de   :  { %3846 = vbcast.lane.b32.xlu1 %v10529_v42, 264  ;;  %v2939_v48 = vrot.slane %v2938_v4, 4  ;;  %vm999_vm12 = vcmp.gt.f32.partialorder %v8421_v19, 0.0  ;;  %v8493_v13 = vmax.f32 %v1625_v51, %v1626_v33  ;;  %vm2338_vm14 = vcmp.gt.f32.partialorder %v8259_v50, 0.0  ;;  %v10540_v35 = vld [vmem:[#allocation40_spill] sm:$0xff] }
 0x2df   :  { %v8474_v22 = vmax.f32 %v10527_v10, %v1406_v45  ;;  %v2904_v10 = vmax.f32 %v2902_v23, %v2903_v21  ;;  %3842 = vbcast.lane.b32.xlu0 %v10529_v42, 256  ;;  %v1689_v40 = vrot.slane %v1688_v46, 1  ;;  %v8497_v3 = vsel %vm1057_vm8, %v7939_v53, -1e+30  ;;  %v1879_v23 = vpop.permute.xlu1 %1878  ;;  %v8503_v19 = vpop.permute.xlu0 %926  ;;  %v10546_v36 = vld [vmem:[#allocation108_spill] sm:$0xff] }
 0x2e0   :  { %10530 = vst [vmem:[#allocation85_spill] sm:$0xff] %v8493_v13  ;;  %v8500_v55 = vsel %vm1056_vm9, %v7946_v47, -1e+30  ;;  %v2694_v1 = vsel %vm2310_vm10, %v8019_v15, -1e+30  ;;  %v2949_v6 = vmax.f32 %v2947_v26, %v2948_v43  ;;  %v10533_v12 = vmax.f32 %v10531_v41, %v10532_v59  ;;  %v8522_v43 = vld [vmem:[%s9715_s9 + $0x8] sm:$0xff] }
 0x2e1   :  { %v2905_v30 = vrot.slane %v2904_v10, 2  ;;  %v1403_v50 = vsel %vm1019_vm11, %v7748_v49, -1e+30  ;;  %v1383_v53 = vsel %vm999_vm12, %v7748_v49, -1e+30  ;;  %v2844_v47 = vrot.slane %v2843_v7, 1 }
 0x2e2   :  { %v8508_v51 = vmax.f32 %v10533_v12, %v1434_v60  ;;  %3698 = vbcast.lane.b32.xlu1 %v10500_v56, 272  ;;  %v2722_v45 = vsel %vm2338_vm14, %v8019_v15, -1e+30  ;;  %v2940_v21 = vmax.f32 %v2938_v4, %v2939_v48  ;;  %v8517_v26 = vrot.slane %v7811_v58, %v10520_v20  ;;  %v10536_v60 = vld [vmem:[#allocation39_spill] sm:$0xff]  ;;  %v10537_v48 = vld [vmem:[#allocation77_spill] sm:$0xff]  ;;  %v10539_v4 = vld [vmem:[#allocation44_spill] sm:$0xff] }
 0x2e3   :  { %3679 = vbcast.lane.b32.xlu0 %v10491_v54, 272  ;;  %v8525_v49 = vmax.f32 %v1688_v46, %v1689_v40  ;;  %vm9963_vm0 = vcmask 1045509   ;;  %v10538_v41 = vmax.f32 %v10536_v60, %v10537_v48  ;;  %v2950_v20 = vrot.slane %v2949_v6, 2  ;;  %v8537_v8 = vpop.permute.xlu1 %2018  ;;  %v1991_v46 = vpop.permute.xlu0 %1990  ;;  %v8542_v40 = vld [vmem:[%s9715_s9] sm:$0xff]  ;;  %v10549_v17 = vld [vmem:[#allocation72_spill] sm:$0xff] }
 0x2e4   :  { %10534 = vst [vmem:[#allocation94_spill] sm:$0xff] %v8517_v26  ;;  %v1630_v59 = vmax.f32 %v8225_v37, %v1403_v50  ;;  %v1585_v12 = vmax.f32 %v8220_v28, %v1383_v53  ;;  %v10541_v33 = vmax.f32 %v10539_v4, %v10540_v35  ;;  %vm2307_vm2 = vcmp.gt.f32.partialorder %v1879_v23, 0.0  ;;  %v10542_v28 = vld [vmem:[#allocation59_spill] sm:$0xff]  ;;  %v8561_v4 = vld [vmem:[#allocation2 + $0x20] sm:$0xff] }
 0x2e5   :  { %10535 = vst [vmem:[#allocation92_spill] sm:$0xff] %v8525_v49  ;;  %v8533_v58 = vmax.f32 %v10538_v41, %v2694_v1  ;;  %v2906_v1 = vmax.f32 %v2904_v10, %v2905_v30  ;;  %v3651_v60 = vmax.f32 %v8522_v43, 1.0  ;;  %v2845_v37 = vmax.f32 %v2843_v7, %v2844_v47  ;;  %v8576_v49 = vld [vmem:[#allocation2 + $0x18] sm:$0xff] }
 0x2e6   :  { %v8547_v0 = vmax.f32 %v10541_v33, %v2722_v45  ;;  %v2941_v50 = vrot.slane %v2940_v21, 2  ;;  %vm2364_vm3 = vcmp.gt.f32.partialorder %v8322_v18, 0.0  ;;  %vm2358_vm4 = vcmp.gt.f32.partialorder %v8324_v62, 0.0  ;;  %3732 = vbcast.lane.b32.xlu1 %v10542_v28, 264 }
 0x2e7   :  { %3728 = vbcast.lane.b32.xlu0 %v10542_v28, 256  ;;  %vm2386_vm6 = vcmp.gt.f32.partialorder %v8355_v32, 0.0  ;;  %vm1047_vm7 = vcmp.gt.f32.partialorder %v8448_v34, 0.0  ;;  %v3650_v10 = vmax.f32 %v8542_v40, 1.0  ;;  %v2951_v23 = vmax.f32 %v2949_v6, %v2950_v20  ;;  %v8559_v45 = vpop.permute.xlu1 %2098  ;;  %v2071_v35 = vpop.permute.xlu0 %2070  ;;  %v10544_v6 = vld [vmem:[#allocation133_spill] sm:$0xff] }
 0x2e8   :  { %v1631_v30 = vrot.slane %v1630_v59, 4  ;;  %v1586_v7 = vrot.slane %v1585_v12, 4  ;;  %v2691_v47 = vsel %vm2307_vm2, %v8115_v63, -1e+30  ;;  %v2907_v33 = vrot.slane %v2906_v1, 1 }
 0x2e9   :  { %v8566_v48 = vsel %vm2364_vm3, %v8561_v4, -1e+30  ;;  %v2742_v41 = vsel %vm2358_vm4, %v8019_v15, -1e+30  ;;  %5686 = vrcp.f32 %v3651_v60  ;;  %v10545_v20 = vmax.f32 %v10544_v6, -1e+30 }
 0x2ea   :  { %10543 = vst [vmem:[#allocation73_spill] sm:$0xff] %v8566_v48  ;;  %v2942_v26 = vmax.f32 %v2940_v21, %v2941_v50  ;;  %v2770_v11 = vsel %vm2386_vm6, %v8019_v15, -1e+30  ;;  %v1431_v18 = vsel %vm1047_vm7, %v8576_v49, -1e+30  ;;  %3865 = vbcast.lane.b32.xlu1 %v10546_v36, 264  ;;  %v2848_v62 = vmax.f32 %v8310_v2, %v2691_v47 }
 0x2eb   :  { %v3085_v53 = vmax.f32 %v10545_v20, %v2845_v37  ;;  %vm2365_vm8 = vcmp.gt.f32.partialorder %v8357_v39, 0.0  ;;  %vm2335_vm9 = vcmp.gt.f32.partialorder %v1991_v46, 0.0  ;;  %3861 = vbcast.lane.b32.xlu0 %v10546_v36, 256  ;;  %5688 = vrcp.f32 %v3650_v10  ;;  %v8585_v15 = vpop.permute.xlu1 %2126  ;;  %v8587_v37 = vpop.permute.xlu0 %2122  ;;  %v10547_v50 = vld [vmem:[#allocation61_spill] sm:$0xff]  ;;  %v10550_v2 = vld [vmem:[#allocation62_spill] sm:$0xff] }
 0x2ec   :  { %v2952_v21 = vrot.slane %v2951_v23, 1  ;;  %v1632_v60 = vmax.f32 %v1630_v59, %v1631_v30  ;;  %v1587_v32 = vmax.f32 %v1585_v12, %v1586_v7  ;;  %vm2355_vm10 = vcmp.gt.f32.partialorder %v2071_v35, 0.0  ;;  %v8600_v12 = vld [vmem:[#allocation2 + $0x28] sm:$0xff] }
 0x2ed   :  { %v2908_v34 = vmax.f32 %v2906_v1, %v2907_v33  ;;  %v10548_v6 = vmax.f32 %v8143_v29, %v10547_v50  ;;  %v10551_v47 = vmax.f32 %v10549_v17, %v10550_v2  ;;  %v1693_v10 = vmax.f32 %v8284_v52, %v1431_v18  ;;  %v10553_v1 = vld [vmem:[#allocation58_spill] sm:$0xff] }
 0x2ee   :  { %v2943_v59 = vrot.slane %v2942_v26, 1  ;;  %v8605_v30 = vsel %vm2365_vm8, %v8600_v12, -1e+30  ;;  %v2719_v29 = vsel %vm2335_vm9, %v8115_v63, -1e+30  ;;  %3747 = vbcast.lane.b32.xlu1 %v10553_v1, 256  ;;  %v8612_v17 = vsel %vm9963_vm0, %v3085_v53, %v8401_v57 }
 0x2ef   :  { %v8592_v20 = vmax.f32 %v10548_v6, %v2742_v41  ;;  %v8597_v13 = vmax.f32 %v10551_v47, %v2770_v11  ;;  %10552 = vst [vmem:[#allocation119_spill] sm:$0xff] %v8605_v30  ;;  %vm2393_vm11 = vcmp.gt.f32.partialorder %v8384_v44, 0.0  ;;  %vm2392_vm12 = vcmp.gt.f32.partialorder %v8386_v24, 0.0  ;;  %3717 = vbcast.lane.b32.xlu0 %v10513_v61, 272  ;;  %v2183_v33 = vpop.permute.xlu1 %2182  ;;  %v2167_v41 = vpop.permute.xlu0 %2166  ;;  %v10568_v30 = vld [vmem:[#allocation26_spill] sm:$0xff] }
 0x2f0   :  { %v2849_v52 = vrot.slane %v2848_v62, 4  ;;  %v2739_v11 = vsel %vm2355_vm10, %v8115_v63, -1e+30  ;;  %v2953_v39 = vmax.f32 %v2951_v23, %v2952_v21  ;;  %v1633_v7 = vrot.slane %v1632_v60, 2 }
 0x2f1   :  { %v1588_v46 = vrot.slane %v1587_v32, 2  ;;  %vm4387_vm14 = vcmp.gt.f32.partialorder %v8522_v43, 0.0  ;;  %v1694_v18 = vrot.slane %v1693_v10, 4  ;;  %v2911_v57 = vmax.f32 %v8350_v25, %v2719_v29  ;;  %v10557_v25 = vld [vmem:[#allocation129_spill] sm:$0xff] }
 0x2f2   :  { %vm2383_vm2 = vcmp.gt.f32.partialorder %v2183_v33, 0.0  ;;  %vm2379_vm3 = vcmp.gt.f32.partialorder %v2167_v41, 0.0  ;;  %v2944_v53 = vmax.f32 %v2942_v26, %v2943_v59  ;;  %v8624_v35 = vsel %vm2393_vm11, %v8600_v12, -1e+30  ;;  %3831 = vbcast.lane.b32.xlu1 %v10519_v31, 272  ;;  %v10566_v26 = vld [vmem:[#allocation125_spill] sm:$0xff] }
 0x2f3   :  { %10554 = vst [vmem:[#allocation27_spill] sm:$0xff] %v8624_v35  ;;  %v8629_v23 = vsel %vm2392_vm12, %v8561_v4, -1e+30  ;;  %v2956_v21 = vmax.f32 %v8373_v38, %v2739_v11  ;;  %v8633_v43 = vpop.eup %5686  ;;  %v10558_v50 = vmax.f32 %v10557_v25, -1e+30  ;;  %v2850_v44 = vmax.f32 %v2848_v62, %v2849_v52  ;;  %3751 = vbcast.lane.b32.xlu0 %v10553_v1, 264  ;;  %v8645_v11 = vpop.permute.xlu1 %2234 }
 0x2f4   :  { %10555 = vst [vmem:[#allocation56_spill] sm:$0xff] %v8629_v23  ;;  %10556 = vst [vmem:[#allocation127_spill] sm:$0xff] %v8633_v43  ;;  %v10559_v2 = vmov 0   ;;  %v1634_v24 = vmax.f32 %v1632_v60, %v1633_v7  ;;  %v1589_v59 = vmax.f32 %v1587_v32, %v1588_v46  ;;  %v2767_v38 = vsel %vm2383_vm2, %v8115_v63, -1e+30  ;;  %v8647_v33 = vpop.permute.xlu0 %2210  ;;  %v10562_v25 = vld [vmem:[#allocation57_spill] sm:$0xff] }
 0x2f5   :  { %v3092_v6 = vmax.f32 %v10558_v50, %v2908_v34  ;;  %v8641_v47 = vsel %vm4387_vm14, 1, %v10559_v2  ;;  %v2763_v29 = vsel %vm2379_vm3, %v8115_v63, -1e+30  ;;  %v8649_v34 = vpop.eup %5688  ;;  %v1695_v52 = vmax.f32 %v1693_v10, %v1694_v18  ;;  %v10564_v7 = vld [vmem:[#allocation43_spill] sm:$0xff]  ;;  %v10569_v10 = vld [vmem:[#allocation89_spill] sm:$0xff] }
 0x2f6   :  { %10560 = vst [vmem:[#allocation98_spill] sm:$0xff] %v8641_v47  ;;  %10561 = vst [vmem:[#allocation95_spill] sm:$0xff] %v8649_v34  ;;  %v2912_v41 = vrot.slane %v2911_v57, 4  ;;  %vm4386_vm4 = vcmp.gt.f32.partialorder %v8542_v40, 0.0  ;;  %v10563_v60 = vmax.f32 %v10562_v25, -1e+30  ;;  %v3019_v62 = vmax.f32 %v10568_v30, %v2767_v38 }
 0x2f7   :  { %v10565_v46 = vmax.f32 %v10564_v7, -1e+30  ;;  %vm1026_vm6 = vcmp.gt.f32.partialorder %v10566_v26, 0.0  ;;  %v2957_v43 = vrot.slane %v2956_v21, 4  ;;  %v10567_v47 = vld [vmem:[#allocation67_spill] sm:$0xff]  ;;  %vm1054_vm7 = vcmp.gt.f32.partialorder %v8483_v16, 0.0 }
 0x2f8   :  { %v3097_v32 = vmax.f32 %v10563_v60, %v2953_v39  ;;  %3880 = vbcast.lane.b32.xlu1 %v10567_v47, 256  ;;  %v2851_v34 = vrot.slane %v2850_v44, 2  ;;  %v3010_v18 = vmax.f32 %v10569_v10, %v2763_v29  ;;  %3850 = vbcast.lane.b32.xlu0 %v10529_v42, 272  ;;  %v1635_v35 = vrot.slane %v1634_v24, 1  ;;  %v745_v39 = vpop.permute.xlu1 %744  ;;  %v8664_v60 = vpop.permute.xlu0 %2238  ;;  %v8675_v30 = vld [vmem:[#allocation2 + $0x10] sm:$0xff] }
 0x2f9   :  { %v3096_v50 = vmax.f32 %v10565_v46, %v2944_v53  ;;  %v1590_v25 = vrot.slane %v1589_v59, 1  ;;  %v10570_v53 = vld [vmem:[#allocation87_spill] sm:$0xff]  ;;  %v8673_v46 = vsel %vm4386_vm4, 1, %v10559_v2  ;;  %v1696_v23 = vrot.slane %v1695_v52, 2 }
 0x2fa   :  { %v8668_v7 = vsel %vm9964_vm1, %v3092_v6, %v10570_v53  ;;  %10571 = vst [vmem:[#allocation97_spill] sm:$0xff] %v8673_v46  ;;  %v1410_v38 = vsel %vm1026_vm6, %v8675_v30, -1e+30  ;;  %v2913_v29 = vmax.f32 %v2911_v57, %v2912_v41  ;;  %vm1023_vm8 = vcmp.gt.f32.partialorder %v745_v39, 0.0 }
 0x2fb   :  { %v8681_v10 = vsel %vm9967_vm13, %v3097_v32, %v3096_v50  ;;  %vm1060_vm9 = vcmp.gt.f32.partialorder %v8481_v27, 0.0  ;;  %v1438_v40 = vsel %vm1054_vm7, %v8675_v30, -1e+30  ;;  %v2958_v6 = vmax.f32 %v2956_v21, %v2957_v43  ;;  %v10574_v32 = vld [vmem:[#allocation47_spill] sm:$0xff]  ;;  %v10575_v50 = vld [vmem:[#allocation60_spill] sm:$0xff]  ;;  %v5724_v43 = vld [vmem:[#allocation2] sm:$0xff] }
 0x2fc   :  { %3683 = vbcast.lane.b32.xlu1 %v10491_v54, 280  ;;  %v2852_v2 = vmax.f32 %v2850_v44, %v2851_v34  ;;  %v3020_v53 = vrot.slane %v3019_v62, 4  ;;  %v3011_v46 = vrot.slane %v3010_v18, 4  ;;  %v1407_v26 = vsel %vm1023_vm8, %v8576_v49, -1e+30  ;;  %3884 = vbcast.lane.b32.xlu0 %v10567_v47, 264  ;;  %v878_v16 = vpop.permute.xlu1 %877  ;;  %v8700_v54 = vpop.permute.xlu0 %778 }
 0x2fd   :  { %v8690_v57 = vmax.f32 %v1634_v24, %v1635_v35  ;;  %v8692_v41 = vmax.f32 %v1589_v59, %v1590_v25  ;;  %v10576_v39 = vmax.f32 %v10574_v32, %v10575_v50  ;;  %vm1061_vm10 = vcmp.gt.f32.partialorder %v8503_v19, 0.0  ;;  %v10578_v24 = vld [vmem:[#allocation78_spill] sm:$0xff]  ;;  %v10579_v59 = vld [vmem:[#allocation80_spill] sm:$0xff] }
 0x2fe   :  { %v1697_v21 = vmax.f32 %v1695_v52, %v1696_v23  ;;  %v8704_v44 = vsel %vm1060_vm9, %v5724_v43, -1e+30  ;;  %v2914_v35 = vrot.slane %v2913_v29, 2  ;;  %vm1051_vm11 = vcmp.gt.f32.partialorder %v878_v16, 0.0  ;;  %v5725_v52 = vld [vmem:[#allocation2 + $0x8] sm:$0xff] }
 0x2ff   :  { %10572 = vst [vmem:[#allocation102_spill] sm:$0xff] %v8690_v57  ;;  %10573 = vst [vmem:[#allocation28_spill] sm:$0xff] %v8692_v41  ;;  %v8697_v48 = vmax.f32 %v10576_v39, %v1410_v38  ;;  %v10580_v34 = vmax.f32 %v10578_v24, %v10579_v59  ;;  %v2959_v38 = vrot.slane %v2958_v6, 2  ;;  %v1639_v32 = vmax.f32 %v8474_v22, %v1407_v26 }
 0x300   :  { %10577 = vst [vmem:[#allocation86_spill] sm:$0xff] %v8704_v44  ;;  %v1435_v19 = vsel %vm1051_vm11, %v8576_v49, -1e+30  ;;  %3736 = vbcast.lane.b32.xlu1 %v10542_v28, 272  ;;  %v2853_v23 = vrot.slane %v2852_v2, 1  ;;  %v3021_v27 = vmax.f32 %v3019_v62, %v3020_v53  ;;  %v3012_v39 = vmax.f32 %v3010_v18, %v3011_v46  ;;  %3702 = vbcast.lane.b32.xlu0 %v10500_v56, 280  ;;  %v1895_v26 = vpop.permute.xlu1 %1894  ;;  %v8721_v43 = vpop.permute.xlu0 %911 }
 0x301   :  { %v8709_v25 = vmax.f32 %v10580_v34, %v1438_v40  ;;  %v8714_v50 = vsel %vm1061_vm10, %v5725_v52, -1e+30  ;;  %vm2342_vm12 = vcmp.gt.f32.partialorder %v8537_v8, 0.0  ;;  %v1702_v22 = vmax.f32 %v8508_v51, %v1435_v19  ;;  %v10582_v18 = vld [vmem:[#allocation70_spill] sm:$0xff]  ;;  %v8727_v53 = vld [vmem:[#allocation2 + $0x30] sm:$0xff] }
 0x302   :  { %10581 = vst [vmem:[#allocation107_spill] sm:$0xff] %v8714_v50  ;;  %vm9962_vm14 = vcmask 1046534   ;;  %v1698_v24 = vrot.slane %v1697_v21, 1  ;;  %v2915_v59 = vmax.f32 %v2913_v29, %v2914_v35  ;;  %vm2362_vm2 = vcmp.gt.f32.partialorder %v8559_v45, 0.0  ;;  %v10583_v45 = vld [vmem:[#allocation74_spill] sm:$0xff] }
 0x303   :  { %vm2369_vm3 = vcmp.gt.f32.partialorder %v8585_v15, 0.0  ;;  %v2960_v62 = vmax.f32 %v2958_v6, %v2959_v38  ;;  %vm2368_vm4 = vcmp.gt.f32.partialorder %v8587_v37, 0.0  ;;  %v1640_v56 = vrot.slane %v1639_v32, 4  ;;  %v10584_v37 = vld [vmem:[#allocation65_spill] sm:$0xff] }
 0x304   :  { %vm2311_vm6 = vcmp.gt.f32.partialorder %v1895_v26, 0.0  ;;  %3770 = vbcast.lane.b32.xlu1 %v10582_v18, 264  ;;  %v2854_v46 = vmax.f32 %v2852_v2, %v2853_v23  ;;  %v2726_v51 = vsel %vm2342_vm12, %v8727_v53, -1e+30  ;;  %v3022_v34 = vrot.slane %v3021_v27, 2  ;;  %3766 = vbcast.lane.b32.xlu0 %v10582_v18, 256  ;;  %v2087_v2 = vpop.permute.xlu1 %2086  ;;  %v2007_v38 = vpop.permute.xlu0 %2006 }
 0x305   :  { %v3013_v29 = vrot.slane %v3012_v39, 2  ;;  %v2746_v15 = vsel %vm2362_vm2, %v8727_v53, -1e+30  ;;  %v8737_v6 = vsel %vm2369_vm3, %v8600_v12, -1e+30  ;;  %v1703_v35 = vrot.slane %v1702_v22, 4 }
 0x306   :  { %v2916_v19 = vrot.slane %v2915_v59, 1  ;;  %v8742_v8 = vsel %vm2368_vm4, %v8561_v4, -1e+30  ;;  %v2695_v23 = vsel %vm2311_vm6, %v8115_v63, -1e+30  ;;  %vm2359_vm7 = vcmp.gt.f32.partialorder %v2087_v2, 0.0 }
 0x307   :  { %v2961_v52 = vrot.slane %v2960_v62, 1  ;;  %v1641_v40 = vmax.f32 %v1639_v32, %v1640_v56  ;;  %v2743_v16 = vsel %vm2359_vm7, %v8115_v63, -1e+30  ;;  %vm2339_vm8 = vcmp.gt.f32.partialorder %v2007_v38, 0.0 }
 0x308   :  { %3899 = vbcast.lane.b32.xlu1 %v10583_v45, 256  ;;  %v3023_v41 = vmax.f32 %v3021_v27, %v3022_v34  ;;  %v3014_v57 = vmax.f32 %v3012_v39, %v3013_v29  ;;  %v2723_v50 = vsel %vm2339_vm8, %v8115_v63, -1e+30  ;;  %3869 = vbcast.lane.b32.xlu0 %v10546_v36, 272  ;;  %v10585_v44 = vmax.f32 %v10584_v37, -1e+30  ;;  %v8756_v56 = vpop.permute.xlu1 %2138  ;;  %v8758_v38 = vpop.permute.xlu0 %2114 }
 0x309   :  { %v8752_v18 = vmax.f32 %v1697_v21, %v1698_v24  ;;  %v1704_v26 = vmax.f32 %v1702_v22, %v1703_v35  ;;  %v2857_v2 = vmax.f32 %v8533_v58, %v2695_v23  ;;  %v2965_v32 = vmax.f32 %v8592_v20, %v2743_v16  ;;  %v10586_v27 = vld [vmem:[#allocation25_spill] sm:$0xff]  ;;  %v10587_v39 = vld [vmem:[#allocation82_spill] sm:$0xff]  ;;  %v10589_v36 = vld [vmem:[#allocation84_spill] sm:$0xff] }
 0x30a   :  { %v3086_v28 = vmax.f32 %v10585_v44, %v2854_v46  ;;  %v10588_v34 = vmax.f32 %v10586_v27, %v10587_v39  ;;  %v2917_v29 = vmax.f32 %v2915_v59, %v2916_v19  ;;  %v10590_v37 = vld [vmem:[#allocation91_spill] sm:$0xff]  ;;  %v2920_v22 = vmax.f32 %v8547_v0, %v2723_v50  ;;  %v8792_v27 = vld [vmem:[#allocation2 + $0x38] sm:$0xff] }
 0x30b   :  { %v10591_v44 = vmax.f32 %v10589_v36, %v10590_v37  ;;  %v2962_v58 = vmax.f32 %v2960_v62, %v2961_v52  ;;  %v2990_v20 = vmax.f32 %v8742_v8, %v8737_v6  ;;  %vm2390_vm9 = vcmp.gt.f32.partialorder %v8647_v33, 0.0  ;;  %v10594_v19 = vld [vmem:[#allocation75_spill] sm:$0xff] }
 0x30c   :  { %v8763_v63 = vmax.f32 %v10588_v34, %v2726_v51  ;;  %v1642_v16 = vrot.slane %v1641_v40, 2  ;;  %3721 = vbcast.lane.b32.xlu1 %v10513_v61, 280  ;;  %v3024_v24 = vrot.slane %v3023_v41, 1  ;;  %v3015_v46 = vrot.slane %v3014_v57, 1  ;;  %3903 = vbcast.lane.b32.xlu0 %v10583_v45, 264  ;;  %v2199_v62 = vpop.permute.xlu1 %2198  ;;  %v8782_v33 = vpop.permute.xlu0 %2142  ;;  %v10592_v51 = vld [vmem:[#allocation81_spill] sm:$0xff] }
 0x30d   :  { %v8768_v21 = vmax.f32 %v10591_v44, %v2746_v15  ;;  %vm2397_vm10 = vcmp.gt.f32.partialorder %v8664_v60, 0.0  ;;  %v8779_v36 = vsel %vm9962_vm14, %v3086_v28, %v8612_v17  ;;  %vm2396_vm11 = vcmp.gt.f32.partialorder %v8645_v11, 0.0  ;;  %v10596_v44 = vld [vmem:[#allocation103_spill] sm:$0xff] }
 0x30e   :  { %v1705_v0 = vrot.slane %v1704_v26, 2  ;;  %v2858_v50 = vrot.slane %v2857_v2, 4  ;;  %v2966_v59 = vrot.slane %v2965_v32, 4  ;;  %v10593_v61 = vmax.f32 %v10592_v51, -1e+30 }
 0x30f   :  { %v2774_v35 = vsel %vm2390_vm9, %v8727_v53, -1e+30  ;;  %v2921_v60 = vrot.slane %v2920_v22, 4  ;;  %vm2387_vm12 = vcmp.gt.f32.partialorder %v2199_v62, 0.0  ;;  %v10595_v23 = vmax.f32 %v10594_v19, -1e+30 }
 0x310   :  { %v3093_v15 = vmax.f32 %v10593_v61, %v2917_v29  ;;  %v1643_v28 = vmax.f32 %v1641_v40, %v1642_v16  ;;  %v8790_v17 = vsel %vm2397_vm10, %v8600_v12, -1e+30  ;;  %v2771_v39 = vsel %vm2387_vm12, %v8792_v27, -1e+30  ;;  %3785 = vbcast.lane.b32.xlu1 %v10596_v44, 256  ;;  %3755 = vbcast.lane.b32.xlu0 %v10553_v1, 272  ;;  %v8804_v51 = vpop.permute.xlu1 %2250 }
 0x311   :  { %v3098_v52 = vmax.f32 %v10595_v23, %v2962_v58  ;;  %v3025_v34 = vmax.f32 %v3023_v41, %v3024_v24  ;;  %v3016_v37 = vmax.f32 %v3014_v57, %v3015_v46  ;;  %vm1030_vm2 = vcmp.gt.f32.partialorder %v8700_v54, 0.0  ;;  %v8806_v41 = vpop.permute.xlu0 %2226  ;;  %v10597_v57 = vld [vmem:[#allocation88_spill] sm:$0xff] }
 0x312   :  { %v3028_v29 = vmax.f32 %v8597_v13, %v2771_v39  ;;  %v8802_v40 = vsel %vm2396_vm11, %v8561_v4, -1e+30  ;;  %v1706_v58 = vmax.f32 %v1704_v26, %v1705_v0  ;;  %v2859_v16 = vmax.f32 %v2857_v2, %v2858_v50 }
 0x313   :  { %v2967_v62 = vmax.f32 %v2965_v32, %v2966_v59  ;;  %v10598_v24 = vmax.f32 %v8436_v5, %v10597_v57  ;;  %v2922_v46 = vmax.f32 %v2920_v22, %v2921_v60  ;;  %v8815_v19 = vsel %vm9963_vm0, %v3093_v15, %v8668_v7  ;;  %v10599_v22 = vld [vmem:[#allocation24_spill] sm:$0xff]  ;;  %v10601_v59 = vld [vmem:[#allocation31_spill] sm:$0xff] }
 0x314   :  { %v3029_v61 = vrot.slane %v3028_v29, 4  ;;  %v1644_v11 = vrot.slane %v1643_v28, 1  ;;  %v3053_v26 = vmax.f32 %v8802_v40, %v8790_v17  ;;  %v1414_v2 = vsel %vm1030_vm2, %v8675_v30, -1e+30  ;;  %3835 = vbcast.lane.b32.xlu1 %v10519_v31, 280  ;;  %3789 = vbcast.lane.b32.xlu0 %v10596_v44, 264 }
 0x315   :  { %v8811_v13 = vmax.f32 %v10598_v24, %v2774_v35  ;;  %v8824_v32 = vsel %vm9966_vm15, %v3098_v52, %v8681_v10  ;;  %v10600_v0 = vmax.f32 %v10599_v22, -1e+30  ;;  %v10602_v7 = vmax.f32 %v10601_v59, -1e+30  ;;  %v764_v10 = vpop.permute.xlu1 %763  ;;  %v8834_v52 = vpop.permute.xlu0 %2254  ;;  %v10606_v59 = vld [vmem:[#allocation119_spill] sm:$0xff]  ;;  %v10630_v40 = vld [vmem:[#allocation28_spill] sm:$0xff] }
 0x316   :  { %v3030_v35 = vmax.f32 %v3028_v29, %v3029_v61  ;;  %v1707_v60 = vrot.slane %v1706_v58, 1  ;;  %v2860_v54 = vrot.slane %v2859_v16, 2  ;;  %vm1058_vm3 = vcmp.gt.f32.partialorder %v8721_v43, 0.0 }
 0x317   :  { %v3105_v50 = vmax.f32 %v10600_v0, %v3025_v34  ;;  %v3104_v15 = vmax.f32 %v10602_v7, %v3016_v37  ;;  %v2968_v23 = vrot.slane %v2967_v62, 2  ;;  %v10603_v39 = vmax.f32 %v8453_v14, %v8445_v9 }
 0x318   :  { %v2923_v57 = vrot.slane %v2922_v46, 2  ;;  %vm2366_vm4 = vcmp.gt.f32.partialorder %v8758_v38, 0.0  ;;  %vm1027_vm6 = vcmp.gt.f32.partialorder %v764_v10, 0.0  ;;  %v8842_v31 = vmax.f32 %v1643_v28, %v1644_v11  ;;  %3888 = vbcast.lane.b32.xlu1 %v10567_v47, 272  ;;  %3854 = vbcast.lane.b32.xlu0 %v10529_v42, 280  ;;  %v10618_v10 = vld [vmem:[#allocation92_spill] sm:$0xff] }
 0x319   :  { %v8839_v34 = vmax.f32 %v10603_v39, %v1414_v2  ;;  %v3031_v37 = vrot.slane %v3030_v35, 2  ;;  %vm2373_vm7 = vcmp.gt.f32.partialorder %v8782_v33, 0.0  ;;  %v1411_v43 = vsel %vm1027_vm6, %v8576_v49, -1e+30  ;;  %v8857_v61 = vpop.permute.xlu1 %930  ;;  %v897_v11 = vpop.permute.xlu0 %896 }
 0x31a   :  { %v8847_v29 = vsel %vm9967_vm13, %v3105_v50, %v3104_v15  ;;  %v1442_v24 = vsel %vm1058_vm3, %v8675_v30, -1e+30  ;;  %vm2372_vm8 = vcmp.gt.f32.partialorder %v8756_v56, 0.0  ;;  %v1648_v9 = vmax.f32 %v8697_v48, %v1411_v43  ;;  %v10616_v48 = vld [vmem:[#allocation93_spill] sm:$0xff] }
 0x31b   :  { %v8854_v14 = vmax.f32 %v1706_v58, %v1707_v60  ;;  %v2861_v38 = vmax.f32 %v2859_v16, %v2860_v54  ;;  %v2969_v28 = vmax.f32 %v2967_v62, %v2968_v23  ;;  %v2750_v33 = vsel %vm2366_vm4, %v8727_v53, -1e+30  ;;  %v10608_v23 = vld [vmem:[#allocation83_spill] sm:$0xff] }
 0x31c   :  { %v2924_v2 = vmax.f32 %v2922_v46, %v2923_v57  ;;  %v8860_v22 = vsel %vm2373_vm7, %v8600_v12, -1e+30  ;;  %v1649_v0 = vrot.slane %v1648_v9, 4  ;;  %vm1055_vm9 = vcmp.gt.f32.partialorder %v897_v11, 0.0  ;;  %v10605_v46 = vld [vmem:[#allocation73_spill] sm:$0xff]  ;;  %3922 = vbcast.lane.b32.xlu1 %v10608_v23, 264 }
 0x31d   :  { %v10604_v42 = vmax.f32 %v8500_v55, %v8497_v3  ;;  %v3032_v16 = vmax.f32 %v3030_v35, %v3031_v37  ;;  %v1439_v62 = vsel %vm1055_vm9, %v8576_v49, -1e+30  ;;  %v8872_v50 = vsel %vm2372_vm8, %v8561_v4, -1e+30  ;;  %3918 = vbcast.lane.b32.xlu0 %v10608_v23, 256  ;;  %v2103_v56 = vpop.permute.xlu1 %2102  ;;  %v2023_v39 = vpop.permute.xlu0 %2022 }
 0x31e   :  { %v10607_v7 = vmax.f32 %v10605_v46, %v10606_v59  ;;  %v1650_v60 = vmax.f32 %v1648_v9, %v1649_v0  ;;  %v1711_v54 = vmax.f32 %v8709_v25, %v1439_v62  ;;  %v2862_v55 = vrot.slane %v2861_v38, 1 }
 0x31f   :  { %v8866_v58 = vmax.f32 %v10604_v42, %v1442_v24  ;;  %v2970_v35 = vrot.slane %v2969_v28, 1  ;;  %v2925_v57 = vrot.slane %v2924_v2, 1  ;;  %vm2363_vm10 = vcmp.gt.f32.partialorder %v2103_v56, 0.0  ;;  %v10609_v42 = vld [vmem:[#allocation70_spill] sm:$0xff] }
 0x320   :  { %v8877_v15 = vmax.f32 %v10607_v7, %v2750_v33  ;;  %v1651_v37 = vrot.slane %v1650_v60, 2  ;;  %v1712_v43 = vrot.slane %v1711_v54, 4  ;;  %v3033_v24 = vrot.slane %v3032_v16, 1  ;;  %3774 = vbcast.lane.b32.xlu1 %v10609_v42, 272  ;;  %v10610_v7 = vld [vmem:[#allocation59_spill] sm:$0xff] }
 0x321   :  { %vm2394_vm11 = vcmp.gt.f32.partialorder %v8806_v41, 0.0  ;;  %v2747_v25 = vsel %vm2363_vm10, %v8792_v27, -1e+30  ;;  %vm2343_vm12 = vcmp.gt.f32.partialorder %v2023_v39, 0.0  ;;  %vm9961_vm2 = vcmask 1047559   ;;  %3740 = vbcast.lane.b32.xlu0 %v10610_v7, 280  ;;  %v2215_v56 = vpop.permute.xlu1 %2214  ;;  %v2131_v3 = vpop.permute.xlu0 %2130 }
 0x322   :  { %v1652_v9 = vmax.f32 %v1650_v60, %v1651_v37  ;;  %v1713_v33 = vmax.f32 %v1711_v54, %v1712_v43  ;;  %v2974_v11 = vmax.f32 %v8768_v21, %v2747_v25  ;;  %v2727_v0 = vsel %vm2343_vm12, %v8792_v27, -1e+30  ;;  %v10611_v43 = vld [vmem:[#allocation64_spill] sm:$0xff] }
 0x323   :  { %v2863_v62 = vmax.f32 %v2861_v38, %v2862_v55  ;;  %v2971_v46 = vmax.f32 %v2969_v28, %v2970_v35  ;;  %vm2400_vm3 = vcmp.gt.f32.partialorder %v8804_v51, 0.0  ;;  %v2929_v59 = vmax.f32 %v8763_v63, %v2727_v0  ;;  %v10614_v0 = vld [vmem:[#allocation96_spill] sm:$0xff] }
 0x324   :  { %v2926_v39 = vmax.f32 %v2924_v2, %v2925_v57  ;;  %v2778_v60 = vsel %vm2394_vm11, %v8727_v53, -1e+30  ;;  %v2975_v21 = vrot.slane %v2974_v11, 4  ;;  %vm2391_vm4 = vcmp.gt.f32.partialorder %v2215_v56, 0.0  ;;  %3808 = vbcast.lane.b32.xlu1 %v10611_v43, 264  ;;  %v10612_v2 = vld [vmem:[#allocation85_spill] sm:$0xff] }
 0x325   :  { %v3034_v54 = vmax.f32 %v3032_v16, %v3033_v24  ;;  %vm2401_vm6 = vcmp.gt.f32.partialorder %v8834_v52, 0.0  ;;  %v2930_v38 = vrot.slane %v2929_v59, 4  ;;  %v2775_v28 = vsel %vm2391_vm4, %v8792_v27, -1e+30  ;;  %3804 = vbcast.lane.b32.xlu0 %v10611_v43, 256  ;;  %v8904_v16 = vpop.permute.xlu1 %2266  ;;  %v2243_v24 = vpop.permute.xlu0 %2242  ;;  %v10623_v52 = vld [vmem:[#allocation108_spill] sm:$0xff] }
 0x326   :  { %v1653_v55 = vrot.slane %v1652_v9, 1  ;;  %v1714_v35 = vrot.slane %v1713_v33, 2  ;;  %v2976_v63 = vmax.f32 %v2974_v11, %v2975_v21  ;;  %v3037_v37 = vmax.f32 %v8811_v13, %v2775_v28 }
 0x327   :  { %v10613_v57 = vmax.f32 %v10612_v2, -1e+30  ;;  %vm1062_vm7 = vcmp.gt.f32.partialorder %v8857_v61, 0.0  ;;  %v2931_v41 = vmax.f32 %v2929_v59, %v2930_v38  ;;  %v10615_v7 = vmax.f32 %v10614_v0, -1e+30 }
 0x328   :  { %v10617_v11 = vmax.f32 %v10616_v48, -1e+30  ;;  %v2977_v13 = vrot.slane %v2976_v63, 2  ;;  %v3038_v28 = vrot.slane %v3037_v37, 4  ;;  %vm2370_vm8 = vcmp.gt.f32.partialorder %v2131_v3, 0.0  ;;  %3907 = vbcast.lane.b32.xlu1 %v10583_v45, 272 }
 0x329   :  { %v3099_v25 = vmax.f32 %v10613_v57, %v2971_v46  ;;  %v3087_v56 = vmax.f32 %v10615_v7, %v2863_v62  ;;  %v10619_v2 = vmax.f32 %v10618_v10, -1e+30  ;;  %v8915_v61 = vsel %vm2400_vm3, %v8561_v4, -1e+30  ;;  %v10620_v10 = vld [vmem:[#allocation56_spill] sm:$0xff]  ;;  %3873 = vbcast.lane.b32.xlu0 %v10623_v52, 280  ;;  %v2271_v5 = vpop.permute.xlu0 %2270 }
 0x32a   :  { %v3094_v21 = vmax.f32 %v10617_v11, %v2926_v39  ;;  %v8920_v59 = vsel %vm2401_vm6, %v8600_v12, -1e+30  ;;  %v2932_v62 = vrot.slane %v2931_v41, 2  ;;  %v8922_v38 = vmax.f32 %v1652_v9, %v1653_v55  ;;  %v10624_v55 = vld [vmem:[#allocation86_spill] sm:$0xff] }
 0x32b   :  { %v3106_v46 = vmax.f32 %v10619_v2, %v3034_v54  ;;  %v1446_v48 = vsel %vm1062_vm7, %v8675_v30, -1e+30  ;;  %v1715_v39 = vmax.f32 %v1713_v33, %v1714_v35  ;;  %v3039_v3 = vmax.f32 %v3037_v37, %v3038_v28  ;;  %v10621_v54 = vld [vmem:[#allocation27_spill] sm:$0xff]  ;;  %v783_v2 = vpop.permute.xlu1 %782 }
 0x32c   :  { %v10622_v57 = vmax.f32 %v10620_v10, %v10621_v54  ;;  %v2978_v0 = vmax.f32 %v2976_v63, %v2977_v13  ;;  %v2933_v7 = vmax.f32 %v2931_v41, %v2932_v62  ;;  %v2754_v11 = vsel %vm2370_vm8, %v8727_v53, -1e+30  ;;  %v10625_v35 = vld [vmem:[#allocation107_spill] sm:$0xff] }
 0x32d   :  { %v3062_v9 = vmax.f32 %v8915_v61, %v8920_v59  ;;  %v8935_v30 = vsel %vm9961_vm2, %v3087_v56, %v8779_v36  ;;  %v8939_v33 = vsel %vm9962_vm14, %v3094_v21, %v8815_v19  ;;  %v10626_v63 = vmax.f32 %v10624_v55, %v10625_v35  ;;  %v4435_v35 = vld [vmem:[#allocation13 + $0x18] sm:$0xff] }
 0x32e   :  { %v3045_v51 = vmax.f32 %v10622_v57, %v2778_v60  ;;  %v8943_v60 = vsel %vm9965_vm5, %v3099_v25, %v8824_v32  ;;  %v3040_v41 = vrot.slane %v3039_v3, 2  ;;  %vm1031_vm9 = vcmp.gt.f32.partialorder %v783_v2, 0.0  ;;  %v10627_v25 = vld [vmem:[#allocation53_spill] sm:$0xff] }
 0x32f   :  { %v8948_v37 = vmax.f32 %v10626_v63, %v1446_v48  ;;  %v8952_v13 = vsel %vm9966_vm15, %v3106_v46, %v8847_v29  ;;  %v1758_v36 = vmax.f32 %v8922_v38, -1e+30  ;;  %v1716_v56 = vrot.slane %v1715_v39, 1  ;;  %3941 = vbcast.lane.b32.xlu1 %v10627_v25, 264  ;;  %3937 = vbcast.lane.b32.xlu0 %v10627_v25, 256  ;;  %v2119_v29 = vpop.permute.xlu1 %2118  ;;  %v916_v46 = vpop.permute.xlu0 %915 }
 0x330   :  { %v8958_v19 = vmax.f32 %v2990_v20, %v2754_v11  ;;  %v1415_v32 = vsel %vm1031_vm9, %v8576_v49, -1e+30  ;;  %v2979_v21 = vrot.slane %v2978_v0, 1  ;;  %v2934_v28 = vrot.slane %v2933_v7, 1 }
 0x331   :  { %vm2398_vm10 = vcmp.gt.f32.partialorder %v2243_v24, 0.0  ;;  %v1657_v62 = vmax.f32 %v8839_v34, %v1415_v32  ;;  %vm2404_vm11 = vcmp.gt.f32.partialorder %v8904_v16, 0.0  ;;  %vm2405_vm12 = vcmp.gt.f32.partialorder %v2271_v5, 0.0  ;;  %v4434_v32 = vld [vmem:[#allocation13 + $0x10] sm:$0xff] }
 0x332   :  { %vm2367_vm3 = vcmp.gt.f32.partialorder %v2119_v29, 0.0  ;;  %vm1059_vm4 = vcmp.gt.f32.partialorder %v916_v46, 0.0  ;;  %v3041_v6 = vmax.f32 %v3039_v3, %v3040_v41  ;;  %v8967_v10 = vmax.f32 %v1715_v39, %v1716_v56  ;;  %v4432_v56 = vld [vmem:[#allocation13] sm:$0xff] }
 0x333   :  { %v1658_v8 = vrot.slane %v1657_v62, 4  ;;  %v2751_v20 = vsel %vm2367_vm3, %v8792_v27, -1e+30  ;;  %v1443_v48 = vsel %vm1059_vm4, %v8576_v49, -1e+30  ;;  %3793 = vbcast.lane.b32.xlu1 %v10596_v44, 272  ;;  %v2980_v57 = vmax.f32 %v2978_v0, %v2979_v21  ;;  %v2231_v52 = vpop.permute.xlu1 %2230  ;;  %v2147_v2 = vpop.permute.xlu0 %2146 }
 0x334   :  { %v2782_v24 = vsel %vm2398_vm10, %v8727_v53, -1e+30  ;;  %v2983_v34 = vmax.f32 %v8877_v15, %v2751_v20  ;;  %v1720_v54 = vmax.f32 %v8866_v58, %v1443_v48  ;;  %v2935_v5 = vmax.f32 %v2933_v7, %v2934_v28  ;;  %3759 = vbcast.lane.b32.xlu0 %v10553_v1, 280  ;;  %v4433_v1 = vld [vmem:[#allocation13 + $0x8] sm:$0xff]  ;;  %v10628_v21 = vld [vmem:[#allocation102_spill] sm:$0xff] }
 0x335   :  { %v1659_v11 = vmax.f32 %v1657_v62, %v1658_v8  ;;  %v8974_v3 = vsel %vm2405_vm12, %v8600_v12, -1e+30  ;;  %v8980_v39 = vsel %vm2404_vm11, %v8561_v4, -1e+30  ;;  %vm2395_vm6 = vcmp.gt.f32.partialorder %v2231_v52, 0.0 }
 0x336   :  { %v2984_v15 = vrot.slane %v2983_v34, 4  ;;  %v1721_v55 = vrot.slane %v1720_v54, 4  ;;  %v3042_v58 = vrot.slane %v3041_v6, 1  ;;  %v8985_v0 = vmax.f32 %v3053_v26, %v2782_v24 }
 0x337   :  { %v1660_v12 = vrot.slane %v1659_v11, 2  ;;  %v2779_v7 = vsel %vm2395_vm6, %v8792_v27, -1e+30  ;;  %v3071_v63 = vmax.f32 %v8980_v39, %v8974_v3  ;;  %3926 = vbcast.lane.b32.xlu1 %v10608_v23, 272  ;;  %v10629_v28 = vmax.f32 %v10628_v21, -1e+30  ;;  %v935_v46 = vpop.permute.xlu1 %934  ;;  %v2259_v8 = vpop.permute.xlu0 %2258 }
 0x338   :  { %v2985_v16 = vmax.f32 %v2983_v34, %v2984_v15  ;;  %v1722_v4 = vmax.f32 %v1720_v54, %v1721_v55  ;;  %v3046_v41 = vmax.f32 %v3045_v51, %v2779_v7  ;;  %v10631_v26 = vmax.f32 %v10630_v40, -1e+30  ;;  %3892 = vbcast.lane.b32.xlu0 %v10567_v47, 280  ;;  %v4541_v51 = vld [vmem:[#allocation10] sm:$0xff]  ;;  %v4542_v54 = vld [vmem:[#allocation10 + $0x8] sm:$0xff] }
 0x339   :  { %v3100_v17 = vmax.f32 %v10629_v28, %v2980_v57  ;;  %v1661_v29 = vmax.f32 %v1659_v11, %v1660_v12  ;;  %v5498_v20 = vpack.c.bf16 %v4435_v35, %v4433_v1  ;;  %vm1063_vm7 = vcmp.gt.f32.partialorder %v935_v46, 0.0  ;;  %v4437_v55 = vld [vmem:[#allocation13 + $0x28] sm:$0xff]  ;;  %v10632_v7 = vld [vmem:[#allocation94_spill] sm:$0xff] }
 0x33a   :  { %v3095_v62 = vmax.f32 %v10631_v26, %v2935_v5  ;;  %v2986_v48 = vrot.slane %v2985_v16, 2  ;;  %v1723_v24 = vrot.slane %v1722_v4, 2  ;;  %v3047_v34 = vrot.slane %v3046_v41, 4  ;;  %v4439_v5 = vld [vmem:[#allocation13 + $0x38] sm:$0xff]  ;;  %v4441_v3 = vld [vmem:[#allocation13 + $0x48] sm:$0xff] }
 0x33b   :  { %v3043_v52 = vmax.f32 %v3041_v6, %v3042_v58  ;;  %vm2374_vm8 = vcmp.gt.f32.partialorder %v2147_v2, 0.0  ;;  %v1447_v15 = vsel %vm1063_vm7, %v8576_v49, -1e+30  ;;  %5499 = vmatprep.subr.bf16.mxu0 %v5498_v20  ;;  %v5500_v57 = vpack.c.bf16 %v4434_v32, %v4432_v56  ;;  %3960 = vbcast.lane.b32.xlu1 %v10632_v7, 264  ;;  %v2247_v6 = vpop.permute.xlu1 %2246  ;;  %v2135_v58 = vpop.permute.xlu0 %2134 }
 0x33c   :  { %v2987_v11 = vmax.f32 %v2985_v16, %v2986_v48  ;;  %v1724_v12 = vmax.f32 %v1722_v4, %v1723_v24  ;;  %v1729_v47 = vmax.f32 %v8948_v37, %v1447_v15  ;;  %vm2402_vm9 = vcmp.gt.f32.partialorder %v2259_v8, 0.0  ;;  %3956 = vbcast.lane.b32.xlu0 %v10632_v7, 256  ;;  %v4436_v4 = vld [vmem:[#allocation13 + $0x20] sm:$0xff] }
 0x33d   :  { %v1765_v1 = vmax.f32 %v8967_v10, -1e+30  ;;  %v3048_v35 = vmax.f32 %v3046_v41, %v3047_v34  ;;  %5501 = vmatpush1.bf16.msra.mxu0 %v5500_v57  ;;  %v9001_v49 = vpack.c.bf16 %v4542_v54, %v4541_v51  ;;  %v5502_v56 = vpack.c.bf16 %v4439_v5, %v4437_v55  ;;  %v4438_v41 = vld [vmem:[#allocation13 + $0x30] sm:$0xff]  ;;  %v4457_v10 = vld [vmem:[#allocation13 + $0xc8] sm:$0xff] }
 0x33e   :  { %v1662_v32 = vrot.slane %v1661_v29, 1  ;;  %v1730_v21 = vrot.slane %v1729_v47, 4  ;;  %v9005_v16 = vsel %vm9961_vm2, %v3095_v62, %v8939_v33  ;;  %v9009_v37 = vsel %vm9964_vm1, %v3100_v17, %v8943_v60 }
 0x33f   :  { %v2758_v28 = vsel %vm2374_vm8, %v8727_v53, -1e+30  ;;  %v2786_v40 = vsel %vm2402_vm9, %v8727_v53, -1e+30  ;;  %vm2399_vm10 = vcmp.gt.f32.partialorder %v2247_v6, 0.0  ;;  %vm2371_vm11 = vcmp.gt.f32.partialorder %v2135_v58, 0.0  ;;  %5531 = vmatprep.subr.bf16.mxu1 %v9001_v49  ;;  %5503 = vmatprep.subr.bf16.mxu0 %v5502_v56  ;;  %v2151_v20 = vpop.permute.xlu1 %2150  ;;  %v2275_v48 = vpop.permute.xlu0 %2274 }
 0x340   :  { %v10633_v33 = vmax.f32 %v8752_v18, -1e+30  ;;  %v2988_v62 = vrot.slane %v2987_v11, 1  ;;  %v1725_v60 = vrot.slane %v1724_v12, 1  ;;  %v1731_v17 = vmax.f32 %v1729_v47, %v1730_v21  ;;  %3812 = vbcast.lane.b32.xlu1 %v10611_v43, 272  ;;  %3778 = vbcast.lane.b32.xlu0 %v10609_v42, 280 }
 0x341   :  { %v3049_v46 = vrot.slane %v3048_v35, 2  ;;  %v2783_v2 = vsel %vm2399_vm10, %v8792_v27, -1e+30  ;;  %v2755_v8 = vsel %vm2371_vm11, %v8792_v27, -1e+30  ;;  %v5504_v24 = vpack.c.bf16 %v4438_v41, %v4436_v4  ;;  %v4544_v47 = vld [vmem:[#allocation10 + $0x18] sm:$0xff] }
 0x342   :  { %v9018_v26 = vmax.f32 %v10633_v33, %v3043_v52  ;;  %v9024_v34 = vmax.f32 %v1661_v29, %v1662_v32  ;;  %v10634_v18 = vmax.f32 %v8872_v50, %v8860_v22  ;;  %v1732_v54 = vrot.slane %v1731_v17, 2  ;;  %v4443_v33 = vld [vmem:[#allocation13 + $0x58] sm:$0xff] }
 0x343   :  { %v3063_v52 = vmax.f32 %v3062_v9, %v2786_v40  ;;  %v3055_v15 = vmax.f32 %v8985_v0, %v2783_v2  ;;  %v2992_v57 = vmax.f32 %v8958_v19, %v2755_v8  ;;  %vm2375_vm12 = vcmp.gt.f32.partialorder %v2151_v20, 0.0  ;;  %5505 = vmatpush1.bf16.msra.mxu0 %v5504_v24  ;;  %v2279_v9 = vpop.permute.xlu1 %2278  ;;  %v2263_v19 = vpop.permute.xlu0 %2262  ;;  %v4543_v0 = vld [vmem:[#allocation10 + $0x10] sm:$0xff]  ;;  %v4447_v24 = vld [vmem:[#allocation13 + $0x78] sm:$0xff] }
 0x344   :  { %v3000_v51 = vmax.f32 %v10634_v18, %v2758_v28  ;;  %vm2406_vm3 = vcmp.gt.f32.partialorder %v2275_v48, 0.0  ;;  %v2989_v42 = vmax.f32 %v2987_v11, %v2988_v62  ;;  %v9034_v55 = vmax.f32 %v1724_v12, %v1725_v60  ;;  %3945 = vbcast.lane.b32.xlu1 %v10627_v25, 272  ;;  %3911 = vbcast.lane.b32.xlu0 %v10583_v45, 280  ;;  %v4440_v62 = vld [vmem:[#allocation13 + $0x40] sm:$0xff]  ;;  %v4445_v48 = vld [vmem:[#allocation13 + $0x68] sm:$0xff] }
 0x345   :  { %v2759_v29 = vsel %vm2375_vm12, %v8792_v27, -1e+30  ;;  %v2790_v22 = vsel %vm2406_vm3, %v8727_v53, -1e+30  ;;  %v3050_v50 = vmax.f32 %v3048_v35, %v3049_v46  ;;  %v3056_v5 = vrot.slane %v3055_v15, 4 }
 0x346   :  { %v2993_v61 = vrot.slane %v2992_v57, 4  ;;  %v3001_v59 = vmax.f32 %v3000_v51, %v2759_v29  ;;  %v1733_v6 = vmax.f32 %v1731_v17, %v1732_v54  ;;  %v3072_v11 = vmax.f32 %v3071_v63, %v2790_v22  ;;  %v4545_v54 = vld [vmem:[#allocation10 + $0x20] sm:$0xff] }
 0x347   :  { %vm2407_vm4 = vcmp.gt.f32.partialorder %v2279_v9, 0.0  ;;  %vm2403_vm6 = vcmp.gt.f32.partialorder %v2263_v19, 0.0  ;;  %v3057_v53 = vmax.f32 %v3055_v15, %v3056_v5  ;;  %v10635_v56 = vmax.f32 %v8842_v31, -1e+30  ;;  %v3125_v40 = vpop.permute.xlu1 %3124  ;;  %v4442_v31 = vld [vmem:[#allocation13 + $0x50] sm:$0xff]  ;;  %v4444_v5 = vld [vmem:[#allocation13 + $0x60] sm:$0xff] }
 0x348   :  { %v2994_v12 = vmax.f32 %v2992_v57, %v2993_v61  ;;  %v3002_v58 = vrot.slane %v3001_v59, 4  ;;  %v2791_v35 = vsel %vm2407_vm4, %v8792_v27, -1e+30  ;;  %v2787_v21 = vsel %vm2403_vm6, %v8792_v27, -1e+30  ;;  %3930 = vbcast.lane.b32.xlu1 %v10608_v23, 280  ;;  %v3122_v27 = vpop.permute.xlu0 %3121 }
 0x349   :  { %v9046_v32 = vmax.f32 %v10635_v56, %v2989_v42  ;;  %v3073_v45 = vmax.f32 %v3072_v11, %v2791_v35  ;;  %v9050_v4 = vpack.c.bf16 %v4544_v47, %v4543_v0  ;;  %v3058_v39 = vrot.slane %v3057_v53, 2  ;;  %3797 = vbcast.lane.b32.xlu0 %v10596_v44, 280  ;;  %v4446_v61 = vld [vmem:[#allocation13 + $0x70] sm:$0xff]  ;;  %v4451_v35 = vld [vmem:[#allocation13 + $0x98] sm:$0xff] }
 0x34a   :  { %v2995_v63 = vrot.slane %v2994_v12, 2  ;;  %v3003_v41 = vmax.f32 %v3001_v59, %v3002_v58  ;;  %v3064_v28 = vmax.f32 %v3063_v52, %v2787_v21  ;;  %v3051_v60 = vrot.slane %v3050_v50, 1  ;;  %v4546_v52 = vld [vmem:[#allocation10 + $0x28] sm:$0xff]  ;;  %v4448_v21 = vld [vmem:[#allocation13 + $0x80] sm:$0xff] }
 0x34b   :  { %v1734_v17 = vrot.slane %v1733_v6, 1  ;;  %v3074_v46 = vrot.slane %v3073_v45, 4  ;;  %vm3133_vm7 = vcmp.eq.s32.totalorder %v3125_v40, 1  ;;  %v3059_v2 = vmax.f32 %v3057_v53, %v3058_v39  ;;  %v9056_v22 = vpop.permute.xlu1 %3130  ;;  %v4449_v58 = vld [vmem:[#allocation13 + $0x88] sm:$0xff] }
 0x34c   :  { %v2996_v23 = vmax.f32 %v2994_v12, %v2995_v63  ;;  %v3004_v8 = vrot.slane %v3003_v41, 2  ;;  %v3065_v20 = vrot.slane %v3064_v28, 4  ;;  %vm3132_vm8 = vcmp.eq.s32.totalorder %v3122_v27, 1  ;;  %3816 = vbcast.lane.b32.xlu1 %v10611_v43, 280  ;;  %v3128_v19 = vpop.permute.xlu0 %3127  ;;  %v4547_v12 = vld [vmem:[#allocation10 + $0x30] sm:$0xff] }
 0x34d   :  { %v3075_v18 = vmax.f32 %v3073_v45, %v3074_v46  ;;  %v5506_v44 = vpack.c.bf16 %v4443_v33, %v4441_v3  ;;  %v5508_v51 = vpack.c.bf16 %v4442_v31, %v4440_v62  ;;  %v3060_v15 = vrot.slane %v3059_v2, 1  ;;  %3964 = vbcast.lane.b32.xlu0 %v10632_v7, 272  ;;  %5221 = vmatprep.mubr.msk.f32.mxu1 %vm3132_vm8, %v8935_v30  ;;  %v4548_v45 = vld [vmem:[#allocation10 + $0x38] sm:$0xff]  ;;  %v4450_v3 = vld [vmem:[#allocation13 + $0x90] sm:$0xff]  ;;  %v4453_v31 = vld [vmem:[#allocation13 + $0xa8] sm:$0xff] }
 0x34e   :  { %v2997_v57 = vrot.slane %v2996_v23, 1  ;;  %v3005_v42 = vmax.f32 %v3003_v41, %v3004_v8  ;;  %v3066_v29 = vmax.f32 %v3064_v28, %v3065_v20  ;;  %v3052_v59 = vmax.f32 %v3050_v50, %v3051_v60  ;;  %5222 = vmatmul.mubr.msk.f32.vlgmr.msra.gmra.mrb[4].mxu1 %vm3133_vm7, %v9005_v16  ;;  %v4455_v60 = vld [vmem:[#allocation13 + $0xb8] sm:$0xff] }
 0x34f   :  { %v9058_v9 = vmax.f32 %v1733_v6, %v1734_v17  ;;  %v3076_v43 = vrot.slane %v3075_v18, 2  ;;  %5507 = vmatprep.subr.bf16.mxu0 %v5506_v44  ;;  %v5510_v0 = vpack.c.bf16 %v4447_v24, %v4445_v48  ;;  %5533 = vmatpush3.bf16.msra.mxu1 %v9001_v49  ;;  %v5538_v30 = vpack.c.bf16 %v4546_v52, %v4545_v54  ;;  %v9068_v41 = vpop.permute.xlu1 %3675  ;;  %v10638_v20 = vld [vmem:[#allocation97_spill] sm:$0xff]  ;;  %v4549_v54 = vld [vmem:[#allocation10 + $0x40] sm:$0xff]  ;;  %v4550_v52 = vld [vmem:[#allocation10 + $0x48] sm:$0xff] }
 0x350   :  { %v2998_v47 = vmax.f32 %v2996_v23, %v2997_v57  ;;  %v3006_v11 = vrot.slane %v3005_v42, 1  ;;  %v3067_v53 = vrot.slane %v3066_v29, 2  ;;  %5509 = vmatpush1.bf16.msra.mxu0 %v5508_v51  ;;  %v1759_v50 = vmax.f32 %v9024_v34, -1e+30  ;;  %3968 = vbcast.lane.b32.xlu1 %v10632_v7, 280  ;;  %v9074_v33 = vpop.permute.xlu0 %3671  ;;  %v4454_v23 = vld [vmem:[#allocation13 + $0xb0] sm:$0xff] }
 0x351   :  { %v3061_v6 = vmax.f32 %v3059_v2, %v3060_v15  ;;  %v3077_v56 = vmax.f32 %v3075_v18, %v3076_v43  ;;  %5535 = vmatprep.subr.bf16.mxu1 %v9050_v4  ;;  %v5512_v16 = vpack.c.bf16 %v4446_v61, %v4444_v5  ;;  %v1766_v39 = vmax.f32 %v9034_v55, -1e+30  ;;  %3949 = vbcast.lane.b32.xlu0 %v10627_v25, 280  ;;  %v10637_v2 = vld [vmem:[#allocation98_spill] sm:$0xff]  ;;  %v10640_v43 = vld [vmem:[#allocation95_spill] sm:$0xff] }
 0x352   :  { %v3007_v49 = vmax.f32 %v3005_v42, %v3006_v11  ;;  %v3068_v63 = vmax.f32 %v3066_v29, %v3067_v53  ;;  %v3102_v34 = vmax.f32 %v1758_v36, %v2998_v47  ;;  %v10636_v28 = vmax.f32 %v8854_v14, -1e+30  ;;  %5511 = vmatprep.subr.bf16.mxu0 %v5510_v0  ;;  %v10639_v29 = vld [vmem:[#allocation127_spill] sm:$0xff]  ;;  %v4463_v47 = vld [vmem:[#allocation13 + $0xf8] sm:$0xff] }
 0x353   :  { %v3078_v40 = vrot.slane %v3077_v56, 1  ;;  %v3193_v62 = vsel %vm9963_vm0, %v9046_v32, %v9009_v37  ;;  %v5514_v55 = vpack.c.bf16 %v4451_v35, %v4449_v58  ;;  %5537 = vmatpush3.bf16.msra.mxu1 %v9050_v4  ;;  %v5542_v38 = vpack.c.bf16 %v4548_v45, %v4547_v12  ;;  %v4452_v32 = vld [vmem:[#allocation13 + $0xa0] sm:$0xff]  ;;  %v9086_v4 = vpop.permute.xlu1 %3694  ;;  %v4461_v0 = vld [vmem:[#allocation13 + $0xe8] sm:$0xff]  ;;  %v4552_v12 = vld [vmem:[#allocation10 + $0x58] sm:$0xff] }
 0x354   :  { %v3108_v7 = vmax.f32 %v10636_v28, %v3052_v59  ;;  %v3069_v25 = vrot.slane %v3068_v63, 1  ;;  %v3103_v17 = vmax.f32 %v1759_v50, %v3007_v49  ;;  %5513 = vmatpush1.bf16.msra.mxu0 %v5512_v16  ;;  %v5516_v36 = vpack.c.bf16 %v4450_v3, %v4448_v21  ;;  %4394 = vperm.xlu1 %5677, %v10637_v2   ;;  %v9089_v18 = vpop.permute.xlu0 %3690  ;;  %v4456_v59 = vld [vmem:[#allocation13 + $0xc0] sm:$0xff]  ;;  %v4554_v21 = vld [vmem:[#allocation10 + $0x68] sm:$0xff]  ;;  %v4556_v28 = vld [vmem:[#allocation10 + $0x78] sm:$0xff] }
 0x355   :  { %v1767_v14 = vmax.f32 %v9058_v9, -1e+30  ;;  %v3109_v46 = vmax.f32 %v1765_v1, %v3061_v6  ;;  %v3079_v27 = vmax.f32 %v3077_v56, %v3078_v40  ;;  %v3194_v37 = vsel %vm9962_vm14, %v3102_v34, %v3193_v62  ;;  %5539 = vmatprep.subr.bf16.mxu1 %v5538_v30  ;;  %4391 = vperm.xlu0 %5676, %v10638_v20   ;;  %v4459_v1 = vld [vmem:[#allocation13 + $0xd8] sm:$0xff]  ;;  %v4458_v9 = vld [vmem:[#allocation13 + $0xd0] sm:$0xff]  ;;  %v4460_v50 = vld [vmem:[#allocation13 + $0xe0] sm:$0xff] }
 0x356   :  { %v3070_v8 = vmax.f32 %v3068_v63, %v3069_v25  ;;  %vm3134_vm9 = vcmp.eq.s32.totalorder %v3128_v19, 1  ;;  %v3195_v48 = vsel %vm9961_vm2, %v3103_v17, %v3194_v37  ;;  %5515 = vmatprep.subr.bf16.mxu0 %v5514_v55  ;;  %v5518_v24 = vpack.c.bf16 %v4455_v60, %v4453_v31  ;;  %v4462_v6 = vld [vmem:[#allocation13 + $0xf0] sm:$0xff]  ;;  %v5728_v31 = vld [vmem:[#allocation2] sm:$0xff] }
 0x357   :  { %5224 = vmatprep.mubr.msk.f32.mxu1 %vm3134_vm9, %v3195_v48  ;;  %v3111_v44 = vmax.f32 %v1767_v14, %v3079_v27  ;;  %v3198_v51 = vsel %vm9965_vm5, %v9018_v26, %v8952_v13  ;;  %5541 = vmatpush3.bf16.msra.mxu1 %v5538_v30  ;;  %v5520_v42 = vpack.c.bf16 %v4454_v23, %v4452_v32  ;;  %v9098_v19 = vpop.permute.xlu1 %3713  ;;  %vm3135_vm10 = vcmp.eq.s32.totalorder %v9056_v22, 1  ;;  %v4551_v30 = vld [vmem:[#allocation10 + $0x50] sm:$0xff]  ;;  %v4553_v22 = vld [vmem:[#allocation10 + $0x60] sm:$0xff] }
 0x358   :  { %v3110_v15 = vmax.f32 %v1766_v39, %v3070_v8  ;;  %v3199_v57 = vsel %vm9964_vm1, %v3108_v7, %v3198_v51  ;;  %5517 = vmatpush1.bf16.msra.mxu0 %v5516_v36  ;;  %3661 = vperm.xlu1 %5677, %v10639_v29   ;;  %v5522_v61 = vpack.c.bf16 %v4459_v1, %v4457_v10  ;;  %v9102_v11 = vpop.permute.xlu0 %3709  ;;  %v4555_v34 = vld [vmem:[#allocation10 + $0x70] sm:$0xff]  ;;  %v10641_v25 = vmov 0.0   ;;  %v5729_v36 = vld [vmem:[#allocation2 + $0x8] sm:$0xff] }
 0x359   :  { %v3200_v5 = vsel %vm9963_vm0, %v3109_v46, %v3199_v57  ;;  %5543 = vmatprep.subr.bf16.mxu1 %v5542_v38  ;;  %3656 = vperm.xlu0 %5676, %v10640_v43   ;;  %v5546_v26 = vpack.c.bf16 %v4550_v52, %v4549_v54  ;;  %v5524_v58 = vpack.c.bf16 %v4458_v9, %v4456_v59  ;;  %vm3971_vm11 = vcmp.gt.f32.partialorder %v9068_v41, 0.0 }
 0x35a   :  { %v3201_v13 = vsel %vm9962_vm14, %v3110_v15, %v3200_v5  ;;  %5519 = vmatprep.subr.bf16.mxu0 %v5518_v24  ;;  %v5526_v35 = vpack.c.bf16 %v4463_v47, %v4461_v0  ;;  %v5550_v16 = vpack.c.bf16 %v4552_v12, %v4551_v30  ;;  %v5528_v3 = vpack.c.bf16 %v4462_v6, %v4460_v50  ;;  %v4641_v50 = vld [vmem:[#allocation11] sm:$0xff]  ;;  %v4642_v6 = vld [vmem:[#allocation11 + $0x8] sm:$0xff] }
 0x35b   :  { %v3202_v53 = vsel %vm9961_vm2, %v3111_v44, %v3201_v13  ;;  %5545 = vmatpush3.bf16.msra.mxu1 %v5542_v38  ;;  %v9105_v56 = vpop.permute.xlu1 %3827  ;;  %v5554_v49 = vpack.c.bf16 %v4554_v21, %v4553_v22  ;;  %v5558_v40 = vpack.c.bf16 %v4556_v28, %v4555_v34  ;;  %v5562_v22 = vpack.c.bf16 %v4642_v6, %v4641_v50  ;;  %v4643_v21 = vld [vmem:[#allocation11 + $0x10] sm:$0xff]  ;;  %v4649_v6 = vld [vmem:[#allocation11 + $0x40] sm:$0xff] }
 0x35c   :  { %5225 = vmatmul.mubr.msk.f32.gmra.mrb[6].mxu1 %vm3135_vm10, %v3202_v53  ;;  %5521 = vmatpush1.bf16.msra.mxu0 %v5520_v42  ;;  %v9107_v45 = vpop.permute.xlu0 %3823  ;;  %vm3970_vm12 = vcmp.gt.f32.partialorder %v9074_v33, 0.0  ;;  %vm3975_vm3 = vcmp.gt.f32.partialorder %v9086_v4, 0.0  ;;  %vm3974_vm4 = vcmp.gt.f32.partialorder %v9089_v18, 0.0  ;;  %vm3979_vm6 = vcmp.gt.f32.partialorder %v9098_v19, 0.0 }
 0x35d   :  { %5523 = vmatprep.subr.bf16.mxu0 %v5522_v61  ;;  %5547 = vmatprep.subr.bf16.mxu1 %v5546_v26  ;;  %v9117_v55 = vpop.f32.mrb[12].mxu0  ;;  %vm3978_vm7 = vcmp.gt.f32.partialorder %v9102_v11, 0.0  ;;  %v10668_v11 = vld [vmem:[#allocation116_spill] sm:$0xff] }
 0x35e   :  { %v9119_v60 = vpop.f32.mrb[13].mxu0 }
 0x35f   :  { %5549 = vmatpush3.bf16.msra.mxu1 %v5546_v26  ;;  %v9109_v39 = vpop.permute.xlu1 %3846 }
 0x360   :  { %5525 = vmatpush1.bf16.msra.mxu0 %v5524_v58  ;;  %5551 = vmatprep.subr.bf16.mxu1 %v5550_v16  ;;  %v9111_v63 = vpop.permute.xlu0 %3842 }
 0x361   :  { %5527 = vmatprep.subr.bf16.mxu0 %v5526_v35 }
 0x363   :  { %5553 = vmatpush3.bf16.msra.mxu1 %v5550_v16  ;;  %v9113_v7 = vpop.permute.xlu1 %3698 }
 0x364   :  { %5529 = vmatpush1.bf16.msra.mxu0 %v5528_v3  ;;  %5555 = vmatprep.subr.bf16.mxu1 %v5554_v49  ;;  %v9115_v62 = vpop.permute.xlu0 %3679  ;;  %v4644_v3 = vld [vmem:[#allocation11 + $0x18] sm:$0xff] }
 0x365   :  { %5563 = vmatprep.subr.bf16.mxu0 %v5562_v22  ;;  %v5566_v28 = vpack.c.bf16 %v4644_v3, %v4643_v21  ;;  %v4651_v3 = vld [vmem:[#allocation11 + $0x50] sm:$0xff] }
 0x367   :  { %4529 = vmatmul.mubr.f32.vlgmr.msra.gmra.mrb[14].mxu0 %v5728_v31  ;;  %5557 = vmatpush3.bf16.msra.mxu1 %v5554_v49  ;;  %v9122_v17 = vpop.permute.xlu1 %3732  ;;  %v4645_v49 = vld [vmem:[#allocation11 + $0x20] sm:$0xff] }
 0x368   :  { %4534 = vmatprep.mubr.f32.mxu0 %v10641_v25  ;;  %5559 = vmatprep.subr.bf16.mxu1 %v5558_v40  ;;  %v9124_v38 = vpop.permute.xlu0 %3728 }
 0x369   :  { %5565 = vmatpush3.bf16.msra.mxu0 %v5562_v22  ;;  %vm3982_vm2 = vcmp.gt.f32.partialorder %v9124_v38, 0.0 }
 0x36a   :  { %5567 = vmatprep.subr.bf16.mxu0 %v5566_v28 }
 0x36b   :  { %4535 = vmatmul.mubr.f32.gmra.mrb[16].mxu0 %v5729_v36  ;;  %5561 = vmatpush3.bf16.msra.mxu1 %v5558_v40  ;;  %v9126_v14 = vpop.permute.xlu1 %3865  ;;  %v4646_v40 = vld [vmem:[#allocation11 + $0x28] sm:$0xff]  ;;  %v4647_v36 = vld [vmem:[#allocation11 + $0x30] sm:$0xff] }
 0x36c   :  { %v9128_v46 = vpop.permute.xlu0 %3861  ;;  %v5570_v25 = vpack.c.bf16 %v4646_v40, %v4645_v49  ;;  %v4652_v49 = vld [vmem:[#allocation11 + $0x58] sm:$0xff] }
 0x36d   :  { %5569 = vmatpush3.bf16.msra.mxu0 %v5566_v28  ;;  %v5582_v28 = vpack.c.bf16 %v4652_v49, %v4651_v3  ;;  %vm4010_vm14 = vcmp.gt.f32.partialorder %v9128_v46, 0.0 }
 0x36e   :  { %5571 = vmatprep.subr.bf16.mxu0 %v5570_v25 }
 0x36f   :  { %v9130_v27 = vpop.permute.xlu1 %3747 }
 0x370   :  { %v9132_v2 = vpop.permute.xlu0 %3717 }
 0x371   :  { %5573 = vmatpush3.bf16.msra.mxu0 %v5570_v25 }
 0x373   :  { %v9134_v37 = vpop.permute.xlu1 %3831 }
 0x374   :  { %v9136_v32 = vpop.permute.xlu0 %3751 }
 0x377   :  { %v9138_v23 = vpop.permute.xlu1 %3880 }
 0x378   :  { %v9140_v8 = vpop.permute.xlu0 %3850  ;;  %vm4014_vm0 = vcmp.gt.f32.partialorder %v9138_v23, 0.0  ;;  %v10672_v23 = vld [vmem:[#allocation114_spill] sm:$0xff] }
 0x379   :  { %10642 = vst [vmem:[#allocation118_spill] sm:$0xff] %v9140_v8  ;;  %v4655_v8 = vld [vmem:[#allocation11 + $0x70] sm:$0xff] }
 0x37b   :  { %v9142_v20 = vpop.permute.xlu1 %3683 }
 0x37c   :  { %v9144_v48 = vpop.permute.xlu0 %3884 }
 0x37f   :  { %v9146_v24 = vpop.permute.xlu1 %3736 }
 0x380   :  { %v9148_v10 = vpop.permute.xlu0 %3702 }
 0x383   :  { %v9150_v1 = vpop.permute.xlu1 %3770 }
 0x384   :  { %v9152_v44 = vpop.permute.xlu0 %3766 }
 0x387   :  { %v9154_v51 = vpop.permute.xlu1 %3899 }
 0x388   :  { %v9156_v54 = vpop.permute.xlu0 %3869 }
 0x389   :  { %10643 = vst [vmem:[#allocation117_spill] sm:$0xff] %v9156_v54 }
 0x38b   :  { %v9158_v52 = vpop.permute.xlu1 %3721 }
 0x38c   :  { %v9160_v15 = vpop.permute.xlu0 %3903 }
 0x38f   :  { %v9162_v57 = vpop.permute.xlu1 %3785 }
 0x390   :  { %v9164_v42 = vpop.permute.xlu0 %3755 }
 0x393   :  { %v9166_v29 = vpop.permute.xlu1 %3835 }
 0x394   :  { %10644 = vst [vmem:[#allocation34_spill] sm:$0xff] %v9166_v29  ;;  %v9168_v5 = vpop.permute.xlu0 %3789 }
 0x395   :  { %vm3995_vm8 = vcmp.gt.f32.partialorder %v9168_v5, 0.0 }
 0x397   :  { %v9170_v61 = vpop.permute.xlu1 %3888 }
 0x398   :  { %10645 = vst [vmem:[#allocation33_spill] sm:$0xff] %v9170_v61  ;;  %v9172_v59 = vpop.permute.xlu0 %3854 }
 0x399   :  { %10646 = vst [vmem:[#allocation99_spill] sm:$0xff] %v9172_v59  ;;  %v4650_v59 = vld [vmem:[#allocation11 + $0x48] sm:$0xff] }
 0x39a   :  { %v5578_v21 = vpack.c.bf16 %v4650_v59, %v4649_v6  ;;  %v4656_v59 = vld [vmem:[#allocation11 + $0x78] sm:$0xff] }
 0x39b   :  { %v9174_v9 = vpop.permute.xlu1 %3922 }
 0x39c   :  { %v9176_v43 = vpop.permute.xlu0 %3918  ;;  %vm4023_vm9 = vcmp.gt.f32.partialorder %v9174_v9, 0.0 }
 0x39d   :  { %vm4022_vm13 = vcmp.gt.f32.partialorder %v9176_v43, 0.0 }
 0x39f   :  { %v9178_v13 = vpop.permute.xlu1 %3774 }
 0x3a0   :  { %v9180_v26 = vpop.permute.xlu0 %3740 }
 0x3a3   :  { %v9182_v0 = vpop.permute.xlu1 %3808 }
 0x3a4   :  { %v9184_v47 = vpop.permute.xlu0 %3804  ;;  %vm3999_vm1 = vcmp.gt.f32.partialorder %v9182_v0, 0.0 }
 0x3a5   :  { %vm3998_vm5 = vcmp.gt.f32.partialorder %v9184_v47, 0.0 }
 0x3a7   :  { %v9186_v53 = vpop.permute.xlu1 %3907 }
 0x3a8   :  { %10647 = vst [vmem:[#allocation104_spill] sm:$0xff] %v9186_v53  ;;  %v9188_v30 = vpop.permute.xlu0 %3873  ;;  %v4648_v53 = vld [vmem:[#allocation11 + $0x38] sm:$0xff] }
 0x3a9   :  { %10648 = vst [vmem:[#allocation100_spill] sm:$0xff] %v9188_v30  ;;  %v5574_v50 = vpack.c.bf16 %v4648_v53, %v4647_v36  ;;  %v4654_v53 = vld [vmem:[#allocation11 + $0x68] sm:$0xff] }
 0x3ab   :  { %v9190_v12 = vpop.permute.xlu1 %3941  ;;  %5575 = vmatprep.subr.bf16.mxu0 %v5574_v50 }
 0x3ac   :  { %v9192_v58 = vpop.permute.xlu0 %3937  ;;  %5577 = vmatpush3.bf16.msra.mxu0 %v5574_v50  ;;  %v5590_v50 = vpack.c.bf16 %v4656_v59, %v4655_v8  ;;  %v9235_v8 = vld [vmem:[%s9712_s6] ss:$0 sm:$0xff] }
 0x3ad   :  { %5579 = vmatprep.subr.bf16.mxu0 %v5578_v21  ;;  %vm4026_vm10 = vcmp.gt.f32.partialorder %v9192_v58, 0.0 }
 0x3af   :  { %v9194_v35 = vpop.permute.xlu1 %3793 }
 0x3b0   :  { %v9196_v16 = vpop.permute.xlu0 %3759  ;;  %5581 = vmatpush3.bf16.msra.mxu0 %v5578_v21 }
 0x3b1   :  { %5583 = vmatprep.subr.bf16.mxu0 %v5582_v28 }
 0x3b3   :  { %v9198_v34 = vpop.permute.xlu1 %3926 }
 0x3b4   :  { %10649 = vst [vmem:[#allocation120_spill] sm:$0xff] %v9198_v34  ;;  %v9200_v31 = vpop.permute.xlu0 %3892  ;;  %5585 = vmatpush3.bf16.msra.mxu0 %v5582_v28 }
 0x3b5   :  { %10650 = vst [vmem:[#allocation29_spill] sm:$0xff] %v9200_v31  ;;  %v4653_v31 = vld [vmem:[#allocation11 + $0x60] sm:$0xff] }
 0x3b6   :  { %v5586_v25 = vpack.c.bf16 %v4654_v53, %v4653_v31 }
 0x3b7   :  { %v9202_v61 = vpop.permute.xlu1 %3960 }
 0x3b8   :  { %v9204_v30 = vpop.permute.xlu0 %3956  ;;  %5587 = vmatprep.subr.bf16.mxu0 %v5586_v25  ;;  %vm4031_vm15 = vcmp.gt.f32.partialorder %v9202_v61, 0.0 }
 0x3b9   :  { %5589 = vmatpush3.bf16.msra.mxu0 %v5586_v25 }
 0x3ba   :  { %5591 = vmatprep.subr.bf16.mxu0 %v5590_v50 }
 0x3bb   :  { %v9206_v54 = vpop.permute.xlu1 %3812 }
 0x3bc   :  { %v9208_v22 = vpop.permute.xlu0 %3778 }
 0x3bd   :  { %5593 = vmatpush3.bf16.msra.mxu0 %v5590_v50 }
 0x3bf   :  { %v9210_v40 = vpop.permute.xlu1 %3945 }
 0x3c0   :  { %10651 = vst [vmem:[#allocation46_spill] sm:$0xff] %v9210_v40  ;;  %v9212_v34 = vpop.permute.xlu0 %3911 }
 0x3c1   :  { %10652 = vst [vmem:[#allocation113_spill] sm:$0xff] %v9212_v34 }
 0x3c3   :  { %v9214_v36 = vpop.permute.xlu1 %3930 }
 0x3c4   :  { %10653 = vst [vmem:[#allocation112_spill] sm:$0xff] %v9214_v36  ;;  %v9216_v29 = vpop.permute.xlu0 %3797 }
 0x3c7   :  { %v9218_v6 = vpop.permute.xlu1 %3816 }
 0x3c8   :  { %v9220_v40 = vpop.permute.xlu0 %3964 }
 0x3cb   :  { %v9222_v34 = vpop.permute.xlu1 %3968 }
 0x3cc   :  { %v9224_v3 = vpop.permute.xlu0 %3949 }
 0x3d3   :  { %v9226_v21 = vpop.permute.xlu1 %4394 }
 0x3d4   :  { %10654 = vst [vmem:[#allocation32_spill] sm:$0xff] %v9226_v21  ;;  %v9228_v49 = vpop.permute.xlu0 %4391 }
 0x3d7   :  { %v3662_v31 = vpop.permute.xlu1 %3661 }
 0x3d8   :  { %v3665_v53 = vmul.f32 %v9117_v55, %v3662_v31  ;;  %v3657_v36 = vpop.permute.xlu0 %3656  ;;  %v10656_v31 = vld [vmem:[#allocation106_spill] sm:$0xff] }
 0x3d9   :  { %v3664_v28 = vmul.f32 %v3657_v36, %v9119_v60  ;;  %v10655_v60 = vld [vmem:[#allocation110_spill] sm:$0xff] }
 0x3db   :  { %5270 = vmatprep.mubr.f32.mxu1 %v3664_v28 }
 0x3dc   :  { %5271 = vmatmul.mubr.f32.vlgmr.msra.gmra.mrb[8].mxu1 %v3665_v53 }
 0x421   :  { %v5223_v25 = vpop.f32.mrb[4].mxu1 }
 0x422   :  { %v3539_v59 = vadd.f32 %v5223_v25, %v9235_v8  ;;  %v3533_v50 = vpop.f32.mrb[5].mxu1 }
 0x423   :  { %v3534_v55 = vadd.f32 %v9235_v8, %v3533_v50 }
 0x424   :  { %v3553_v36 = vadd.f32 %v3539_v59, %v10655_v60 }
 0x425   :  { %v3552_v53 = vadd.f32 %v3534_v55, %v10656_v31 }
 0x426   :  { %v9258_v28 = vmax.f32 %v3553_v36, 0.0 }
 0x427   :  { %v9266_v25 = vmax.f32 %v3552_v53, 0.0 }
 0x428   :  { %v9275_v59 = vsel %vm3971_vm11, %v9258_v28, -1e+30  ;;  %v9280_v50 = vsel %vm3975_vm3, %v9258_v28, -1e+30  ;;  %v9285_v55 = vsel %vm3979_vm6, %v9258_v28, -1e+30 }
 0x429   :  { %v9294_v41 = vsel %vm3970_vm12, %v9266_v25, -1e+30  ;;  %v9299_v4 = vsel %vm3974_vm4, %v9266_v25, -1e+30  ;;  %v9304_v19 = vsel %vm3978_vm7, %v9266_v25, -1e+30 }
 0x42a   :  { %vm4027_vm11 = vcmp.gt.f32.partialorder %v9190_v12, 0.0  ;;  %v9310_v60 = vsel %vm3982_vm2, %v9266_v25, -1e+30  ;;  %vm10657_vm12 = vcmp.gt.f32.partialorder %v9122_v17, 0.0  ;;  %vm10658_vm3 = vcmp.gt.f32.partialorder %v9130_v27, 0.0 }
 0x42b   :  { %v9315_v33 = vsel %vm10657_vm12, %v9258_v28, -1e+30  ;;  %v9320_v18 = vsel %vm10658_vm3, %v9266_v25, -1e+30  ;;  %vm10659_vm4 = vcmp.gt.f32.partialorder %v9136_v32, 0.0  ;;  %vm10660_vm2 = vcmp.gt.f32.partialorder %v9152_v44, 0.0 }
 0x42c   :  { %v9327_v36 = vsel %vm10659_vm4, %v9258_v28, -1e+30  ;;  %v9332_v38 = vsel %vm10660_vm2, %v9266_v25, -1e+30  ;;  %vm10661_vm6 = vcmp.gt.f32.partialorder %v9150_v1, 0.0  ;;  %vm3973_vm7 = vcmp.gt.f32.partialorder %v9142_v20, 0.0 }
 0x42d   :  { %v9337_v17 = vsel %vm10661_vm6, %v9258_v28, -1e+30  ;;  %vm3977_vm12 = vcmp.gt.f32.partialorder %v9148_v10, 0.0  ;;  %vm3981_vm3 = vcmp.gt.f32.partialorder %v9158_v52, 0.0  ;;  %vm10662_vm4 = vcmp.gt.f32.partialorder %v9162_v57, 0.0 }
 0x42e   :  { %v9347_v32 = vsel %vm10662_vm4, %v9266_v25, -1e+30  ;;  %v9352_v1 = vsel %vm3995_vm8, %v9258_v28, -1e+30  ;;  %v9357_v44 = vsel %vm3998_vm5, %v9266_v25, -1e+30 }
 0x42f   :  { %v9367_v57 = vsel %vm3999_vm1, %v9258_v28, -1e+30  ;;  %v5226_v0 = vpop.f32.mrb[6].mxu1  ;;  %vm10663_vm1 = vcmp.gt.f32.partialorder %v9107_v45, 0.0  ;;  %vm10664_vm5 = vcmp.gt.f32.partialorder %v9105_v56, 0.0  ;;  %vm3992_vm8 = vcmp.gt.f32.partialorder %v9178_v13, 0.0 }
 0x430   :  { %v9386_v47 = vsel %vm10663_vm1, %v9266_v25, -1e+30  ;;  %v9391_v53 = vsel %vm10664_vm5, %v9258_v28, -1e+30  ;;  %vm3989_vm2 = vcmp.gt.f32.partialorder %v9196_v16, 0.0  ;;  %v3549_v5 = vadd.f32 %v5226_v0, %v9235_v8  ;;  %v3543_v31 = vpop.f32.mrb[7].mxu1 }
 0x431   :  { %vm10665_vm1 = vcmp.gt.f32.partialorder %v9111_v63, 0.0  ;;  %vm10666_vm5 = vcmp.gt.f32.partialorder %v9109_v39, 0.0  ;;  %vm3996_vm4 = vcmp.gt.f32.partialorder %v9194_v35, 0.0  ;;  %vm4000_vm6 = vcmp.gt.f32.partialorder %v9206_v54, 0.0 }
 0x432   :  { %v9401_v45 = vsel %vm10665_vm1, %v9266_v25, -1e+30  ;;  %v9406_v56 = vsel %vm10666_vm5, %v9258_v28, -1e+30  ;;  %v3544_v0 = vadd.f32 %v9235_v8, %v3543_v31  ;;  %v9416_v63 = vsel %vm4010_vm14, %v9266_v25, -1e+30 }
 0x433   :  { %vm10667_vm1 = vcmp.gt.f32.partialorder %v9126_v14, 0.0  ;;  %v9426_v27 = vsel %vm4014_vm0, %v9266_v25, -1e+30  ;;  %v3555_v21 = vadd.f32 %v3549_v5, %v10668_v11  ;;  %vm10669_vm5 = vcmp.gt.f32.partialorder %v9144_v48, 0.0 }
 0x434   :  { %v9421_v39 = vsel %vm10667_vm1, %v9258_v28, -1e+30  ;;  %v9432_v8 = vsel %vm10669_vm5, %v9258_v28, -1e+30  ;;  %vm10670_vm14 = vcmp.gt.f32.partialorder %v9154_v51, 0.0  ;;  %vm10671_vm1 = vcmp.gt.f32.partialorder %v9160_v15, 0.0 }
 0x435   :  { %v9437_v46 = vsel %vm10670_vm14, %v9266_v25, -1e+30  ;;  %v9442_v14 = vsel %vm10671_vm1, %v9258_v28, -1e+30  ;;  %v3554_v31 = vadd.f32 %v3544_v0, %v10672_v23  ;;  %v9448_v11 = vsel %vm4022_vm13, %v9266_v25, -1e+30 }
 0x436   :  { %v9453_v48 = vsel %vm4023_vm9, %v9258_v28, -1e+30  ;;  %v9458_v51 = vsel %vm4026_vm10, %v9266_v25, -1e+30  ;;  %v9460_v15 = vmax.f32 %v3555_v21, 0.0  ;;  %vm10673_vm13 = vcmp.gt.f32.partialorder %v9204_v30, 0.0 }
 0x437   :  { %v9465_v5 = vsel %vm4027_vm11, %v9258_v28, -1e+30  ;;  %v9470_v43 = vsel %vm10673_vm13, %v9266_v25, -1e+30  ;;  %v9474_v0 = vmax.f32 %v3554_v31, 0.0  ;;  %vm10675_vm0 = vcmp.gt.f32.partialorder %v9113_v7, 0.0 }
 0x438   :  { %v9479_v58 = vsel %vm4031_vm15, %v9258_v28, -1e+30  ;;  %v4165_v30 = vsel %vm3973_vm7, %v9460_v15, -1e+30  ;;  %v4169_v25 = vsel %vm3977_vm12, %v9460_v15, -1e+30  ;;  %v10680_v28 = vmax.f32 %v9294_v41, %v9275_v59 }
 0x439   :  { %v4173_v61 = vsel %vm3981_vm3, %v9460_v15, -1e+30  ;;  %vm10674_vm15 = vcmp.gt.f32.partialorder %v9115_v62, 0.0  ;;  %v4168_v20 = vsel %vm10675_vm0, %v9474_v0, -1e+30  ;;  %vm10676_vm9 = vcmp.gt.f32.partialorder %v9132_v2, 0.0 }
 0x43a   :  { %v4164_v23 = vsel %vm10674_vm15, %v9474_v0, -1e+30  ;;  %v4172_v10 = vsel %vm10676_vm9, %v9474_v0, -1e+30  ;;  %vm10677_vm10 = vcmp.gt.f32.partialorder %v9146_v24, 0.0  ;;  %vm10678_vm11 = vcmp.gt.f32.partialorder %v9180_v26, 0.0 }
 0x43b   :  { %v4176_v52 = vsel %vm10677_vm10, %v9474_v0, -1e+30  ;;  %v4177_v62 = vsel %vm10678_vm11, %v9460_v15, -1e+30  ;;  %vm10679_vm7 = vcmp.gt.f32.partialorder %v9164_v42, 0.0  ;;  %v4227_v2 = vmax.f32 %v10680_v28, %v4164_v23 }
 0x43c   :  { %v4180_v7 = vsel %vm10679_vm7, %v9474_v0, -1e+30  ;;  %v4181_v31 = vsel %vm3989_vm2, %v9460_v15, -1e+30  ;;  %v4184_v24 = vsel %vm3992_vm8, %v9474_v0, -1e+30  ;;  %v10682_v42 = vmax.f32 %v9299_v4, %v9280_v50 }
 0x43d   :  { %vm10681_vm12 = vcmp.gt.f32.partialorder %v9208_v22, 0.0  ;;  %v4188_v59 = vsel %vm3996_vm4, %v9474_v0, -1e+30  ;;  %vm10683_vm3 = vcmp.gt.f32.partialorder %v9216_v29, 0.0  ;;  %v4192_v13 = vsel %vm4000_vm6, %v9474_v0, -1e+30 }
 0x43e   :  { %v4185_v26 = vsel %vm10681_vm12, %v9460_v15, -1e+30  ;;  %v4236_v21 = vmax.f32 %v10682_v42, %v4168_v20  ;;  %v4189_v16 = vsel %vm10683_vm3, %v9460_v15, -1e+30  ;;  %v4228_v41 = vmax.f32 %v4227_v2, %v4165_v30  ;;  %v9549_v29 = vpop.f32.mrb[14].mxu0 }
 0x43f   :  { %vm10684_vm2 = vcmp.gt.f32.partialorder %v9218_v6, 0.0  ;;  %v10685_v50 = vmax.f32 %v9304_v19, %v9285_v55  ;;  %v10686_v35 = vmax.f32 %v9310_v60, %v9315_v33  ;;  %v10687_v54 = vmax.f32 %v9320_v18, %v9327_v36  ;;  %v9560_v19 = vpop.f32.mrb[15].mxu0 }
 0x440   :  { %v4193_v22 = vsel %vm10684_vm2, %v9460_v15, -1e+30  ;;  %v4237_v28 = vmax.f32 %v4236_v21, %v4169_v25  ;;  %v4229_v20 = vrot.slane %v4228_v41, 4  ;;  %v10688_v6 = vmax.f32 %v9332_v38, %v9337_v17  ;;  %10690 = vst [vmem:[#allocation42_spill] sm:$0xff] %v9560_v19 }
 0x441   :  { %v4245_v4 = vmax.f32 %v10685_v50, %v4172_v10  ;;  %v4254_v23 = vmax.f32 %v10686_v35, %v4176_v52  ;;  %v4263_v30 = vmax.f32 %v10687_v54, %v4180_v7  ;;  %v10689_v21 = vmax.f32 %v9347_v32, %v9352_v1  ;;  %v9565_v50 = vpop.f32.mrb[16].mxu0  ;;  %v10693_v54 = vld [vmem:[#allocation118_spill] sm:$0xff] }
 0x442   :  { %v4272_v2 = vmax.f32 %v10688_v6, %v4184_v24  ;;  %v4238_v25 = vrot.slane %v4237_v28, 4  ;;  %v10691_v10 = vmax.f32 %v9357_v44, %v9367_v57  ;;  %v4230_v42 = vmax.f32 %v4228_v41, %v4229_v20  ;;  %v9567_v1 = vpop.f32.mrb[17].mxu0 }
 0x443   :  { %v4281_v55 = vmax.f32 %v10689_v21, %v4188_v59  ;;  %v4246_v60 = vmax.f32 %v4245_v4, %v4173_v61  ;;  %v4255_v33 = vmax.f32 %v4254_v23, %v4177_v62  ;;  %v4264_v18 = vmax.f32 %v4263_v30, %v4181_v31  ;;  %10692 = vst [vmem:[#allocation121_spill] sm:$0xff] %v9567_v1  ;;  %v10694_v30 = vld [vmem:[#allocation34_spill] sm:$0xff] }
 0x444   :  { %v4290_v52 = vmax.f32 %v10691_v10, %v4192_v13  ;;  %v4273_v36 = vmax.f32 %v4272_v2, %v4185_v26  ;;  %v4239_v38 = vmax.f32 %v4237_v28, %v4238_v25  ;;  %v4231_v59 = vrot.slane %v4230_v42, 2  ;;  %v10695_v25 = vld [vmem:[#allocation117_spill] sm:$0xff]  ;;  %v10698_v10 = vld [vmem:[#allocation112_spill] sm:$0xff] }
 0x445   :  { %v4282_v7 = vmax.f32 %v4281_v55, %v4189_v16  ;;  %v4247_v17 = vrot.slane %v4246_v60, 4  ;;  %v4256_v24 = vrot.slane %v4255_v33, 4  ;;  %v4265_v35 = vrot.slane %v4264_v18, 4 }
 0x446   :  { %v4291_v32 = vmax.f32 %v4290_v52, %v4193_v22  ;;  %v4274_v61 = vrot.slane %v4273_v36, 4  ;;  %vm4004_vm6 = vcmp.gt.f32.partialorder %v9134_v37, 0.0  ;;  %v4240_v44 = vrot.slane %v4239_v38, 2 }
 0x447   :  { %v4283_v62 = vrot.slane %v4282_v7, 4  ;;  %v4248_v57 = vmax.f32 %v4246_v60, %v4247_v17  ;;  %v4257_v13 = vmax.f32 %v4255_v33, %v4256_v24  ;;  %v4232_v26 = vmax.f32 %v4230_v42, %v4231_v59  ;;  %v10696_v60 = vld [vmem:[#allocation99_spill] sm:$0xff]  ;;  %v10697_v33 = vld [vmem:[#allocation100_spill] sm:$0xff]  ;;  %v10701_v17 = vld [vmem:[#allocation29_spill] sm:$0xff] }
 0x448   :  { %v4292_v31 = vrot.slane %v4291_v32, 4  ;;  %v4266_v16 = vmax.f32 %v4264_v18, %v4265_v35  ;;  %v4275_v41 = vmax.f32 %v4273_v36, %v4274_v61  ;;  %v4241_v28 = vmax.f32 %v4239_v38, %v4240_v44  ;;  %v10700_v38 = vld [vmem:[#allocation104_spill] sm:$0xff] }
 0x449   :  { %v4284_v4 = vmax.f32 %v4282_v7, %v4283_v62  ;;  %v4249_v23 = vrot.slane %v4248_v57, 2  ;;  %v4258_v20 = vrot.slane %v4257_v13, 2  ;;  %vm4008_vm4 = vcmp.gt.f32.partialorder %v10693_v54, 0.0  ;;  %v10699_v7 = vld [vmem:[#allocation33_spill] sm:$0xff]  ;;  %v10702_v61 = vld [vmem:[#allocation120_spill] sm:$0xff] }
 0x44a   :  { %v4293_v22 = vmax.f32 %v4291_v32, %v4292_v31  ;;  %vm4005_vm8 = vcmp.gt.f32.partialorder %v10694_v30, 0.0  ;;  %v4233_v6 = vrot.slane %v4232_v26, 1  ;;  %v4267_v2 = vrot.slane %v4266_v16, 2  ;;  %v10703_v62 = vld [vmem:[#allocation113_spill] sm:$0xff] }
 0x44b   :  { %v4276_v21 = vrot.slane %v4275_v41, 2  ;;  %v4285_v55 = vrot.slane %v4284_v4, 2  ;;  %vm4012_vm5 = vcmp.gt.f32.partialorder %v10695_v25, 0.0  ;;  %vm4009_vm14 = vcmp.gt.f32.partialorder %v10696_v60, 0.0 }
 0x44c   :  { %vm4013_vm1 = vcmp.gt.f32.partialorder %v10697_v33, 0.0  ;;  %vm4025_vm13 = vcmp.gt.f32.partialorder %v10698_v10, 0.0  ;;  %v4242_v52 = vrot.slane %v4241_v28, 1  ;;  %v4250_v42 = vmax.f32 %v4248_v57, %v4249_v23  ;;  %v10704_v23 = vld [vmem:[#allocation46_spill] sm:$0xff] }
 0x44d   :  { %v4259_v18 = vmax.f32 %v4257_v13, %v4258_v20  ;;  %v4294_v36 = vrot.slane %v4293_v22, 2  ;;  %vm4016_vm15 = vcmp.gt.f32.partialorder %v10699_v7, 0.0  ;;  %vm4020_vm0 = vcmp.gt.f32.partialorder %v10700_v38, 0.0 }
 0x44e   :  { %vm4017_vm9 = vcmp.gt.f32.partialorder %v10701_v17, 0.0  ;;  %vm4029_vm11 = vcmp.gt.f32.partialorder %v9224_v3, 0.0  ;;  %v4234_v24 = vmax.f32 %v4232_v26, %v4233_v6  ;;  %v4268_v32 = vmax.f32 %v4266_v16, %v4267_v2 }
 0x44f   :  { %v4277_v59 = vmax.f32 %v4275_v41, %v4276_v21  ;;  %v4286_v35 = vmax.f32 %v4284_v4, %v4285_v55  ;;  %vm4024_vm7 = vcmp.gt.f32.partialorder %v10702_v61, 0.0  ;;  %vm4021_vm12 = vcmp.gt.f32.partialorder %v10703_v62, 0.0 }
 0x450   :  { %v4243_v44 = vmax.f32 %v4241_v28, %v4242_v52  ;;  %v4251_v57 = vrot.slane %v4250_v42, 1  ;;  %v4260_v13 = vrot.slane %v4259_v18, 1  ;;  %v4295_v31 = vmax.f32 %v4293_v22, %v4294_v36 }
 0x451   :  { %vm4028_vm2 = vcmp.gt.f32.partialorder %v10704_v23, 0.0  ;;  %v4269_v20 = vrot.slane %v4268_v32, 1  ;;  %v4278_v12 = vrot.slane %v4277_v59, 1  ;;  %v4287_v9 = vrot.slane %v4286_v35, 1 }
 0x452   :  { %v4370_v19 = vmax.f32 %v4234_v24, -1e+30  ;;  %v4252_v26 = vmax.f32 %v4250_v42, %v4251_v57  ;;  %v4261_v16 = vmax.f32 %v4259_v18, %v4260_v13  ;;  %v4296_v41 = vrot.slane %v4295_v31, 1 }
 0x453   :  { %v4371_v4 = vmax.f32 %v4243_v44, -1e+30  ;;  %v4270_v6 = vmax.f32 %v4268_v32, %v4269_v20  ;;  %v4279_v2 = vmax.f32 %v4277_v59, %v4278_v12  ;;  %v4288_v21 = vmax.f32 %v4286_v35, %v4287_v9 }
 0x454   :  { %v4196_v28 = vsel %vm4004_vm6, %v9474_v0, -1e+30  ;;  %v4297_v22 = vmax.f32 %v4295_v31, %v4296_v41  ;;  %v4372_v55 = vmax.f32 %v4252_v26, -1e+30  ;;  %v4373_v52 = vmax.f32 %v4261_v16, -1e+30 }
 0x455   :  { %vm10705_vm3 = vcmask 1041409   ;;  %v4374_v1 = vmax.f32 %v4270_v6, -1e+30  ;;  %v4375_v24 = vmax.f32 %v4279_v2, -1e+30  ;;  %v10706_v18 = vmax.f32 %v9386_v47, %v9391_v53 }
 0x456   :  { %v4414_v36 = vsel %vm10705_vm3, %v4371_v4, %v4370_v19  ;;  %v4376_v42 = vmax.f32 %v4288_v21, -1e+30  ;;  %v4377_v57 = vmax.f32 %v4297_v22, -1e+30  ;;  %vm10707_vm10 = vcmask 1042434  }
 0x457   :  { %v4299_v44 = vmax.f32 %v10706_v18, %v4196_v28  ;;  %v4415_v12 = vsel %vm10707_vm10, %v4372_v55, %v4414_v36  ;;  %v4197_v37 = vsel %vm4005_vm8, %v9460_v15, -1e+30  ;;  %v4200_v9 = vsel %vm4008_vm4, %v9474_v0, -1e+30 }
 0x458   :  { %vm10708_vm6 = vcmask 1043459   ;;  %v4201_v32 = vsel %vm4009_vm14, %v9460_v15, -1e+30  ;;  %v4204_v47 = vsel %vm4012_vm5, %v9474_v0, -1e+30  ;;  %vm10709_vm10 = vcmask 1044484  }
 0x459   :  { %v4416_v19 = vsel %vm10708_vm6, %v4373_v52, %v4415_v12  ;;  %v4205_v53 = vsel %vm4013_vm1, %v9460_v15, -1e+30  ;;  %v4208_v54 = vsel %vm4016_vm15, %v9474_v0, -1e+30  ;;  %v4209_v59 = vsel %vm4017_vm9, %v9460_v15, -1e+30  ;;  %vm10721_vm15 = vmmov %vm10705_vm3 }
 0x45a   :  { %v4417_v30 = vsel %vm10709_vm10, %v4374_v1, %v4416_v19  ;;  %v4212_v60 = vsel %vm4020_vm0, %v9474_v0, -1e+30  ;;  %vm10710_vm4 = vcmask 1045509   ;;  %v4213_v33 = vsel %vm4021_vm12, %v9460_v15, -1e+30  ;;  %vm10723_vm9 = vmmov %vm10708_vm6 }
 0x45b   :  { %v4418_v25 = vsel %vm10710_vm4, %v4375_v24, %v4417_v30  ;;  %v4216_v1 = vsel %vm4024_vm7, %v9474_v0, -1e+30  ;;  %v4217_v7 = vsel %vm4025_vm13, %v9460_v15, -1e+30  ;;  %vm10711_vm8 = vcmask 1046534   ;;  %vm10725_vm7 = vmmov %vm10710_vm4 }
 0x45c   :  { %v4419_v17 = vsel %vm10711_vm8, %v4376_v42, %v4418_v25  ;;  %v4220_v38 = vsel %vm4028_vm2, %v9474_v0, -1e+30  ;;  %v4221_v35 = vsel %vm4029_vm11, %v9460_v15, -1e+30  ;;  %vm10712_vm5 = vcmp.gt.f32.partialorder %v9220_v40, 0.0  ;;  %vm10724_vm11 = vmmov %vm10709_vm10 }
 0x45d   :  { %v4224_v62 = vsel %vm10712_vm5, %v9474_v0, -1e+30  ;;  %vm10713_vm14 = vcmask 1047559   ;;  %vm10714_vm1 = vcmp.gt.f32.partialorder %v9222_v34, 0.0  ;;  %v4300_v13 = vmax.f32 %v4299_v44, %v4197_v37  ;;  %vm10726_vm12 = vmmov %vm10711_vm8 }
 0x45e   :  { %v4420_v61 = vsel %vm10713_vm14, %v4377_v57, %v4419_v17  ;;  %v4225_v10 = vsel %vm10714_vm1, %v9460_v15, -1e+30  ;;  %v10715_v31 = vmax.f32 %v9401_v45, %v9406_v56  ;;  %vm10716_vm13 = vcmp.eq.s32.totalorder %v9228_v49, 1  ;;  %vm10728_vm2 = vmmov %vm10713_vm14 }
 0x45f   :  { %5305 = vmatprep.mubr.msk.f32.mxu0 %vm10716_vm13, %v4420_v61  ;;  %v10717_v3 = vmax.f32 %v9416_v63, %v9421_v39  ;;  %v10718_v40 = vmax.f32 %v9426_v27, %v9432_v8  ;;  %v10719_v34 = vmax.f32 %v9437_v46, %v9442_v14  ;;  %v10720_v26 = vmax.f32 %v9448_v11, %v9453_v48  ;;  %v4758_v61 = vld [vmem:[#allocation16 + $0x8] sm:$0xff] }
 0x460   :  { %v4308_v23 = vmax.f32 %v10715_v31, %v4200_v9  ;;  %v4301_v56 = vrot.slane %v4300_v13, 4  ;;  %v4352_v49 = vmax.f32 %v9458_v51, %v9465_v5  ;;  %v4361_v63 = vmax.f32 %v9470_v43, %v9479_v58 }
 0x461   :  { %v4317_v20 = vmax.f32 %v10717_v3, %v4204_v47  ;;  %v4326_v0 = vmax.f32 %v10718_v40, %v4208_v54  ;;  %v4335_v15 = vmax.f32 %v10719_v34, %v4212_v60  ;;  %v4344_v45 = vmax.f32 %v10720_v26, %v4216_v1  ;;  %v4759_v3 = vld [vmem:[#allocation16 + $0x10] sm:$0xff] }
 0x462   :  { %v4309_v16 = vmax.f32 %v4308_v23, %v4201_v32  ;;  %v4302_v4 = vmax.f32 %v4300_v13, %v4301_v56  ;;  %v4353_v46 = vmax.f32 %v4352_v49, %v4220_v38  ;;  %v4362_v14 = vmax.f32 %v4361_v63, %v4224_v62  ;;  %v4757_v62 = vld [vmem:[#allocation16] sm:$0xff] }
 0x463   :  { %v4318_v39 = vmax.f32 %v4317_v20, %v4205_v53  ;;  %v4327_v41 = vmax.f32 %v4326_v0, %v4209_v59  ;;  %v4336_v27 = vmax.f32 %v4335_v15, %v4213_v33  ;;  %v4345_v8 = vmax.f32 %v4344_v45, %v4217_v7  ;;  %v4760_v20 = vld [vmem:[#allocation16 + $0x18] sm:$0xff] }
 0x464   :  { %v4310_v6 = vrot.slane %v4309_v16, 4  ;;  %v4303_v28 = vrot.slane %v4302_v4, 2  ;;  %v4354_v55 = vmax.f32 %v4353_v46, %v4221_v35  ;;  %v4363_v52 = vmax.f32 %v4362_v14, %v4225_v10 }
 0x465   :  { %v4319_v2 = vrot.slane %v4318_v39, 4  ;;  %v4328_v21 = vrot.slane %v4327_v41, 4  ;;  %v4337_v11 = vrot.slane %v4336_v27, 4  ;;  %v4346_v48 = vrot.slane %v4345_v8, 4 }
 0x466   :  { %v4311_v22 = vmax.f32 %v4309_v16, %v4310_v6  ;;  %v4304_v58 = vmax.f32 %v4302_v4, %v4303_v28  ;;  %v4355_v42 = vrot.slane %v4354_v55, 4  ;;  %v4364_v18 = vrot.slane %v4363_v52, 4 }
 0x467   :  { %v4320_v51 = vmax.f32 %v4318_v39, %v4319_v2  ;;  %v4329_v5 = vmax.f32 %v4327_v41, %v4328_v21  ;;  %v4338_v36 = vmax.f32 %v4336_v27, %v4337_v11  ;;  %v4347_v43 = vmax.f32 %v4345_v8, %v4346_v48  ;;  %v4761_v39 = vld [vmem:[#allocation16 + $0x20] sm:$0xff]  ;;  %v4762_v41 = vld [vmem:[#allocation16 + $0x28] sm:$0xff] }
 0x468   :  { %v4312_v24 = vrot.slane %v4311_v22, 2  ;;  %v4305_v9 = vrot.slane %v4304_v58, 1  ;;  %v4356_v32 = vmax.f32 %v4354_v55, %v4355_v42  ;;  %v4365_v47 = vmax.f32 %v4363_v52, %v4364_v18  ;;  %v4764_v55 = vld [vmem:[#allocation16 + $0x38] sm:$0xff]  ;;  %v4766_v42 = vld [vmem:[#allocation16 + $0x48] sm:$0xff] }
 0x469   :  { %v4321_v44 = vrot.slane %v4320_v51, 2  ;;  %v4330_v57 = vrot.slane %v4329_v5, 2  ;;  %v4339_v12 = vrot.slane %v4338_v36, 2  ;;  %v4348_v37 = vrot.slane %v4347_v43, 2 }
 0x46a   :  { %v4313_v19 = vmax.f32 %v4311_v22, %v4312_v24  ;;  %v4306_v60 = vmax.f32 %v4304_v58, %v4305_v9  ;;  %v4357_v33 = vrot.slane %v4356_v32, 2  ;;  %v4366_v1 = vrot.slane %v4365_v47, 2  ;;  %v4763_v22 = vld [vmem:[#allocation16 + $0x30] sm:$0xff]  ;;  %v4765_v24 = vld [vmem:[#allocation16 + $0x40] sm:$0xff]  ;;  %v4770_v9 = vld [vmem:[#allocation16 + $0x68] sm:$0xff] }
 0x46b   :  { %v4322_v53 = vmax.f32 %v4320_v51, %v4321_v44  ;;  %v4331_v30 = vmax.f32 %v4329_v5, %v4330_v57  ;;  %v4340_v54 = vmax.f32 %v4338_v36, %v4339_v12  ;;  %v4349_v59 = vmax.f32 %v4347_v43, %v4348_v37  ;;  %v10727_v36 = vld [vmem:[#allocation32_spill] sm:$0xff]  ;;  %v4768_v57 = vld [vmem:[#allocation16 + $0x58] sm:$0xff]  ;;  %v4769_v37 = vld [vmem:[#allocation16 + $0x60] sm:$0xff] }
 0x46c   :  { %v4314_v25 = vrot.slane %v4313_v19, 1  ;;  %v4358_v13 = vmax.f32 %v4356_v32, %v4357_v33  ;;  %v4367_v31 = vmax.f32 %v4365_v47, %v4366_v1  ;;  %v4378_v23 = vmax.f32 %v4306_v60, -1e+30  ;;  %v4767_v44 = vld [vmem:[#allocation16 + $0x50] sm:$0xff]  ;;  %v4994_v32 = vld [vmem:[%s9717_s11] ss:$0 sm:$0xff] }
 0x46d   :  { %v4323_v7 = vrot.slane %v4322_v53, 1  ;;  %v4332_v17 = vrot.slane %v4331_v30, 1  ;;  %v4341_v38 = vrot.slane %v4340_v54, 1  ;;  %v4350_v35 = vrot.slane %v4349_v59, 1  ;;  %v4772_v33 = vld [vmem:[#allocation16 + $0x78] sm:$0xff] }
 0x46e   :  { %v4315_v10 = vmax.f32 %v4313_v19, %v4314_v25  ;;  %v4359_v26 = vrot.slane %v4358_v13, 1  ;;  %v4368_v45 = vrot.slane %v4367_v31, 1  ;;  %v5594_v16 = vpack.c.bf16 %v4758_v61, %v4757_v62  ;;  %v4771_v25 = vld [vmem:[#allocation16 + $0x70] sm:$0xff] }
 0x46f   :  { %v4324_v40 = vmax.f32 %v4322_v53, %v4323_v7  ;;  %v4333_v0 = vmax.f32 %v4331_v30, %v4332_v17  ;;  %v4342_v34 = vmax.f32 %v4340_v54, %v4341_v38  ;;  %v4351_v15 = vmax.f32 %v4349_v59, %v4350_v35  ;;  %v4741_v7 = vld [vmem:[#allocation14] sm:$0xff]  ;;  %v4742_v17 = vld [vmem:[#allocation14 + $0x8] sm:$0xff] }
 0x470   :  { %v4379_v56 = vmax.f32 %v4315_v10, -1e+30  ;;  %v5598_v63 = vpack.c.bf16 %v4760_v20, %v4759_v3  ;;  %v4360_v27 = vmax.f32 %v4358_v13, %v4359_v26  ;;  %v4369_v8 = vmax.f32 %v4367_v31, %v4368_v45  ;;  %5595 = vmatprep.subr.bf16.mxu1 %v5594_v16  ;;  %v4995_v35 = vld [vmem:[%s9719_s13] ss:$0 sm:$0xff]  ;;  %v4744_v31 = vld [vmem:[#allocation14 + $0x18] sm:$0xff]  ;;  %v4747_v26 = vld [vmem:[#allocation14 + $0x30] sm:$0xff] }
 0x471   :  { %v4380_v49 = vmax.f32 %v4324_v40, -1e+30  ;;  %v4381_v4 = vmax.f32 %v4333_v0, -1e+30  ;;  %v4382_v46 = vmax.f32 %v4342_v34, -1e+30  ;;  %5597 = vmatpush3.bf16.msra.mxu1 %v5594_v16  ;;  %v5602_v11 = vpack.c.bf16 %v4762_v41, %v4761_v39 }
 0x472   :  { %v4421_v6 = vsel %vm10721_vm15, %v4379_v56, %v4378_v23  ;;  %vm10722_vm0 = vcmask 1042434   ;;  %v4383_v2 = vmax.f32 %v4351_v15, -1e+30  ;;  %5599 = vmatprep.subr.bf16.mxu1 %v5598_v63  ;;  %v4384_v48 = vmax.f32 %v4360_v27, -1e+30  ;;  %v10730_v3 = vld [vmem:[#allocation42_spill] sm:$0xff] }
 0x473   :  { %v4422_v14 = vsel %vm10722_vm0, %v4380_v49, %v4421_v6  ;;  %v4385_v52 = vmax.f32 %v4369_v8, -1e+30  ;;  %vm4397_vm3 = vcmp.eq.s32.totalorder %v10727_v36, 1  ;;  %v5606_v58 = vpack.c.bf16 %v4764_v55, %v4763_v22  ;;  %v4745_v0 = vld [vmem:[#allocation14 + $0x20] sm:$0xff]  ;;  %v4746_v34 = vld [vmem:[#allocation14 + $0x28] sm:$0xff]  ;;  %v4748_v45 = vld [vmem:[#allocation14 + $0x38] sm:$0xff] }
 0x474   :  { %v4423_v21 = vsel %vm10723_vm9, %v4381_v4, %v4422_v14  ;;  %v5610_v18 = vpack.c.bf16 %v4766_v42, %v4765_v24  ;;  %v5614_v12 = vpack.c.bf16 %v4768_v57, %v4767_v44  ;;  %v5618_v19 = vpack.c.bf16 %v4770_v9, %v4769_v37  ;;  %v4749_v16 = vld [vmem:[#allocation14 + $0x40] sm:$0xff]  ;;  %v4750_v49 = vld [vmem:[#allocation14 + $0x48] sm:$0xff]  ;;  %v4751_v39 = vld [vmem:[#allocation14 + $0x50] sm:$0xff] }
 0x475   :  { %v4424_v28 = vsel %vm10724_vm11, %v4382_v46, %v4423_v21  ;;  %5601 = vmatpush3.bf16.msra.mxu1 %v5598_v63  ;;  %v5622_v1 = vpack.c.bf16 %v4772_v33, %v4771_v25  ;;  %v5626_v38 = vpack.c.bf16 %v4742_v17, %v4741_v7  ;;  %v5634_v15 = vpack.c.bf16 %v4746_v34, %v4745_v0  ;;  %v4752_v41 = vld [vmem:[#allocation14 + $0x58] sm:$0xff]  ;;  %v4753_v8 = vld [vmem:[#allocation14 + $0x60] sm:$0xff]  ;;  %v4754_v4 = vld [vmem:[#allocation14 + $0x68] sm:$0xff] }
 0x476   :  { %v4425_v51 = vsel %vm10725_vm7, %v4383_v2, %v4424_v28  ;;  %5603 = vmatprep.subr.bf16.mxu1 %v5602_v11  ;;  %v5638_v56 = vpack.c.bf16 %v4748_v45, %v4747_v26  ;;  %v5642_v63 = vpack.c.bf16 %v4750_v49, %v4749_v16  ;;  %v5646_v27 = vpack.c.bf16 %v4752_v41, %v4751_v39  ;;  %v4755_v46 = vld [vmem:[#allocation14 + $0x70] sm:$0xff]  ;;  %v4756_v14 = vld [vmem:[#allocation14 + $0x78] sm:$0xff] }
 0x477   :  { %v4426_v5 = vsel %vm10726_vm12, %v4384_v48, %v4425_v51  ;;  %v5650_v6 = vpack.c.bf16 %v4754_v4, %v4753_v8  ;;  %v5654_v2 = vpack.c.bf16 %v4756_v14, %v4755_v46  ;;  %v10731_v21 = vlaneseq  ;;  %v4998_v48 = vld [vmem:[%s9723_s17] ss:$0 sm:$0xff]  ;;  %s5977_s17 = smov [#allocation17]  }
 0x478   :  { %v4427_v43 = vsel %vm10728_vm2, %v4385_v52, %v4426_v5  ;;  %s4966_s16 = sshll.u32 %s5977_s17, 4  ;;  %s4967_s16 = int_to_ptr.vmem [resolvable:$true] %s4966_s16 }
 0x479   :  { %5306 = vmatmul.mubr.msk.f32.vlgmr.msra.gmra.mrb[18].mxu0 %vm4397_vm3, %v4427_v43  ;;  %5605 = vmatpush3.bf16.msra.mxu1 %v5602_v11  ;;  %v4933_v11 = vand.u32 127, %v10731_v21  ;;  %s5928_s19 = scalar_lea.vmem %s4967_s16, 256  ;;  %p5933_p3 = scmp.lt.s32.totalorder %s4967_s16, %s4967_s16 }
 0x47a   :  { %5607 = vmatprep.subr.bf16.mxu1 %v5606_v58  ;;  %p5929_p2 = scmp.ne.s32.totalorder %s4967_s16, %s5928_s19  ;;  %p5934_p4 = scmp.lt.s32.totalorder %s5928_s19, %s5928_s19 }
 0x47b   :  { %vm4934_vm6 = vcmp.lt.s32.totalorder %v4933_v11, 8 }
 0x47c   :  { %p5935_p5 = por %p5934_p4, %p5933_p3 }
 0x47d   :  { %5609 = vmatpush3.bf16.msra.mxu1 %v5606_v58 }
 0x47e   :  { %5611 = vmatprep.subr.bf16.mxu1 %v5610_v18  ;;  %p5936_p6 = pnand %p5935_p5, %p5929_p2 }
 0x481   :  { %5613 = vmatpush3.bf16.msra.mxu1 %v5610_v18 }
 0x482   :  { %5615 = vmatprep.subr.bf16.mxu1 %v5614_v12 }
 0x485   :  { %5617 = vmatpush3.bf16.msra.mxu1 %v5614_v12 }
 0x486   :  { %5619 = vmatprep.subr.bf16.mxu1 %v5618_v19 }
 0x489   :  { %5621 = vmatpush3.bf16.msra.mxu1 %v5618_v19 }
 0x48a   :  { %5623 = vmatprep.subr.bf16.mxu1 %v5622_v1 }
 0x48d   :  { %5625 = vmatpush3.bf16.msra.mxu1 %v5622_v1 }
 0x48e   :  { %5627 = vmatprep.subr.bf16.mxu1 %v5626_v38 }
 0x4af   :  { %v5272_v47 = vpop.f32.mrb[8].mxu1 }
 0x4b0   :  { %v4636_v53 = vadd.f32 %v5272_v47, %v4994_v32  ;;  %v4630_v30 = vpop.f32.mrb[9].mxu1 }
 0x4b1   :  { %v4631_v54 = vadd.f32 %v4994_v32, %v4630_v30 }
 0x4b2   :  { %v4640_v59 = vadd.f32 %v4636_v53, %v9565_v50  ;;  %v4743_v50 = vld [vmem:[#allocation14 + $0x10] sm:$0xff] }
 0x4b3   :  { %v4639_v60 = vadd.f32 %v4631_v54, %v9549_v29  ;;  %v10729_v29 = vld [vmem:[#allocation121_spill] sm:$0xff]  ;;  %v5630_v40 = vpack.c.bf16 %v4744_v31, %v4743_v50 }
 0x54c   :  { %v5307_v62 = vpop.f32.mrb[18].mxu0 }
 0x54d   :  { %v4736_v61 = vadd.f32 %v5307_v62, %v4995_v35  ;;  %v4730_v10 = vpop.f32.mrb[19].mxu0 }
 0x54e   :  { %v4731_v13 = vadd.f32 %v4995_v35, %v4730_v10 }
 0x54f   :  { %v4740_v23 = vadd.f32 %v4736_v61, %v10729_v29 }
 0x550   :  { %v4739_v20 = vadd.f32 %v4731_v13, %v10730_v3 }
 0x552   :  { %5340 = vmatprep.mubr.f32.mxu1 %v4739_v20 }
 0x553   :  { %5341 = vmatmul.mubr.f32.vlgmr.msra.gmra.mrb[10].mxu1 %v4740_v23 }
 0x554   :  { %5629 = vmatpush3.bf16.msra.mxu1 %v5626_v38  ;;  %5375 = vmatprep.mubr.f32.mxu1 %v4639_v60 }
 0x555   :  { %5631 = vmatprep.subr.bf16.mxu1 %v5630_v40 }
 0x558   :  { %5633 = vmatpush3.bf16.msra.mxu1 %v5630_v40 }
 0x559   :  { %5635 = vmatprep.subr.bf16.mxu1 %v5634_v15 }
 0x55c   :  { %5637 = vmatpush3.bf16.msra.mxu1 %v5634_v15 }
 0x55d   :  { %5639 = vmatprep.subr.bf16.mxu1 %v5638_v56 }
 0x560   :  { %5641 = vmatpush3.bf16.msra.mxu1 %v5638_v56 }
 0x561   :  { %5643 = vmatprep.subr.bf16.mxu1 %v5642_v63 }
 0x564   :  { %5645 = vmatpush3.bf16.msra.mxu1 %v5642_v63 }
 0x565   :  { %5647 = vmatprep.subr.bf16.mxu1 %v5646_v27 }
 0x568   :  { %5649 = vmatpush3.bf16.msra.mxu1 %v5646_v27 }
 0x569   :  { %5651 = vmatprep.subr.bf16.mxu1 %v5650_v6 }
 0x56c   :  { %5653 = vmatpush3.bf16.msra.mxu1 %v5650_v6 }
 0x56d   :  { %5655 = vmatprep.subr.bf16.mxu1 %v5654_v2 }
 0x570   :  { %5657 = vmatpush3.bf16.msra.mxu1 %v5654_v2 }
 0x573   :  { %5376 = vmatmul.mubr.f32.vlgmr.msra.gmra.mrb[10].mxu1 %v4640_v59 }
 0x646   :  { %v5377_v28 = vpop.f32.mrb[10].mxu1 }
 0x647   :  { %v4931_v22 = vadd.f32 %v5377_v28, %v4998_v48  ;;  %v4914_v55 = vpop.f32.mrb[11].mxu1 }
 0x648   :  { %v4930_v52 = vadd.f32 %v4998_v48, %v4914_v55 }
 0x649   :  { %v4936_v51 = vsel %vm4934_vm6, %v4931_v22, -1e+30 }
 0x64a   :  { %4939 = vmax.xlane.f32.xlu1 %v4936_v51  ;;  %v4935_v5 = vsel %vm4934_vm6, %v4930_v52, -1e+30 }
 0x64b   :  { %4937 = vmax.xlane.f32.xlu0 %v4935_v5 }
 0x6d7   :  { %v4940_v36 = vpop.xlane.xlu1 %4939 }
 0x6d8   :  { %v4942_v43 = vsub.f32 %v4936_v51, %v4940_v36  ;;  %v4938_v58 = vpop.xlane.xlu0 %4937 }
 0x6d9   :  { %v4941_v24 = vsub.f32 %v4935_v5, %v4938_v58 }
 0x6da   :  { %v4945_v42 = vmul.f32 1.442695, %v4942_v43 }
 0x6db   :  { %v4943_v18 = vmul.f32 1.442695, %v4941_v24 }
 0x6dd   :  { %5690 = vpow2.f32 %v4943_v18 }
 0x6de   :  { %5692 = vpow2.f32 %v4945_v42 }
 0x6e7   :  { %v5691_v44 = vpop.eup %5690 }
 0x6e8   :  { %v4947_v57 = vsel %vm4934_vm6, %v5691_v44, 0.0  ;;  %v5693_v12 = vpop.eup %5692 }
 0x6e9   :  { %4949 = vadd.xlane.f32.xlu0 %v4947_v57  ;;  %v4948_v37 = vsel %vm4934_vm6, %v5693_v12, 0.0 }
 0x6ed   :  { %4951 = vadd.xlane.f32.xlu0 %v4948_v37 }
 0x776   :  { %v4950_v9 = vpop.xlane.xlu0 %4949 }
 0x777   :  { %5694 = vlog2.f32 %v4950_v9 }
 0x77a   :  { %v4952_v19 = vpop.xlane.xlu0 %4951 }
 0x77b   :  { %5696 = vlog2.f32 %v4952_v19 }
 0x781   :  { %v5695_v32 = vpop.eup %5694 }
 0x782   :  { %v4954_v47 = vmul.f32 0.6931472, %v5695_v32 }
 0x784   :  { %v4957_v53 = vsub.f32 %v4941_v24, %v4954_v47 }
 0x785   :  { %v5697_v30 = vpop.eup %5696 }
 0x786   :  { %4959 = vst [vmem:[#allocation17] sm:$0xff] %v4957_v53  ;;  %v4956_v54 = vmul.f32 0.6931472, %v5697_v30 }
 0x788   :  { %v4958_v59 = vsub.f32 %v4942_v43, %v4956_v54 }
 0x78a   :  { %4960 = vst [vmem:[#allocation17 + $0x8] sm:$0xff] %v4958_v59 }
 0x78b   :  { %5939 = shalt.err (!%p5936_p6)
}
 0x78c   :  { %s5940_s12 = scalar_lea.hbm %s9724_s18, 256 }
 0x78d   :  { %p5941_p7 = scmp.ne.s32.totalorder %s9724_s18, %s5940_s12  ;;  %p5944_p8 = scmp.lt.u32.totalorder %s5940_s12, %s9724_s18 }
 0x78f   :  { %p5946_p9 = pnand %p5944_p8, %p5941_p7 }
 0x791   :  { %5949 = shalt.err (!%p5946_p9)
}
 0x792   :  { %4972 = dma.vmem_to_hbm [thread:$0]  %s4967_s16, 256, %s9724_s18, [#allocation4], %s9972_s23, %s9972_s23, %s9971_s30  }
 0x793   :  { %5960 = dma.done.wait [#allocation4], 256  }
 0x794   :  { %5961 = vsyncadd [#allocation4], 4294967040 }
 0x795   :  { %4976 = vsyncpa [#allocation3], 1 }
 0x796   :  { %4977 = vsyncpa [#allocation6], 1 }
 0x797   :  { %4978 = vsyncpa [#allocation9], 1 }
 0x798   :  { %4979 = vsyncpa [#allocation12], 1 }
 0x799   :  { %4980 = vsyncpa [#allocation15], 1 }
 0x79a   :  { %4981 = vsyncpa [#allocation4], 1 }

</bundles_post_ra>
